<compile_context>
chip_gen: v6e
topology: v6e:2x2x1
jax: 0.10.0
libtpu: 0.0.40
codegen_flags: <defaults>
</compile_context>

<pallas_src>
import functools

import jax
import jax.numpy as jnp
from jax import lax
from jax.experimental import pallas as pl
from jax.experimental.pallas import tpu as pltpu


def _sigmoid(x):
    # sigmoid(x) == 0.5 * tanh(0.5 * x) + 0.5  -> one EUP op per gate.
    return 0.5 * jnp.tanh(0.5 * x) + 0.5


# ----------------------------------------------------------------------------
# Kernel (single invocation; whole recurrence inside)
# ----------------------------------------------------------------------------
def _rnn_kernel(
    inputs_ref,                     # [steps, B, O] f32
    wih0_ref, b_ih0_ref,            # [O, 3H] f32, [1, 3H] f32
    whh0_ref, b_hh0_ref,            # [H, 3H] bf16, [1, 3H] f32
    w1_ref, b1_ref,                 # [2H, 4H] bf16, [1, 4H] f32
    w_out_ref, b_out_ref,           # [H, O] f32, [1, O] f32
    outputs_ref,                    # [steps, B, H]
    hidden_ref,                     # [2, B, H]
    probs_ref,                      # [steps, B, O]
    loss_ref,                       # [1, 1] scalar loss
    gi_scr,                         # VMEM [steps, B, 3H] f32 scratch
    *, H, O, B, steps,
):
    f32 = jnp.float32
    bf16 = jnp.bfloat16

    # ---- pre-pass: fused layer-0 input projection (step-independent).
    # Input at step i is initX()==zeros for i==0, else inputs[i-1]; stored
    # pre-shifted (with b_ih folded in) so the recurrence indexes at i.
    b_ih0 = b_ih0_ref[...]                                        # (1, 3H)
    x_flat = inputs_ref[...].reshape(steps * B, O)
    proj = jnp.dot(x_flat, wih0_ref[...], preferred_element_type=f32)
    proj = proj.reshape(steps, B, 3 * H)
    gi_scr[0] = jnp.broadcast_to(b_ih0, (B, 3 * H))               # zeros @ W + b_ih
    if steps > 1:
        gi_scr[pl.ds(1, steps - 1)] = proj[: steps - 1] + b_ih0

    # ---- hoist weight / bias loads out of the time loop
    whh0 = whh0_ref[...]            # (H, 3H)  bf16, gate cols [r | z | n]
    b_hh0 = b_hh0_ref[...]          # (1, 3H)
    w1 = w1_ref[...]                # (2H, 4H) bf16, cols [r | z | n_i | n_h]
    b1 = b1_ref[...]                # (1, 4H)

    h0 = jnp.zeros((B, H), f32)     # initHidden() == zeros
    h1 = jnp.zeros((B, H), f32)
    outs = []

    # steps is small & static -> fully unrolled straight-line recurrence.
    # Per step: one (B,H)x(H,3H) dot + one (B,2H)x(2H,4H) dot + gate math.
    for i in range(steps):
        # layer 0 (PyTorch gate order [r, z, n]; input proj precomputed)
        gi = gi_scr[i]                                            # has b_ih0
        gh = jnp.dot(h0.astype(bf16), whh0,
                     preferred_element_type=f32) + b_hh0          # has b_hh0
        r0 = _sigmoid(gi[:, 0:H] + gh[:, 0:H])
        z0 = _sigmoid(gi[:, H:2 * H] + gh[:, H:2 * H])
        n0 = jnp.tanh(gi[:, 2 * H:3 * H] + r0 * gh[:, 2 * H:3 * H])
        h0 = (1.0 - z0) * n0 + z0 * h0

        # nn.GRU dropout(p=0.01) between layers is identity in eval mode.
        # layer 1: single fused dot over [h0 | h1]
        lhs1 = jnp.concatenate([h0, h1], axis=1).astype(bf16)     # (B, 2H)
        g1 = jnp.dot(lhs1, w1, preferred_element_type=f32) + b1   # (B, 4H)
        r1 = _sigmoid(g1[:, 0:H])
        z1 = _sigmoid(g1[:, H:2 * H])
        n1 = jnp.tanh(g1[:, 2 * H:3 * H] + r1 * g1[:, 3 * H:4 * H])
        h1 = (1.0 - z1) * n1 + z1 * h1
        outs.append(h1)

    out_all = jnp.stack(outs, axis=0)                             # (steps, B, H)
    outputs_ref[...] = out_all                                    # one wide store
    hidden_ref[0] = h0
    hidden_ref[1] = h1

    # ---- post-pass head: batched over all steps (off the serial chain) ------
    flat = out_all.reshape(steps * B, H)
    logits = jnp.dot(flat, w_out_ref[...],
                     preferred_element_type=f32) + b_out_ref[...]  # (steps*B, O)
    shifted = logits - jnp.max(logits, axis=1, keepdims=True)
    e = jnp.exp(shifted)
    se = jnp.sum(e, axis=1, keepdims=True)
    probs = e * pl.reciprocal(se, approx=True)
    logp = shifted - jnp.log(se)
    probs_ref[...] = probs.reshape(steps, B, O)

    # targets = argmax(inputs[i], dim=1)  (first max wins, like torch)
    col = lax.broadcasted_iota(jnp.int32, (steps * B, O), 1)
    m = jnp.max(x_flat, axis=1, keepdims=True)
    tgt = jnp.min(jnp.where(x_flat >= m, col, O), axis=1, keepdims=True)
    onehot = col == tgt

    # torch.sum(losses) == -sum_{i,b} logp[b, t_b]  (the /B and the B-wide row
    # broadcast in the module cancel) -> one scalar, stored once.
    picked = jnp.sum(jnp.where(onehot, logp, 0.0), axis=1, keepdims=True)
    loss_ref[...] = -jnp.sum(picked, axis=0, keepdims=True)


# ----------------------------------------------------------------------------
# Wrapper
# ----------------------------------------------------------------------------
def rnn_forward(inputs, params, *, hidden_size, n_outcomes, batch, steps,
                num_layers=2):
    H, O, B = hidden_size, n_outcomes, batch
    assert num_layers == 2, "kernel implements the default 2-layer GRU"
    assert inputs.shape == (steps, B, O)
    f32, bf16 = jnp.float32, jnp.bfloat16

    # Layer 0: fused RHS slabs (K, 3H), gate columns [r | z | n].
    wih0 = params["w_ih_l0"].astype(f32).T                    # (O, 3H)
    whh0 = params["w_hh_l0"].astype(f32).T.astype(bf16)       # (H, 3H) bf16
    b_ih0 = params["b_ih_l0"].astype(f32).reshape(1, 3 * H)
    b_hh0 = params["b_hh_l0"].astype(f32).reshape(1, 3 * H)

    # Layer 1: single fused RHS (2H, 4H); LHS is [h0 | h1].
    # cols [0:H]=r (input+hidden), [H:2H]=z (input+hidden),
    # cols [2H:3H]=n input part only, [3H:4H]=n hidden part only.
    wih1 = params["w_ih_l1"].astype(f32).T                    # (H, 3H)
    whh1 = params["w_hh_l1"].astype(f32).T                    # (H, 3H)
    zHH = jnp.zeros((H, H), f32)
    w1_top = jnp.concatenate([wih1[:, :2 * H], wih1[:, 2 * H:], zHH], axis=1)
    w1_bot = jnp.concatenate([whh1[:, :2 * H], zHH, whh1[:, 2 * H:]], axis=1)
    w1 = jnp.concatenate([w1_top, w1_bot], axis=0).astype(bf16)   # (2H, 4H)
    b_ih1 = params["b_ih_l1"].astype(f32)
    b_hh1 = params["b_hh_l1"].astype(f32)
    b1 = jnp.concatenate([b_ih1[:2 * H] + b_hh1[:2 * H],
                          b_ih1[2 * H:], b_hh1[2 * H:]]).reshape(1, 4 * H)

    w_out = params["w_out"].astype(f32).T                     # (H, O)
    b_out = params["b_out"].astype(f32).reshape(1, O)

    def full_spec(shape):
        nd = len(shape)
        return pl.BlockSpec(shape, lambda i, _nd=nd: (0,) * _nd)

    kernel = functools.partial(_rnn_kernel, H=H, O=O, B=B, steps=steps)

    operands = (inputs.astype(f32), wih0, b_ih0, whh0, b_hh0,
                w1, b1, w_out, b_out)

    grid_spec = pltpu.PrefetchScalarGridSpec(
        num_scalar_prefetch=0,
        grid=(1,),                               # single invocation; recurrence
                                                 # runs fully inside the kernel
        in_specs=[full_spec(op.shape) for op in operands],
        out_specs=(
            full_spec((steps, B, H)),            # outputs
            full_spec((num_layers, B, H)),       # final hidden
            full_spec((steps, B, O)),            # outcome_probs
            full_spec((1, 1)),                   # scalar loss
        ),
        scratch_shapes=[pltpu.VMEM((steps, B, 3 * H), f32)],
    )

    outputs, hidden, probs, loss2d = pl.pallas_call(
        kernel,
        grid_spec=grid_spec,
        out_shape=(
            jax.ShapeDtypeStruct((steps, B, H), f32),
            jax.ShapeDtypeStruct((num_layers, B, H), f32),
            jax.ShapeDtypeStruct((steps, B, O), f32),
            jax.ShapeDtypeStruct((1, 1), f32),
        ),
        compiler_params=pltpu.CompilerParams(
            dimension_semantics=("arbitrary",)),
    )(*operands)

    loss = loss2d[0, 0]                    # == torch.sum(losses)
    inputX = jnp.zeros((1, B, O), f32)     # initX()
    return outputs, hidden, probs, loss, inputX


# ----------------------------------------------------------------------------
# Pure-JAX reference (for correctness check only; all-f32)
# ----------------------------------------------------------------------------
def rnn_forward_ref(inputs, params, *, hidden_size, n_outcomes, batch, steps,
                    num_layers=2):
    H, O, B, L = hidden_size, n_outcomes, batch, num_layers
    h = jnp.zeros((L, B, H), jnp.float32)
    outs, probs_all, losses = [], [], []
    for i in range(steps):
        x = jnp.zeros((B, O), jnp.float32) if i == 0 else inputs[i - 1]
        targets = jnp.argmax(inputs[i], axis=1)
        layer_in = x
        new_h = []
        for l in range(L):
            w_ih, w_hh = params[f"w_ih_l{l}"], params[f"w_hh_l{l}"]
            b_ih, b_hh = params[f"b_ih_l{l}"], params[f"b_hh_l{l}"]
            gi = layer_in @ w_ih.T + b_ih
            gh = h[l] @ w_hh.T + b_hh
            r = jax.nn.sigmoid(gi[:, :H] + gh[:, :H])
            z = jax.nn.sigmoid(gi[:, H:2 * H] + gh[:, H:2 * H])
            n = jnp.tanh(gi[:, 2 * H:] + r * gh[:, 2 * H:])
            hl = (1.0 - z) * n + z * h[l]
            new_h.append(hl)
            layer_in = hl
        h = jnp.stack(new_h)
        p = jax.nn.softmax(layer_in @ params["w_out"].T + params["b_out"], axis=1)
        loss_i = -jnp.sum(jnp.log(p)[jnp.arange(B), targets]) / B
        outs.append(layer_in)
        probs_all.append(p)
        losses.append(jnp.full((B,), loss_i))
    losses = jnp.stack(losses)
    return (jnp.stack(outs), h, jnp.stack(probs_all), jnp.sum(losses),
            jnp.zeros((1, B, O), jnp.float32))


# ----------------------------------------------------------------------------
# Deterministic parameter init (PyTorch-style uniform(-1/sqrt(H), 1/sqrt(H)))
# ----------------------------------------------------------------------------
def init_params(key, hidden_size, n_outcomes, num_layers=2):
    H, O, L = hidden_size, n_outcomes, num_layers
    bound = 1.0 / (H ** 0.5)
    keys = jax.random.split(key, 4 * L + 2)

    def u(k, shape):
        return jax.random.uniform(k, shape, jnp.float32, -bound, bound)

    p = {}
    in_sizes = [O] + [H] * (L - 1)
    for l in range(L):
        p[f"w_ih_l{l}"] = u(keys[4 * l + 0], (3 * H, in_sizes[l]))
        p[f"w_hh_l{l}"] = u(keys[4 * l + 1], (3 * H, H))
        p[f"b_ih_l{l}"] = u(keys[4 * l + 2], (3 * H,))
        p[f"b_hh_l{l}"] = u(keys[4 * l + 3], (3 * H,))
    p["w_out"] = u(keys[-2], (O, H))
    p["b_out"] = u(keys[-1], (O,))
    return p


# ----------------------------------------------------------------------------
if __name__ == "__main__":
    # small shapes consistent with the module: steps=8, batch=8, n_outcomes=4
    # (the "qubit outcome" alphabet), hidden=32, 2 GRU layers.
    STEPS, B, O, H, L = 8, 8, 4, 32, 2

    key = jax.random.PRNGKey(0)
    k_in, k_p = jax.random.split(key)
    inputs = jax.random.normal(k_in, (STEPS, B, O), jnp.float32)
    params = init_params(k_p, H, O, L)

    outputs, hidden, probs, loss, inputX = rnn_forward(
        inputs, params, hidden_size=H, n_outcomes=O, batch=B, steps=STEPS,
        num_layers=L)
    jax.block_until_ready((outputs, hidden, probs, loss, inputX))

    # correctness check against a pure-JAX f32 reference.  Tolerances account
    # for the bf16 recurrent-matmul operands (f32 accumulation / carried state)
    # and the approx-reciprocal softmax denominator.
    r_out, r_hid, r_probs, r_loss, _ = rnn_forward_ref(
        inputs, params, hidden_size=H, n_outcomes=O, batch=B, steps=STEPS,
        num_layers=L)
    assert outputs.shape == (STEPS, B, H)
    assert hidden.shape == (L, B, H)
    assert probs.shape == (STEPS, B, O)
    assert inputX.shape == (1, B, O)
    assert jnp.allclose(outputs, r_out, atol=2e-2, rtol=2e-2)
    assert jnp.allclose(hidden, r_hid, atol=2e-2, rtol=2e-2)
    assert jnp.allclose(probs, r_probs, atol=2e-2, rtol=2e-2)
    assert jnp.allclose(loss, r_loss, atol=0.5, rtol=2e-2)

    print("KERNEL_OK")
</pallas_src>

<mosaic_0001>
module attributes {stable_mosaic.version = 11 : i64} {
  func.func @_rnn_kernel(%arg0: i32, %arg1: memref<8x8x4xf32, #tpu.memory_space<vmem>>, %arg2: memref<4x96xf32, #tpu.memory_space<vmem>>, %arg3: memref<1x96xf32, #tpu.memory_space<vmem>>, %arg4: memref<32x96xbf16, #tpu.memory_space<vmem>>, %arg5: memref<1x96xf32, #tpu.memory_space<vmem>>, %arg6: memref<64x128xbf16, #tpu.memory_space<vmem>>, %arg7: memref<1x128xf32, #tpu.memory_space<vmem>>, %arg8: memref<32x4xf32, #tpu.memory_space<vmem>>, %arg9: memref<1x4xf32, #tpu.memory_space<vmem>>, %arg10: memref<8x8x32xf32, #tpu.memory_space<vmem>>, %arg11: memref<2x8x32xf32, #tpu.memory_space<vmem>>, %arg12: memref<8x8x4xf32, #tpu.memory_space<vmem>>, %arg13: memref<1x1xf32, #tpu.memory_space<vmem>>, %arg14: memref<8x8x96xf32, #tpu.memory_space<vmem>>) attributes {dimension_semantics = [#tpu.dimension_semantics<arbitrary>], iteration_bounds = array<i64: 1>, scalar_prefetch = 0 : i64, scratch_operands = 1 : i64, tpu.core_type = #tpu.core_type<tc>, window_params = [{pipeline_mode = #tpu.pipeline_mode<synchronous>, transform_indices = @transform_0, window_bounds = array<i64: 8, 8, 4>}, {pipeline_mode = #tpu.pipeline_mode<synchronous>, transform_indices = @transform_1, window_bounds = array<i64: 4, 96>}, {pipeline_mode = #tpu.pipeline_mode<synchronous>, transform_indices = @transform_2, window_bounds = array<i64: 1, 96>}, {pipeline_mode = #tpu.pipeline_mode<synchronous>, transform_indices = @transform_3, window_bounds = array<i64: 32, 96>}, {pipeline_mode = #tpu.pipeline_mode<synchronous>, transform_indices = @transform_4, window_bounds = array<i64: 1, 96>}, {pipeline_mode = #tpu.pipeline_mode<synchronous>, transform_indices = @transform_5, window_bounds = array<i64: 64, 128>}, {pipeline_mode = #tpu.pipeline_mode<synchronous>, transform_indices = @transform_6, window_bounds = array<i64: 1, 128>}, {pipeline_mode = #tpu.pipeline_mode<synchronous>, transform_indices = @transform_7, window_bounds = array<i64: 32, 4>}, {pipeline_mode = #tpu.pipeline_mode<synchronous>, transform_indices = @transform_8, window_bounds = array<i64: 1, 4>}, {pipeline_mode = #tpu.pipeline_mode<synchronous>, transform_indices = @transform_9, window_bounds = array<i64: 8, 8, 32>}, {pipeline_mode = #tpu.pipeline_mode<synchronous>, transform_indices = @transform_10, window_bounds = array<i64: 2, 8, 32>}, {pipeline_mode = #tpu.pipeline_mode<synchronous>, transform_indices = @transform_11, window_bounds = array<i64: 8, 8, 4>}, {pipeline_mode = #tpu.pipeline_mode<synchronous>, transform_indices = @transform_12, window_bounds = array<i64: 1, 1>}]} {
    %c0 = arith.constant 0 : index
    %c0_0 = arith.constant 0 : index
    %0 = vector.load %arg3[%c0, %c0_0] : memref<1x96xf32, #tpu.memory_space<vmem>>, vector<1x96xf32>
    %c0_1 = arith.constant 0 : index
    %c0_2 = arith.constant 0 : index
    %c0_3 = arith.constant 0 : index
    %1 = vector.load %arg1[%c0_1, %c0_2, %c0_3] : memref<8x8x4xf32, #tpu.memory_space<vmem>>, vector<8x8x4xf32>
    %2 = vector.shape_cast %1 : vector<8x8x4xf32> to vector<64x4xf32>
    %c0_4 = arith.constant 0 : index
    %c0_5 = arith.constant 0 : index
    %3 = vector.load %arg2[%c0_4, %c0_5] : memref<4x96xf32, #tpu.memory_space<vmem>>, vector<4x96xf32>
    %cst = arith.constant dense<0.000000e+00> : vector<64x96xf32>
    %4 = tpu.matmul %2, %3, %cst {dimension_numbers = #tpu.dot_dimension_numbers<[1], [0], [0], [1], [0, 0, 1, 1], [], []>} : vector<64x4xf32>, vector<4x96xf32>, vector<64x96xf32> -> vector<64x96xf32>
    %5 = vector.shape_cast %4 : vector<64x96xf32> to vector<8x8x96xf32>
    %6 = vector.shape_cast %0 : vector<1x96xf32> to vector<1x96xf32>
    %7 = vector.broadcast %6 : vector<1x96xf32> to vector<8x96xf32>
    %c0_6 = arith.constant 0 : index
    %c0_7 = arith.constant 0 : index
    %c0_8 = arith.constant 0 : index
    %8 = vector.load %arg14[%c0_6, %c0_7, %c0_8] : memref<8x8x96xf32, #tpu.memory_space<vmem>>, vector<1x8x96xf32>
    %9 = vector.shape_cast %8 : vector<1x8x96xf32> to vector<8x96xf32>
    %10 = vector.shape_cast %7 : vector<8x96xf32> to vector<1x8x96xf32>
    tpu.vector_store %arg14[%c0_6, %c0_7, %c0_8], %10 {strides = array<i32>} : memref<8x8x96xf32, #tpu.memory_space<vmem>>, vector<1x8x96xf32>,
    %11 = vector.extract_strided_slice %5 {offsets = [0, 0, 0], sizes = [7, 8, 96], strides = [1, 1, 1]} : vector<8x8x96xf32> to vector<7x8x96xf32>
    %12 = vector.shape_cast %0 : vector<1x96xf32> to vector<1x1x96xf32>
    %13 = vector.broadcast %12 : vector<1x1x96xf32> to vector<7x8x96xf32>
    %14 = arith.addf %11, %13 : vector<7x8x96xf32>
    %c1 = arith.constant 1 : index
    %c0_9 = arith.constant 0 : index
    %c0_10 = arith.constant 0 : index
    %15 = vector.load %arg14[%c1, %c0_9, %c0_10] : memref<8x8x96xf32, #tpu.memory_space<vmem>>, vector<7x8x96xf32>
    tpu.vector_store %arg14[%c1, %c0_9, %c0_10], %14 {strides = array<i32>} : memref<8x8x96xf32, #tpu.memory_space<vmem>>, vector<7x8x96xf32>,
    %c0_11 = arith.constant 0 : index
    %c0_12 = arith.constant 0 : index
    %16 = vector.load %arg4[%c0_11, %c0_12] : memref<32x96xbf16, #tpu.memory_space<vmem>>, vector<32x96xbf16>
    %c0_13 = arith.constant 0 : index
    %c0_14 = arith.constant 0 : index
    %17 = vector.load %arg5[%c0_13, %c0_14] : memref<1x96xf32, #tpu.memory_space<vmem>>, vector<1x96xf32>
    %c0_15 = arith.constant 0 : index
    %c0_16 = arith.constant 0 : index
    %18 = vector.load %arg6[%c0_15, %c0_16] : memref<64x128xbf16, #tpu.memory_space<vmem>>, vector<64x128xbf16>
    %c0_17 = arith.constant 0 : index
    %c0_18 = arith.constant 0 : index
    %19 = vector.load %arg7[%c0_17, %c0_18] : memref<1x128xf32, #tpu.memory_space<vmem>>, vector<1x128xf32>
    %cst_19 = arith.constant 0.000000e+00 : f32
    %20 = vector.broadcast %cst_19 : f32 to vector<8x32xf32>
    %cst_20 = arith.constant 0.000000e+00 : f32
    %21 = vector.broadcast %cst_20 : f32 to vector<8x32xf32>
    %c0_21 = arith.constant 0 : index
    %c0_22 = arith.constant 0 : index
    %c0_23 = arith.constant 0 : index
    %22 = vector.load %arg14[%c0_21, %c0_22, %c0_23] : memref<8x8x96xf32, #tpu.memory_space<vmem>>, vector<1x8x96xf32>
    %23 = vector.shape_cast %22 : vector<1x8x96xf32> to vector<8x96xf32>
    %24 = arith.truncf %20 : vector<8x32xf32> to vector<8x32xbf16>
    %cst_24 = arith.constant dense<0.000000e+00> : vector<8x96xf32>
    %25 = tpu.matmul %24, %16, %cst_24 {dimension_numbers = #tpu.dot_dimension_numbers<[1], [0], [0], [1], [0, 0, 1, 1], [], []>} : vector<8x32xbf16>, vector<32x96xbf16>, vector<8x96xf32> -> vector<8x96xf32>
    %26 = vector.broadcast %17 : vector<1x96xf32> to vector<8x96xf32>
    %27 = arith.addf %25, %26 : vector<8x96xf32>
    %28 = vector.extract_strided_slice %23 {offsets = [0, 0], sizes = [8, 32], strides = [1, 1]} : vector<8x96xf32> to vector<8x32xf32>
    %29 = vector.extract_strided_slice %27 {offsets = [0, 0], sizes = [8, 32], strides = [1, 1]} : vector<8x96xf32> to vector<8x32xf32>
    %30 = arith.addf %28, %29 : vector<8x32xf32>
    %cst_25 = arith.constant 5.000000e-01 : f32
    %31 = vector.broadcast %cst_25 : f32 to vector<8x32xf32>
    %32 = arith.mulf %31, %30 : vector<8x32xf32>
    %33 = math.tanh %32 : vector<8x32xf32>
    %cst_26 = arith.constant 5.000000e-01 : f32
    %34 = vector.broadcast %cst_26 : f32 to vector<8x32xf32>
    %35 = arith.mulf %34, %33 : vector<8x32xf32>
    %cst_27 = arith.constant 5.000000e-01 : f32
    %36 = vector.broadcast %cst_27 : f32 to vector<8x32xf32>
    %37 = arith.addf %35, %36 : vector<8x32xf32>
    %38 = vector.extract_strided_slice %23 {offsets = [0, 32], sizes = [8, 32], strides = [1, 1]} : vector<8x96xf32> to vector<8x32xf32>
    %39 = vector.extract_strided_slice %27 {offsets = [0, 32], sizes = [8, 32], strides = [1, 1]} : vector<8x96xf32> to vector<8x32xf32>
    %40 = arith.addf %38, %39 : vector<8x32xf32>
    %cst_28 = arith.constant 5.000000e-01 : f32
    %41 = vector.broadcast %cst_28 : f32 to vector<8x32xf32>
    %42 = arith.mulf %41, %40 : vector<8x32xf32>
    %43 = math.tanh %42 : vector<8x32xf32>
    %cst_29 = arith.constant 5.000000e-01 : f32
    %44 = vector.broadcast %cst_29 : f32 to vector<8x32xf32>
    %45 = arith.mulf %44, %43 : vector<8x32xf32>
    %cst_30 = arith.constant 5.000000e-01 : f32
    %46 = vector.broadcast %cst_30 : f32 to vector<8x32xf32>
    %47 = arith.addf %45, %46 : vector<8x32xf32>
    %48 = vector.extract_strided_slice %23 {offsets = [0, 64], sizes = [8, 32], strides = [1, 1]} : vector<8x96xf32> to vector<8x32xf32>
    %49 = vector.extract_strided_slice %27 {offsets = [0, 64], sizes = [8, 32], strides = [1, 1]} : vector<8x96xf32> to vector<8x32xf32>
    %50 = arith.mulf %37, %49 : vector<8x32xf32>
    %51 = arith.addf %48, %50 : vector<8x32xf32>
    %52 = math.tanh %51 : vector<8x32xf32>
    %cst_31 = arith.constant 1.000000e+00 : f32
    %53 = vector.broadcast %cst_31 : f32 to vector<8x32xf32>
    %54 = arith.subf %53, %47 : vector<8x32xf32>
    %55 = arith.mulf %54, %52 : vector<8x32xf32>
    %56 = arith.mulf %47, %20 : vector<8x32xf32>
    %57 = arith.addf %55, %56 : vector<8x32xf32>
    %58 = tpu.concatenate %57, %21 in 1 : vector<8x32xf32>, vector<8x32xf32> -> vector<8x64xf32>
    %59 = arith.truncf %58 : vector<8x64xf32> to vector<8x64xbf16>
    %cst_32 = arith.constant dense<0.000000e+00> : vector<8x128xf32>
    %60 = tpu.matmul %59, %18, %cst_32 {dimension_numbers = #tpu.dot_dimension_numbers<[1], [0], [0], [1], [0, 0, 1, 1], [], []>} : vector<8x64xbf16>, vector<64x128xbf16>, vector<8x128xf32> -> vector<8x128xf32>
    %61 = vector.broadcast %19 : vector<1x128xf32> to vector<8x128xf32>
    %62 = arith.addf %60, %61 : vector<8x128xf32>
    %63 = vector.extract_strided_slice %62 {offsets = [0, 0], sizes = [8, 32], strides = [1, 1]} : vector<8x128xf32> to vector<8x32xf32>
    %cst_33 = arith.constant 5.000000e-01 : f32
    %64 = vector.broadcast %cst_33 : f32 to vector<8x32xf32>
    %65 = arith.mulf %64, %63 : vector<8x32xf32>
    %66 = math.tanh %65 : vector<8x32xf32>
    %cst_34 = arith.constant 5.000000e-01 : f32
    %67 = vector.broadcast %cst_34 : f32 to vector<8x32xf32>
    %68 = arith.mulf %67, %66 : vector<8x32xf32>
    %cst_35 = arith.constant 5.000000e-01 : f32
    %69 = vector.broadcast %cst_35 : f32 to vector<8x32xf32>
    %70 = arith.addf %68, %69 : vector<8x32xf32>
    %71 = vector.extract_strided_slice %62 {offsets = [0, 32], sizes = [8, 32], strides = [1, 1]} : vector<8x128xf32> to vector<8x32xf32>
    %cst_36 = arith.constant 5.000000e-01 : f32
    %72 = vector.broadcast %cst_36 : f32 to vector<8x32xf32>
    %73 = arith.mulf %72, %71 : vector<8x32xf32>
    %74 = math.tanh %73 : vector<8x32xf32>
    %cst_37 = arith.constant 5.000000e-01 : f32
    %75 = vector.broadcast %cst_37 : f32 to vector<8x32xf32>
    %76 = arith.mulf %75, %74 : vector<8x32xf32>
    %cst_38 = arith.constant 5.000000e-01 : f32
    %77 = vector.broadcast %cst_38 : f32 to vector<8x32xf32>
    %78 = arith.addf %76, %77 : vector<8x32xf32>
    %79 = vector.extract_strided_slice %62 {offsets = [0, 64], sizes = [8, 32], strides = [1, 1]} : vector<8x128xf32> to vector<8x32xf32>
    %80 = vector.extract_strided_slice %62 {offsets = [0, 96], sizes = [8, 32], strides = [1, 1]} : vector<8x128xf32> to vector<8x32xf32>
    %81 = arith.mulf %70, %80 : vector<8x32xf32>
    %82 = arith.addf %79, %81 : vector<8x32xf32>
    %83 = math.tanh %82 : vector<8x32xf32>
    %cst_39 = arith.constant 1.000000e+00 : f32
    %84 = vector.broadcast %cst_39 : f32 to vector<8x32xf32>
    %85 = arith.subf %84, %78 : vector<8x32xf32>
    %86 = arith.mulf %85, %83 : vector<8x32xf32>
    %87 = arith.mulf %78, %21 : vector<8x32xf32>
    %88 = arith.addf %86, %87 : vector<8x32xf32>
    %c1_40 = arith.constant 1 : index
    %c0_41 = arith.constant 0 : index
    %c0_42 = arith.constant 0 : index
    %89 = vector.load %arg14[%c1_40, %c0_41, %c0_42] : memref<8x8x96xf32, #tpu.memory_space<vmem>>, vector<1x8x96xf32>
    %90 = vector.shape_cast %89 : vector<1x8x96xf32> to vector<8x96xf32>
    %91 = arith.truncf %57 : vector<8x32xf32> to vector<8x32xbf16>
    %cst_43 = arith.constant dense<0.000000e+00> : vector<8x96xf32>
    %92 = tpu.matmul %91, %16, %cst_43 {dimension_numbers = #tpu.dot_dimension_numbers<[1], [0], [0], [1], [0, 0, 1, 1], [], []>} : vector<8x32xbf16>, vector<32x96xbf16>, vector<8x96xf32> -> vector<8x96xf32>
    %93 = vector.broadcast %17 : vector<1x96xf32> to vector<8x96xf32>
    %94 = arith.addf %92, %93 : vector<8x96xf32>
    %95 = vector.extract_strided_slice %90 {offsets = [0, 0], sizes = [8, 32], strides = [1, 1]} : vector<8x96xf32> to vector<8x32xf32>
    %96 = vector.extract_strided_slice %94 {offsets = [0, 0], sizes = [8, 32], strides = [1, 1]} : vector<8x96xf32> to vector<8x32xf32>
    %97 = arith.addf %95, %96 : vector<8x32xf32>
    %cst_44 = arith.constant 5.000000e-01 : f32
    %98 = vector.broadcast %cst_44 : f32 to vector<8x32xf32>
    %99 = arith.mulf %98, %97 : vector<8x32xf32>
    %100 = math.tanh %99 : vector<8x32xf32>
    %cst_45 = arith.constant 5.000000e-01 : f32
    %101 = vector.broadcast %cst_45 : f32 to vector<8x32xf32>
    %102 = arith.mulf %101, %100 : vector<8x32xf32>
    %cst_46 = arith.constant 5.000000e-01 : f32
    %103 = vector.broadcast %cst_46 : f32 to vector<8x32xf32>
    %104 = arith.addf %102, %103 : vector<8x32xf32>
    %105 = vector.extract_strided_slice %90 {offsets = [0, 32], sizes = [8, 32], strides = [1, 1]} : vector<8x96xf32> to vector<8x32xf32>
    %106 = vector.extract_strided_slice %94 {offsets = [0, 32], sizes = [8, 32], strides = [1, 1]} : vector<8x96xf32> to vector<8x32xf32>
    %107 = arith.addf %105, %106 : vector<8x32xf32>
    %cst_47 = arith.constant 5.000000e-01 : f32
    %108 = vector.broadcast %cst_47 : f32 to vector<8x32xf32>
    %109 = arith.mulf %108, %107 : vector<8x32xf32>
    %110 = math.tanh %109 : vector<8x32xf32>
    %cst_48 = arith.constant 5.000000e-01 : f32
    %111 = vector.broadcast %cst_48 : f32 to vector<8x32xf32>
    %112 = arith.mulf %111, %110 : vector<8x32xf32>
    %cst_49 = arith.constant 5.000000e-01 : f32
    %113 = vector.broadcast %cst_49 : f32 to vector<8x32xf32>
    %114 = arith.addf %112, %113 : vector<8x32xf32>
    %115 = vector.extract_strided_slice %90 {offsets = [0, 64], sizes = [8, 32], strides = [1, 1]} : vector<8x96xf32> to vector<8x32xf32>
    %116 = vector.extract_strided_slice %94 {offsets = [0, 64], sizes = [8, 32], strides = [1, 1]} : vector<8x96xf32> to vector<8x32xf32>
    %117 = arith.mulf %104, %116 : vector<8x32xf32>
    %118 = arith.addf %115, %117 : vector<8x32xf32>
    %119 = math.tanh %118 : vector<8x32xf32>
    %cst_50 = arith.constant 1.000000e+00 : f32
    %120 = vector.broadcast %cst_50 : f32 to vector<8x32xf32>
    %121 = arith.subf %120, %114 : vector<8x32xf32>
    %122 = arith.mulf %121, %119 : vector<8x32xf32>
    %123 = arith.mulf %114, %57 : vector<8x32xf32>
    %124 = arith.addf %122, %123 : vector<8x32xf32>
    %125 = tpu.concatenate %124, %88 in 1 : vector<8x32xf32>, vector<8x32xf32> -> vector<8x64xf32>
    %126 = arith.truncf %125 : vector<8x64xf32> to vector<8x64xbf16>
    %cst_51 = arith.constant dense<0.000000e+00> : vector<8x128xf32>
    %127 = tpu.matmul %126, %18, %cst_51 {dimension_numbers = #tpu.dot_dimension_numbers<[1], [0], [0], [1], [0, 0, 1, 1], [], []>} : vector<8x64xbf16>, vector<64x128xbf16>, vector<8x128xf32> -> vector<8x128xf32>
    %128 = vector.broadcast %19 : vector<1x128xf32> to vector<8x128xf32>
    %129 = arith.addf %127, %128 : vector<8x128xf32>
    %130 = vector.extract_strided_slice %129 {offsets = [0, 0], sizes = [8, 32], strides = [1, 1]} : vector<8x128xf32> to vector<8x32xf32>
    %cst_52 = arith.constant 5.000000e-01 : f32
    %131 = vector.broadcast %cst_52 : f32 to vector<8x32xf32>
    %132 = arith.mulf %131, %130 : vector<8x32xf32>
    %133 = math.tanh %132 : vector<8x32xf32>
    %cst_53 = arith.constant 5.000000e-01 : f32
    %134 = vector.broadcast %cst_53 : f32 to vector<8x32xf32>
    %135 = arith.mulf %134, %133 : vector<8x32xf32>
    %cst_54 = arith.constant 5.000000e-01 : f32
    %136 = vector.broadcast %cst_54 : f32 to vector<8x32xf32>
    %137 = arith.addf %135, %136 : vector<8x32xf32>
    %138 = vector.extract_strided_slice %129 {offsets = [0, 32], sizes = [8, 32], strides = [1, 1]} : vector<8x128xf32> to vector<8x32xf32>
    %cst_55 = arith.constant 5.000000e-01 : f32
    %139 = vector.broadcast %cst_55 : f32 to vector<8x32xf32>
    %140 = arith.mulf %139, %138 : vector<8x32xf32>
    %141 = math.tanh %140 : vector<8x32xf32>
    %cst_56 = arith.constant 5.000000e-01 : f32
    %142 = vector.broadcast %cst_56 : f32 to vector<8x32xf32>
    %143 = arith.mulf %142, %141 : vector<8x32xf32>
    %cst_57 = arith.constant 5.000000e-01 : f32
    %144 = vector.broadcast %cst_57 : f32 to vector<8x32xf32>
    %145 = arith.addf %143, %144 : vector<8x32xf32>
    %146 = vector.extract_strided_slice %129 {offsets = [0, 64], sizes = [8, 32], strides = [1, 1]} : vector<8x128xf32> to vector<8x32xf32>
    %147 = vector.extract_strided_slice %129 {offsets = [0, 96], sizes = [8, 32], strides = [1, 1]} : vector<8x128xf32> to vector<8x32xf32>
    %148 = arith.mulf %137, %147 : vector<8x32xf32>
    %149 = arith.addf %146, %148 : vector<8x32xf32>
    %150 = math.tanh %149 : vector<8x32xf32>
    %cst_58 = arith.constant 1.000000e+00 : f32
    %151 = vector.broadcast %cst_58 : f32 to vector<8x32xf32>
    %152 = arith.subf %151, %145 : vector<8x32xf32>
    %153 = arith.mulf %152, %150 : vector<8x32xf32>
    %154 = arith.mulf %145, %88 : vector<8x32xf32>
    %155 = arith.addf %153, %154 : vector<8x32xf32>
    %c2 = arith.constant 2 : index
    %c0_59 = arith.constant 0 : index
    %c0_60 = arith.constant 0 : index
    %156 = vector.load %arg14[%c2, %c0_59, %c0_60] : memref<8x8x96xf32, #tpu.memory_space<vmem>>, vector<1x8x96xf32>
    %157 = vector.shape_cast %156 : vector<1x8x96xf32> to vector<8x96xf32>
    %158 = arith.truncf %124 : vector<8x32xf32> to vector<8x32xbf16>
    %cst_61 = arith.constant dense<0.000000e+00> : vector<8x96xf32>
    %159 = tpu.matmul %158, %16, %cst_61 {dimension_numbers = #tpu.dot_dimension_numbers<[1], [0], [0], [1], [0, 0, 1, 1], [], []>} : vector<8x32xbf16>, vector<32x96xbf16>, vector<8x96xf32> -> vector<8x96xf32>
    %160 = vector.broadcast %17 : vector<1x96xf32> to vector<8x96xf32>
    %161 = arith.addf %159, %160 : vector<8x96xf32>
    %162 = vector.extract_strided_slice %157 {offsets = [0, 0], sizes = [8, 32], strides = [1, 1]} : vector<8x96xf32> to vector<8x32xf32>
    %163 = vector.extract_strided_slice %161 {offsets = [0, 0], sizes = [8, 32], strides = [1, 1]} : vector<8x96xf32> to vector<8x32xf32>
    %164 = arith.addf %162, %163 : vector<8x32xf32>
    %cst_62 = arith.constant 5.000000e-01 : f32
    %165 = vector.broadcast %cst_62 : f32 to vector<8x32xf32>
    %166 = arith.mulf %165, %164 : vector<8x32xf32>
    %167 = math.tanh %166 : vector<8x32xf32>
    %cst_63 = arith.constant 5.000000e-01 : f32
    %168 = vector.broadcast %cst_63 : f32 to vector<8x32xf32>
    %169 = arith.mulf %168, %167 : vector<8x32xf32>
    %cst_64 = arith.constant 5.000000e-01 : f32
    %170 = vector.broadcast %cst_64 : f32 to vector<8x32xf32>
    %171 = arith.addf %169, %170 : vector<8x32xf32>
    %172 = vector.extract_strided_slice %157 {offsets = [0, 32], sizes = [8, 32], strides = [1, 1]} : vector<8x96xf32> to vector<8x32xf32>
    %173 = vector.extract_strided_slice %161 {offsets = [0, 32], sizes = [8, 32], strides = [1, 1]} : vector<8x96xf32> to vector<8x32xf32>
    %174 = arith.addf %172, %173 : vector<8x32xf32>
    %cst_65 = arith.constant 5.000000e-01 : f32
    %175 = vector.broadcast %cst_65 : f32 to vector<8x32xf32>
    %176 = arith.mulf %175, %174 : vector<8x32xf32>
    %177 = math.tanh %176 : vector<8x32xf32>
    %cst_66 = arith.constant 5.000000e-01 : f32
    %178 = vector.broadcast %cst_66 : f32 to vector<8x32xf32>
    %179 = arith.mulf %178, %177 : vector<8x32xf32>
    %cst_67 = arith.constant 5.000000e-01 : f32
    %180 = vector.broadcast %cst_67 : f32 to vector<8x32xf32>
    %181 = arith.addf %179, %180 : vector<8x32xf32>
    %182 = vector.extract_strided_slice %157 {offsets = [0, 64], sizes = [8, 32], strides = [1, 1]} : vector<8x96xf32> to vector<8x32xf32>
    %183 = vector.extract_strided_slice %161 {offsets = [0, 64], sizes = [8, 32], strides = [1, 1]} : vector<8x96xf32> to vector<8x32xf32>
    %184 = arith.mulf %171, %183 : vector<8x32xf32>
    %185 = arith.addf %182, %184 : vector<8x32xf32>
    %186 = math.tanh %185 : vector<8x32xf32>
    %cst_68 = arith.constant 1.000000e+00 : f32
    %187 = vector.broadcast %cst_68 : f32 to vector<8x32xf32>
    %188 = arith.subf %187, %181 : vector<8x32xf32>
    %189 = arith.mulf %188, %186 : vector<8x32xf32>
    %190 = arith.mulf %181, %124 : vector<8x32xf32>
    %191 = arith.addf %189, %190 : vector<8x32xf32>
    %192 = tpu.concatenate %191, %155 in 1 : vector<8x32xf32>, vector<8x32xf32> -> vector<8x64xf32>
    %193 = arith.truncf %192 : vector<8x64xf32> to vector<8x64xbf16>
    %cst_69 = arith.constant dense<0.000000e+00> : vector<8x128xf32>
    %194 = tpu.matmul %193, %18, %cst_69 {dimension_numbers = #tpu.dot_dimension_numbers<[1], [0], [0], [1], [0, 0, 1, 1], [], []>} : vector<8x64xbf16>, vector<64x128xbf16>, vector<8x128xf32> -> vector<8x128xf32>
    %195 = vector.broadcast %19 : vector<1x128xf32> to vector<8x128xf32>
    %196 = arith.addf %194, %195 : vector<8x128xf32>
    %197 = vector.extract_strided_slice %196 {offsets = [0, 0], sizes = [8, 32], strides = [1, 1]} : vector<8x128xf32> to vector<8x32xf32>
    %cst_70 = arith.constant 5.000000e-01 : f32
    %198 = vector.broadcast %cst_70 : f32 to vector<8x32xf32>
    %199 = arith.mulf %198, %197 : vector<8x32xf32>
    %200 = math.tanh %199 : vector<8x32xf32>
    %cst_71 = arith.constant 5.000000e-01 : f32
    %201 = vector.broadcast %cst_71 : f32 to vector<8x32xf32>
    %202 = arith.mulf %201, %200 : vector<8x32xf32>
    %cst_72 = arith.constant 5.000000e-01 : f32
    %203 = vector.broadcast %cst_72 : f32 to vector<8x32xf32>
    %204 = arith.addf %202, %203 : vector<8x32xf32>
    %205 = vector.extract_strided_slice %196 {offsets = [0, 32], sizes = [8, 32], strides = [1, 1]} : vector<8x128xf32> to vector<8x32xf32>
    %cst_73 = arith.constant 5.000000e-01 : f32
    %206 = vector.broadcast %cst_73 : f32 to vector<8x32xf32>
    %207 = arith.mulf %206, %205 : vector<8x32xf32>
    %208 = math.tanh %207 : vector<8x32xf32>
    %cst_74 = arith.constant 5.000000e-01 : f32
    %209 = vector.broadcast %cst_74 : f32 to vector<8x32xf32>
    %210 = arith.mulf %209, %208 : vector<8x32xf32>
    %cst_75 = arith.constant 5.000000e-01 : f32
    %211 = vector.broadcast %cst_75 : f32 to vector<8x32xf32>
    %212 = arith.addf %210, %211 : vector<8x32xf32>
    %213 = vector.extract_strided_slice %196 {offsets = [0, 64], sizes = [8, 32], strides = [1, 1]} : vector<8x128xf32> to vector<8x32xf32>
    %214 = vector.extract_strided_slice %196 {offsets = [0, 96], sizes = [8, 32], strides = [1, 1]} : vector<8x128xf32> to vector<8x32xf32>
    %215 = arith.mulf %204, %214 : vector<8x32xf32>
    %216 = arith.addf %213, %215 : vector<8x32xf32>
    %217 = math.tanh %216 : vector<8x32xf32>
    %cst_76 = arith.constant 1.000000e+00 : f32
    %218 = vector.broadcast %cst_76 : f32 to vector<8x32xf32>
    %219 = arith.subf %218, %212 : vector<8x32xf32>
    %220 = arith.mulf %219, %217 : vector<8x32xf32>
    %221 = arith.mulf %212, %155 : vector<8x32xf32>
    %222 = arith.addf %220, %221 : vector<8x32xf32>
    %c3 = arith.constant 3 : index
    %c0_77 = arith.constant 0 : index
    %c0_78 = arith.constant 0 : index
    %223 = vector.load %arg14[%c3, %c0_77, %c0_78] : memref<8x8x96xf32, #tpu.memory_space<vmem>>, vector<1x8x96xf32>
    %224 = vector.shape_cast %223 : vector<1x8x96xf32> to vector<8x96xf32>
    %225 = arith.truncf %191 : vector<8x32xf32> to vector<8x32xbf16>
    %cst_79 = arith.constant dense<0.000000e+00> : vector<8x96xf32>
    %226 = tpu.matmul %225, %16, %cst_79 {dimension_numbers = #tpu.dot_dimension_numbers<[1], [0], [0], [1], [0, 0, 1, 1], [], []>} : vector<8x32xbf16>, vector<32x96xbf16>, vector<8x96xf32> -> vector<8x96xf32>
    %227 = vector.broadcast %17 : vector<1x96xf32> to vector<8x96xf32>
    %228 = arith.addf %226, %227 : vector<8x96xf32>
    %229 = vector.extract_strided_slice %224 {offsets = [0, 0], sizes = [8, 32], strides = [1, 1]} : vector<8x96xf32> to vector<8x32xf32>
    %230 = vector.extract_strided_slice %228 {offsets = [0, 0], sizes = [8, 32], strides = [1, 1]} : vector<8x96xf32> to vector<8x32xf32>
    %231 = arith.addf %229, %230 : vector<8x32xf32>
    %cst_80 = arith.constant 5.000000e-01 : f32
    %232 = vector.broadcast %cst_80 : f32 to vector<8x32xf32>
    %233 = arith.mulf %232, %231 : vector<8x32xf32>
    %234 = math.tanh %233 : vector<8x32xf32>
    %cst_81 = arith.constant 5.000000e-01 : f32
    %235 = vector.broadcast %cst_81 : f32 to vector<8x32xf32>
    %236 = arith.mulf %235, %234 : vector<8x32xf32>
    %cst_82 = arith.constant 5.000000e-01 : f32
    %237 = vector.broadcast %cst_82 : f32 to vector<8x32xf32>
    %238 = arith.addf %236, %237 : vector<8x32xf32>
    %239 = vector.extract_strided_slice %224 {offsets = [0, 32], sizes = [8, 32], strides = [1, 1]} : vector<8x96xf32> to vector<8x32xf32>
    %240 = vector.extract_strided_slice %228 {offsets = [0, 32], sizes = [8, 32], strides = [1, 1]} : vector<8x96xf32> to vector<8x32xf32>
    %241 = arith.addf %239, %240 : vector<8x32xf32>
    %cst_83 = arith.constant 5.000000e-01 : f32
    %242 = vector.broadcast %cst_83 : f32 to vector<8x32xf32>
    %243 = arith.mulf %242, %241 : vector<8x32xf32>
    %244 = math.tanh %243 : vector<8x32xf32>
    %cst_84 = arith.constant 5.000000e-01 : f32
    %245 = vector.broadcast %cst_84 : f32 to vector<8x32xf32>
    %246 = arith.mulf %245, %244 : vector<8x32xf32>
    %cst_85 = arith.constant 5.000000e-01 : f32
    %247 = vector.broadcast %cst_85 : f32 to vector<8x32xf32>
    %248 = arith.addf %246, %247 : vector<8x32xf32>
    %249 = vector.extract_strided_slice %224 {offsets = [0, 64], sizes = [8, 32], strides = [1, 1]} : vector<8x96xf32> to vector<8x32xf32>
    %250 = vector.extract_strided_slice %228 {offsets = [0, 64], sizes = [8, 32], strides = [1, 1]} : vector<8x96xf32> to vector<8x32xf32>
    %251 = arith.mulf %238, %250 : vector<8x32xf32>
    %252 = arith.addf %249, %251 : vector<8x32xf32>
    %253 = math.tanh %252 : vector<8x32xf32>
    %cst_86 = arith.constant 1.000000e+00 : f32
    %254 = vector.broadcast %cst_86 : f32 to vector<8x32xf32>
    %255 = arith.subf %254, %248 : vector<8x32xf32>
    %256 = arith.mulf %255, %253 : vector<8x32xf32>
    %257 = arith.mulf %248, %191 : vector<8x32xf32>
    %258 = arith.addf %256, %257 : vector<8x32xf32>
    %259 = tpu.concatenate %258, %222 in 1 : vector<8x32xf32>, vector<8x32xf32> -> vector<8x64xf32>
    %260 = arith.truncf %259 : vector<8x64xf32> to vector<8x64xbf16>
    %cst_87 = arith.constant dense<0.000000e+00> : vector<8x128xf32>
    %261 = tpu.matmul %260, %18, %cst_87 {dimension_numbers = #tpu.dot_dimension_numbers<[1], [0], [0], [1], [0, 0, 1, 1], [], []>} : vector<8x64xbf16>, vector<64x128xbf16>, vector<8x128xf32> -> vector<8x128xf32>
    %262 = vector.broadcast %19 : vector<1x128xf32> to vector<8x128xf32>
    %263 = arith.addf %261, %262 : vector<8x128xf32>
    %264 = vector.extract_strided_slice %263 {offsets = [0, 0], sizes = [8, 32], strides = [1, 1]} : vector<8x128xf32> to vector<8x32xf32>
    %cst_88 = arith.constant 5.000000e-01 : f32
    %265 = vector.broadcast %cst_88 : f32 to vector<8x32xf32>
    %266 = arith.mulf %265, %264 : vector<8x32xf32>
    %267 = math.tanh %266 : vector<8x32xf32>
    %cst_89 = arith.constant 5.000000e-01 : f32
    %268 = vector.broadcast %cst_89 : f32 to vector<8x32xf32>
    %269 = arith.mulf %268, %267 : vector<8x32xf32>
    %cst_90 = arith.constant 5.000000e-01 : f32
    %270 = vector.broadcast %cst_90 : f32 to vector<8x32xf32>
    %271 = arith.addf %269, %270 : vector<8x32xf32>
    %272 = vector.extract_strided_slice %263 {offsets = [0, 32], sizes = [8, 32], strides = [1, 1]} : vector<8x128xf32> to vector<8x32xf32>
    %cst_91 = arith.constant 5.000000e-01 : f32
    %273 = vector.broadcast %cst_91 : f32 to vector<8x32xf32>
    %274 = arith.mulf %273, %272 : vector<8x32xf32>
    %275 = math.tanh %274 : vector<8x32xf32>
    %cst_92 = arith.constant 5.000000e-01 : f32
    %276 = vector.broadcast %cst_92 : f32 to vector<8x32xf32>
    %277 = arith.mulf %276, %275 : vector<8x32xf32>
    %cst_93 = arith.constant 5.000000e-01 : f32
    %278 = vector.broadcast %cst_93 : f32 to vector<8x32xf32>
    %279 = arith.addf %277, %278 : vector<8x32xf32>
    %280 = vector.extract_strided_slice %263 {offsets = [0, 64], sizes = [8, 32], strides = [1, 1]} : vector<8x128xf32> to vector<8x32xf32>
    %281 = vector.extract_strided_slice %263 {offsets = [0, 96], sizes = [8, 32], strides = [1, 1]} : vector<8x128xf32> to vector<8x32xf32>
    %282 = arith.mulf %271, %281 : vector<8x32xf32>
    %283 = arith.addf %280, %282 : vector<8x32xf32>
    %284 = math.tanh %283 : vector<8x32xf32>
    %cst_94 = arith.constant 1.000000e+00 : f32
    %285 = vector.broadcast %cst_94 : f32 to vector<8x32xf32>
    %286 = arith.subf %285, %279 : vector<8x32xf32>
    %287 = arith.mulf %286, %284 : vector<8x32xf32>
    %288 = arith.mulf %279, %222 : vector<8x32xf32>
    %289 = arith.addf %287, %288 : vector<8x32xf32>
    %c4 = arith.constant 4 : index
    %c0_95 = arith.constant 0 : index
    %c0_96 = arith.constant 0 : index
    %290 = vector.load %arg14[%c4, %c0_95, %c0_96] : memref<8x8x96xf32, #tpu.memory_space<vmem>>, vector<1x8x96xf32>
    %291 = vector.shape_cast %290 : vector<1x8x96xf32> to vector<8x96xf32>
    %292 = arith.truncf %258 : vector<8x32xf32> to vector<8x32xbf16>
    %cst_97 = arith.constant dense<0.000000e+00> : vector<8x96xf32>
    %293 = tpu.matmul %292, %16, %cst_97 {dimension_numbers = #tpu.dot_dimension_numbers<[1], [0], [0], [1], [0, 0, 1, 1], [], []>} : vector<8x32xbf16>, vector<32x96xbf16>, vector<8x96xf32> -> vector<8x96xf32>
    %294 = vector.broadcast %17 : vector<1x96xf32> to vector<8x96xf32>
    %295 = arith.addf %293, %294 : vector<8x96xf32>
    %296 = vector.extract_strided_slice %291 {offsets = [0, 0], sizes = [8, 32], strides = [1, 1]} : vector<8x96xf32> to vector<8x32xf32>
    %297 = vector.extract_strided_slice %295 {offsets = [0, 0], sizes = [8, 32], strides = [1, 1]} : vector<8x96xf32> to vector<8x32xf32>
    %298 = arith.addf %296, %297 : vector<8x32xf32>
    %cst_98 = arith.constant 5.000000e-01 : f32
    %299 = vector.broadcast %cst_98 : f32 to vector<8x32xf32>
    %300 = arith.mulf %299, %298 : vector<8x32xf32>
    %301 = math.tanh %300 : vector<8x32xf32>
    %cst_99 = arith.constant 5.000000e-01 : f32
    %302 = vector.broadcast %cst_99 : f32 to vector<8x32xf32>
    %303 = arith.mulf %302, %301 : vector<8x32xf32>
    %cst_100 = arith.constant 5.000000e-01 : f32
    %304 = vector.broadcast %cst_100 : f32 to vector<8x32xf32>
    %305 = arith.addf %303, %304 : vector<8x32xf32>
    %306 = vector.extract_strided_slice %291 {offsets = [0, 32], sizes = [8, 32], strides = [1, 1]} : vector<8x96xf32> to vector<8x32xf32>
    %307 = vector.extract_strided_slice %295 {offsets = [0, 32], sizes = [8, 32], strides = [1, 1]} : vector<8x96xf32> to vector<8x32xf32>
    %308 = arith.addf %306, %307 : vector<8x32xf32>
    %cst_101 = arith.constant 5.000000e-01 : f32
    %309 = vector.broadcast %cst_101 : f32 to vector<8x32xf32>
    %310 = arith.mulf %309, %308 : vector<8x32xf32>
    %311 = math.tanh %310 : vector<8x32xf32>
    %cst_102 = arith.constant 5.000000e-01 : f32
    %312 = vector.broadcast %cst_102 : f32 to vector<8x32xf32>
    %313 = arith.mulf %312, %311 : vector<8x32xf32>
    %cst_103 = arith.constant 5.000000e-01 : f32
    %314 = vector.broadcast %cst_103 : f32 to vector<8x32xf32>
    %315 = arith.addf %313, %314 : vector<8x32xf32>
    %316 = vector.extract_strided_slice %291 {offsets = [0, 64], sizes = [8, 32], strides = [1, 1]} : vector<8x96xf32> to vector<8x32xf32>
    %317 = vector.extract_strided_slice %295 {offsets = [0, 64], sizes = [8, 32], strides = [1, 1]} : vector<8x96xf32> to vector<8x32xf32>
    %318 = arith.mulf %305, %317 : vector<8x32xf32>
    %319 = arith.addf %316, %318 : vector<8x32xf32>
    %320 = math.tanh %319 : vector<8x32xf32>
    %cst_104 = arith.constant 1.000000e+00 : f32
    %321 = vector.broadcast %cst_104 : f32 to vector<8x32xf32>
    %322 = arith.subf %321, %315 : vector<8x32xf32>
    %323 = arith.mulf %322, %320 : vector<8x32xf32>
    %324 = arith.mulf %315, %258 : vector<8x32xf32>
    %325 = arith.addf %323, %324 : vector<8x32xf32>
    %326 = tpu.concatenate %325, %289 in 1 : vector<8x32xf32>, vector<8x32xf32> -> vector<8x64xf32>
    %327 = arith.truncf %326 : vector<8x64xf32> to vector<8x64xbf16>
    %cst_105 = arith.constant dense<0.000000e+00> : vector<8x128xf32>
    %328 = tpu.matmul %327, %18, %cst_105 {dimension_numbers = #tpu.dot_dimension_numbers<[1], [0], [0], [1], [0, 0, 1, 1], [], []>} : vector<8x64xbf16>, vector<64x128xbf16>, vector<8x128xf32> -> vector<8x128xf32>
    %329 = vector.broadcast %19 : vector<1x128xf32> to vector<8x128xf32>
    %330 = arith.addf %328, %329 : vector<8x128xf32>
    %331 = vector.extract_strided_slice %330 {offsets = [0, 0], sizes = [8, 32], strides = [1, 1]} : vector<8x128xf32> to vector<8x32xf32>
    %cst_106 = arith.constant 5.000000e-01 : f32
    %332 = vector.broadcast %cst_106 : f32 to vector<8x32xf32>
    %333 = arith.mulf %332, %331 : vector<8x32xf32>
    %334 = math.tanh %333 : vector<8x32xf32>
    %cst_107 = arith.constant 5.000000e-01 : f32
    %335 = vector.broadcast %cst_107 : f32 to vector<8x32xf32>
    %336 = arith.mulf %335, %334 : vector<8x32xf32>
    %cst_108 = arith.constant 5.000000e-01 : f32
    %337 = vector.broadcast %cst_108 : f32 to vector<8x32xf32>
    %338 = arith.addf %336, %337 : vector<8x32xf32>
    %339 = vector.extract_strided_slice %330 {offsets = [0, 32], sizes = [8, 32], strides = [1, 1]} : vector<8x128xf32> to vector<8x32xf32>
    %cst_109 = arith.constant 5.000000e-01 : f32
    %340 = vector.broadcast %cst_109 : f32 to vector<8x32xf32>
    %341 = arith.mulf %340, %339 : vector<8x32xf32>
    %342 = math.tanh %341 : vector<8x32xf32>
    %cst_110 = arith.constant 5.000000e-01 : f32
    %343 = vector.broadcast %cst_110 : f32 to vector<8x32xf32>
    %344 = arith.mulf %343, %342 : vector<8x32xf32>
    %cst_111 = arith.constant 5.000000e-01 : f32
    %345 = vector.broadcast %cst_111 : f32 to vector<8x32xf32>
    %346 = arith.addf %344, %345 : vector<8x32xf32>
    %347 = vector.extract_strided_slice %330 {offsets = [0, 64], sizes = [8, 32], strides = [1, 1]} : vector<8x128xf32> to vector<8x32xf32>
    %348 = vector.extract_strided_slice %330 {offsets = [0, 96], sizes = [8, 32], strides = [1, 1]} : vector<8x128xf32> to vector<8x32xf32>
    %349 = arith.mulf %338, %348 : vector<8x32xf32>
    %350 = arith.addf %347, %349 : vector<8x32xf32>
    %351 = math.tanh %350 : vector<8x32xf32>
    %cst_112 = arith.constant 1.000000e+00 : f32
    %352 = vector.broadcast %cst_112 : f32 to vector<8x32xf32>
    %353 = arith.subf %352, %346 : vector<8x32xf32>
    %354 = arith.mulf %353, %351 : vector<8x32xf32>
    %355 = arith.mulf %346, %289 : vector<8x32xf32>
    %356 = arith.addf %354, %355 : vector<8x32xf32>
    %c5 = arith.constant 5 : index
    %c0_113 = arith.constant 0 : index
    %c0_114 = arith.constant 0 : index
    %357 = vector.load %arg14[%c5, %c0_113, %c0_114] : memref<8x8x96xf32, #tpu.memory_space<vmem>>, vector<1x8x96xf32>
    %358 = vector.shape_cast %357 : vector<1x8x96xf32> to vector<8x96xf32>
    %359 = arith.truncf %325 : vector<8x32xf32> to vector<8x32xbf16>
    %cst_115 = arith.constant dense<0.000000e+00> : vector<8x96xf32>
    %360 = tpu.matmul %359, %16, %cst_115 {dimension_numbers = #tpu.dot_dimension_numbers<[1], [0], [0], [1], [0, 0, 1, 1], [], []>} : vector<8x32xbf16>, vector<32x96xbf16>, vector<8x96xf32> -> vector<8x96xf32>
    %361 = vector.broadcast %17 : vector<1x96xf32> to vector<8x96xf32>
    %362 = arith.addf %360, %361 : vector<8x96xf32>
    %363 = vector.extract_strided_slice %358 {offsets = [0, 0], sizes = [8, 32], strides = [1, 1]} : vector<8x96xf32> to vector<8x32xf32>
    %364 = vector.extract_strided_slice %362 {offsets = [0, 0], sizes = [8, 32], strides = [1, 1]} : vector<8x96xf32> to vector<8x32xf32>
    %365 = arith.addf %363, %364 : vector<8x32xf32>
    %cst_116 = arith.constant 5.000000e-01 : f32
    %366 = vector.broadcast %cst_116 : f32 to vector<8x32xf32>
    %367 = arith.mulf %366, %365 : vector<8x32xf32>
    %368 = math.tanh %367 : vector<8x32xf32>
    %cst_117 = arith.constant 5.000000e-01 : f32
    %369 = vector.broadcast %cst_117 : f32 to vector<8x32xf32>
    %370 = arith.mulf %369, %368 : vector<8x32xf32>
    %cst_118 = arith.constant 5.000000e-01 : f32
    %371 = vector.broadcast %cst_118 : f32 to vector<8x32xf32>
    %372 = arith.addf %370, %371 : vector<8x32xf32>
    %373 = vector.extract_strided_slice %358 {offsets = [0, 32], sizes = [8, 32], strides = [1, 1]} : vector<8x96xf32> to vector<8x32xf32>
    %374 = vector.extract_strided_slice %362 {offsets = [0, 32], sizes = [8, 32], strides = [1, 1]} : vector<8x96xf32> to vector<8x32xf32>
    %375 = arith.addf %373, %374 : vector<8x32xf32>
    %cst_119 = arith.constant 5.000000e-01 : f32
    %376 = vector.broadcast %cst_119 : f32 to vector<8x32xf32>
    %377 = arith.mulf %376, %375 : vector<8x32xf32>
    %378 = math.tanh %377 : vector<8x32xf32>
    %cst_120 = arith.constant 5.000000e-01 : f32
    %379 = vector.broadcast %cst_120 : f32 to vector<8x32xf32>
    %380 = arith.mulf %379, %378 : vector<8x32xf32>
    %cst_121 = arith.constant 5.000000e-01 : f32
    %381 = vector.broadcast %cst_121 : f32 to vector<8x32xf32>
    %382 = arith.addf %380, %381 : vector<8x32xf32>
    %383 = vector.extract_strided_slice %358 {offsets = [0, 64], sizes = [8, 32], strides = [1, 1]} : vector<8x96xf32> to vector<8x32xf32>
    %384 = vector.extract_strided_slice %362 {offsets = [0, 64], sizes = [8, 32], strides = [1, 1]} : vector<8x96xf32> to vector<8x32xf32>
    %385 = arith.mulf %372, %384 : vector<8x32xf32>
    %386 = arith.addf %383, %385 : vector<8x32xf32>
    %387 = math.tanh %386 : vector<8x32xf32>
    %cst_122 = arith.constant 1.000000e+00 : f32
    %388 = vector.broadcast %cst_122 : f32 to vector<8x32xf32>
    %389 = arith.subf %388, %382 : vector<8x32xf32>
    %390 = arith.mulf %389, %387 : vector<8x32xf32>
    %391 = arith.mulf %382, %325 : vector<8x32xf32>
    %392 = arith.addf %390, %391 : vector<8x32xf32>
    %393 = tpu.concatenate %392, %356 in 1 : vector<8x32xf32>, vector<8x32xf32> -> vector<8x64xf32>
    %394 = arith.truncf %393 : vector<8x64xf32> to vector<8x64xbf16>
    %cst_123 = arith.constant dense<0.000000e+00> : vector<8x128xf32>
    %395 = tpu.matmul %394, %18, %cst_123 {dimension_numbers = #tpu.dot_dimension_numbers<[1], [0], [0], [1], [0, 0, 1, 1], [], []>} : vector<8x64xbf16>, vector<64x128xbf16>, vector<8x128xf32> -> vector<8x128xf32>
    %396 = vector.broadcast %19 : vector<1x128xf32> to vector<8x128xf32>
    %397 = arith.addf %395, %396 : vector<8x128xf32>
    %398 = vector.extract_strided_slice %397 {offsets = [0, 0], sizes = [8, 32], strides = [1, 1]} : vector<8x128xf32> to vector<8x32xf32>
    %cst_124 = arith.constant 5.000000e-01 : f32
    %399 = vector.broadcast %cst_124 : f32 to vector<8x32xf32>
    %400 = arith.mulf %399, %398 : vector<8x32xf32>
    %401 = math.tanh %400 : vector<8x32xf32>
    %cst_125 = arith.constant 5.000000e-01 : f32
    %402 = vector.broadcast %cst_125 : f32 to vector<8x32xf32>
    %403 = arith.mulf %402, %401 : vector<8x32xf32>
    %cst_126 = arith.constant 5.000000e-01 : f32
    %404 = vector.broadcast %cst_126 : f32 to vector<8x32xf32>
    %405 = arith.addf %403, %404 : vector<8x32xf32>
    %406 = vector.extract_strided_slice %397 {offsets = [0, 32], sizes = [8, 32], strides = [1, 1]} : vector<8x128xf32> to vector<8x32xf32>
    %cst_127 = arith.constant 5.000000e-01 : f32
    %407 = vector.broadcast %cst_127 : f32 to vector<8x32xf32>
    %408 = arith.mulf %407, %406 : vector<8x32xf32>
    %409 = math.tanh %408 : vector<8x32xf32>
    %cst_128 = arith.constant 5.000000e-01 : f32
    %410 = vector.broadcast %cst_128 : f32 to vector<8x32xf32>
    %411 = arith.mulf %410, %409 : vector<8x32xf32>
    %cst_129 = arith.constant 5.000000e-01 : f32
    %412 = vector.broadcast %cst_129 : f32 to vector<8x32xf32>
    %413 = arith.addf %411, %412 : vector<8x32xf32>
    %414 = vector.extract_strided_slice %397 {offsets = [0, 64], sizes = [8, 32], strides = [1, 1]} : vector<8x128xf32> to vector<8x32xf32>
    %415 = vector.extract_strided_slice %397 {offsets = [0, 96], sizes = [8, 32], strides = [1, 1]} : vector<8x128xf32> to vector<8x32xf32>
    %416 = arith.mulf %405, %415 : vector<8x32xf32>
    %417 = arith.addf %414, %416 : vector<8x32xf32>
    %418 = math.tanh %417 : vector<8x32xf32>
    %cst_130 = arith.constant 1.000000e+00 : f32
    %419 = vector.broadcast %cst_130 : f32 to vector<8x32xf32>
    %420 = arith.subf %419, %413 : vector<8x32xf32>
    %421 = arith.mulf %420, %418 : vector<8x32xf32>
    %422 = arith.mulf %413, %356 : vector<8x32xf32>
    %423 = arith.addf %421, %422 : vector<8x32xf32>
    %c6 = arith.constant 6 : index
    %c0_131 = arith.constant 0 : index
    %c0_132 = arith.constant 0 : index
    %424 = vector.load %arg14[%c6, %c0_131, %c0_132] : memref<8x8x96xf32, #tpu.memory_space<vmem>>, vector<1x8x96xf32>
    %425 = vector.shape_cast %424 : vector<1x8x96xf32> to vector<8x96xf32>
    %426 = arith.truncf %392 : vector<8x32xf32> to vector<8x32xbf16>
    %cst_133 = arith.constant dense<0.000000e+00> : vector<8x96xf32>
    %427 = tpu.matmul %426, %16, %cst_133 {dimension_numbers = #tpu.dot_dimension_numbers<[1], [0], [0], [1], [0, 0, 1, 1], [], []>} : vector<8x32xbf16>, vector<32x96xbf16>, vector<8x96xf32> -> vector<8x96xf32>
    %428 = vector.broadcast %17 : vector<1x96xf32> to vector<8x96xf32>
    %429 = arith.addf %427, %428 : vector<8x96xf32>
    %430 = vector.extract_strided_slice %425 {offsets = [0, 0], sizes = [8, 32], strides = [1, 1]} : vector<8x96xf32> to vector<8x32xf32>
    %431 = vector.extract_strided_slice %429 {offsets = [0, 0], sizes = [8, 32], strides = [1, 1]} : vector<8x96xf32> to vector<8x32xf32>
    %432 = arith.addf %430, %431 : vector<8x32xf32>
    %cst_134 = arith.constant 5.000000e-01 : f32
    %433 = vector.broadcast %cst_134 : f32 to vector<8x32xf32>
    %434 = arith.mulf %433, %432 : vector<8x32xf32>
    %435 = math.tanh %434 : vector<8x32xf32>
    %cst_135 = arith.constant 5.000000e-01 : f32
    %436 = vector.broadcast %cst_135 : f32 to vector<8x32xf32>
    %437 = arith.mulf %436, %435 : vector<8x32xf32>
    %cst_136 = arith.constant 5.000000e-01 : f32
    %438 = vector.broadcast %cst_136 : f32 to vector<8x32xf32>
    %439 = arith.addf %437, %438 : vector<8x32xf32>
    %440 = vector.extract_strided_slice %425 {offsets = [0, 32], sizes = [8, 32], strides = [1, 1]} : vector<8x96xf32> to vector<8x32xf32>
    %441 = vector.extract_strided_slice %429 {offsets = [0, 32], sizes = [8, 32], strides = [1, 1]} : vector<8x96xf32> to vector<8x32xf32>
    %442 = arith.addf %440, %441 : vector<8x32xf32>
    %cst_137 = arith.constant 5.000000e-01 : f32
    %443 = vector.broadcast %cst_137 : f32 to vector<8x32xf32>
    %444 = arith.mulf %443, %442 : vector<8x32xf32>
    %445 = math.tanh %444 : vector<8x32xf32>
    %cst_138 = arith.constant 5.000000e-01 : f32
    %446 = vector.broadcast %cst_138 : f32 to vector<8x32xf32>
    %447 = arith.mulf %446, %445 : vector<8x32xf32>
    %cst_139 = arith.constant 5.000000e-01 : f32
    %448 = vector.broadcast %cst_139 : f32 to vector<8x32xf32>
    %449 = arith.addf %447, %448 : vector<8x32xf32>
    %450 = vector.extract_strided_slice %425 {offsets = [0, 64], sizes = [8, 32], strides = [1, 1]} : vector<8x96xf32> to vector<8x32xf32>
    %451 = vector.extract_strided_slice %429 {offsets = [0, 64], sizes = [8, 32], strides = [1, 1]} : vector<8x96xf32> to vector<8x32xf32>
    %452 = arith.mulf %439, %451 : vector<8x32xf32>
    %453 = arith.addf %450, %452 : vector<8x32xf32>
    %454 = math.tanh %453 : vector<8x32xf32>
    %cst_140 = arith.constant 1.000000e+00 : f32
    %455 = vector.broadcast %cst_140 : f32 to vector<8x32xf32>
    %456 = arith.subf %455, %449 : vector<8x32xf32>
    %457 = arith.mulf %456, %454 : vector<8x32xf32>
    %458 = arith.mulf %449, %392 : vector<8x32xf32>
    %459 = arith.addf %457, %458 : vector<8x32xf32>
    %460 = tpu.concatenate %459, %423 in 1 : vector<8x32xf32>, vector<8x32xf32> -> vector<8x64xf32>
    %461 = arith.truncf %460 : vector<8x64xf32> to vector<8x64xbf16>
    %cst_141 = arith.constant dense<0.000000e+00> : vector<8x128xf32>
    %462 = tpu.matmul %461, %18, %cst_141 {dimension_numbers = #tpu.dot_dimension_numbers<[1], [0], [0], [1], [0, 0, 1, 1], [], []>} : vector<8x64xbf16>, vector<64x128xbf16>, vector<8x128xf32> -> vector<8x128xf32>
    %463 = vector.broadcast %19 : vector<1x128xf32> to vector<8x128xf32>
    %464 = arith.addf %462, %463 : vector<8x128xf32>
    %465 = vector.extract_strided_slice %464 {offsets = [0, 0], sizes = [8, 32], strides = [1, 1]} : vector<8x128xf32> to vector<8x32xf32>
    %cst_142 = arith.constant 5.000000e-01 : f32
    %466 = vector.broadcast %cst_142 : f32 to vector<8x32xf32>
    %467 = arith.mulf %466, %465 : vector<8x32xf32>
    %468 = math.tanh %467 : vector<8x32xf32>
    %cst_143 = arith.constant 5.000000e-01 : f32
    %469 = vector.broadcast %cst_143 : f32 to vector<8x32xf32>
    %470 = arith.mulf %469, %468 : vector<8x32xf32>
    %cst_144 = arith.constant 5.000000e-01 : f32
    %471 = vector.broadcast %cst_144 : f32 to vector<8x32xf32>
    %472 = arith.addf %470, %471 : vector<8x32xf32>
    %473 = vector.extract_strided_slice %464 {offsets = [0, 32], sizes = [8, 32], strides = [1, 1]} : vector<8x128xf32> to vector<8x32xf32>
    %cst_145 = arith.constant 5.000000e-01 : f32
    %474 = vector.broadcast %cst_145 : f32 to vector<8x32xf32>
    %475 = arith.mulf %474, %473 : vector<8x32xf32>
    %476 = math.tanh %475 : vector<8x32xf32>
    %cst_146 = arith.constant 5.000000e-01 : f32
    %477 = vector.broadcast %cst_146 : f32 to vector<8x32xf32>
    %478 = arith.mulf %477, %476 : vector<8x32xf32>
    %cst_147 = arith.constant 5.000000e-01 : f32
    %479 = vector.broadcast %cst_147 : f32 to vector<8x32xf32>
    %480 = arith.addf %478, %479 : vector<8x32xf32>
    %481 = vector.extract_strided_slice %464 {offsets = [0, 64], sizes = [8, 32], strides = [1, 1]} : vector<8x128xf32> to vector<8x32xf32>
    %482 = vector.extract_strided_slice %464 {offsets = [0, 96], sizes = [8, 32], strides = [1, 1]} : vector<8x128xf32> to vector<8x32xf32>
    %483 = arith.mulf %472, %482 : vector<8x32xf32>
    %484 = arith.addf %481, %483 : vector<8x32xf32>
    %485 = math.tanh %484 : vector<8x32xf32>
    %cst_148 = arith.constant 1.000000e+00 : f32
    %486 = vector.broadcast %cst_148 : f32 to vector<8x32xf32>
    %487 = arith.subf %486, %480 : vector<8x32xf32>
    %488 = arith.mulf %487, %485 : vector<8x32xf32>
    %489 = arith.mulf %480, %423 : vector<8x32xf32>
    %490 = arith.addf %488, %489 : vector<8x32xf32>
    %c7 = arith.constant 7 : index
    %c0_149 = arith.constant 0 : index
    %c0_150 = arith.constant 0 : index
    %491 = vector.load %arg14[%c7, %c0_149, %c0_150] : memref<8x8x96xf32, #tpu.memory_space<vmem>>, vector<1x8x96xf32>
    %492 = vector.shape_cast %491 : vector<1x8x96xf32> to vector<8x96xf32>
    %493 = arith.truncf %459 : vector<8x32xf32> to vector<8x32xbf16>
    %cst_151 = arith.constant dense<0.000000e+00> : vector<8x96xf32>
    %494 = tpu.matmul %493, %16, %cst_151 {dimension_numbers = #tpu.dot_dimension_numbers<[1], [0], [0], [1], [0, 0, 1, 1], [], []>} : vector<8x32xbf16>, vector<32x96xbf16>, vector<8x96xf32> -> vector<8x96xf32>
    %495 = vector.broadcast %17 : vector<1x96xf32> to vector<8x96xf32>
    %496 = arith.addf %494, %495 : vector<8x96xf32>
    %497 = vector.extract_strided_slice %492 {offsets = [0, 0], sizes = [8, 32], strides = [1, 1]} : vector<8x96xf32> to vector<8x32xf32>
    %498 = vector.extract_strided_slice %496 {offsets = [0, 0], sizes = [8, 32], strides = [1, 1]} : vector<8x96xf32> to vector<8x32xf32>
    %499 = arith.addf %497, %498 : vector<8x32xf32>
    %cst_152 = arith.constant 5.000000e-01 : f32
    %500 = vector.broadcast %cst_152 : f32 to vector<8x32xf32>
    %501 = arith.mulf %500, %499 : vector<8x32xf32>
    %502 = math.tanh %501 : vector<8x32xf32>
    %cst_153 = arith.constant 5.000000e-01 : f32
    %503 = vector.broadcast %cst_153 : f32 to vector<8x32xf32>
    %504 = arith.mulf %503, %502 : vector<8x32xf32>
    %cst_154 = arith.constant 5.000000e-01 : f32
    %505 = vector.broadcast %cst_154 : f32 to vector<8x32xf32>
    %506 = arith.addf %504, %505 : vector<8x32xf32>
    %507 = vector.extract_strided_slice %492 {offsets = [0, 32], sizes = [8, 32], strides = [1, 1]} : vector<8x96xf32> to vector<8x32xf32>
    %508 = vector.extract_strided_slice %496 {offsets = [0, 32], sizes = [8, 32], strides = [1, 1]} : vector<8x96xf32> to vector<8x32xf32>
    %509 = arith.addf %507, %508 : vector<8x32xf32>
    %cst_155 = arith.constant 5.000000e-01 : f32
    %510 = vector.broadcast %cst_155 : f32 to vector<8x32xf32>
    %511 = arith.mulf %510, %509 : vector<8x32xf32>
    %512 = math.tanh %511 : vector<8x32xf32>
    %cst_156 = arith.constant 5.000000e-01 : f32
    %513 = vector.broadcast %cst_156 : f32 to vector<8x32xf32>
    %514 = arith.mulf %513, %512 : vector<8x32xf32>
    %cst_157 = arith.constant 5.000000e-01 : f32
    %515 = vector.broadcast %cst_157 : f32 to vector<8x32xf32>
    %516 = arith.addf %514, %515 : vector<8x32xf32>
    %517 = vector.extract_strided_slice %492 {offsets = [0, 64], sizes = [8, 32], strides = [1, 1]} : vector<8x96xf32> to vector<8x32xf32>
    %518 = vector.extract_strided_slice %496 {offsets = [0, 64], sizes = [8, 32], strides = [1, 1]} : vector<8x96xf32> to vector<8x32xf32>
    %519 = arith.mulf %506, %518 : vector<8x32xf32>
    %520 = arith.addf %517, %519 : vector<8x32xf32>
    %521 = math.tanh %520 : vector<8x32xf32>
    %cst_158 = arith.constant 1.000000e+00 : f32
    %522 = vector.broadcast %cst_158 : f32 to vector<8x32xf32>
    %523 = arith.subf %522, %516 : vector<8x32xf32>
    %524 = arith.mulf %523, %521 : vector<8x32xf32>
    %525 = arith.mulf %516, %459 : vector<8x32xf32>
    %526 = arith.addf %524, %525 : vector<8x32xf32>
    %527 = tpu.concatenate %526, %490 in 1 : vector<8x32xf32>, vector<8x32xf32> -> vector<8x64xf32>
    %528 = arith.truncf %527 : vector<8x64xf32> to vector<8x64xbf16>
    %cst_159 = arith.constant dense<0.000000e+00> : vector<8x128xf32>
    %529 = tpu.matmul %528, %18, %cst_159 {dimension_numbers = #tpu.dot_dimension_numbers<[1], [0], [0], [1], [0, 0, 1, 1], [], []>} : vector<8x64xbf16>, vector<64x128xbf16>, vector<8x128xf32> -> vector<8x128xf32>
    %530 = vector.broadcast %19 : vector<1x128xf32> to vector<8x128xf32>
    %531 = arith.addf %529, %530 : vector<8x128xf32>
    %532 = vector.extract_strided_slice %531 {offsets = [0, 0], sizes = [8, 32], strides = [1, 1]} : vector<8x128xf32> to vector<8x32xf32>
    %cst_160 = arith.constant 5.000000e-01 : f32
    %533 = vector.broadcast %cst_160 : f32 to vector<8x32xf32>
    %534 = arith.mulf %533, %532 : vector<8x32xf32>
    %535 = math.tanh %534 : vector<8x32xf32>
    %cst_161 = arith.constant 5.000000e-01 : f32
    %536 = vector.broadcast %cst_161 : f32 to vector<8x32xf32>
    %537 = arith.mulf %536, %535 : vector<8x32xf32>
    %cst_162 = arith.constant 5.000000e-01 : f32
    %538 = vector.broadcast %cst_162 : f32 to vector<8x32xf32>
    %539 = arith.addf %537, %538 : vector<8x32xf32>
    %540 = vector.extract_strided_slice %531 {offsets = [0, 32], sizes = [8, 32], strides = [1, 1]} : vector<8x128xf32> to vector<8x32xf32>
    %cst_163 = arith.constant 5.000000e-01 : f32
    %541 = vector.broadcast %cst_163 : f32 to vector<8x32xf32>
    %542 = arith.mulf %541, %540 : vector<8x32xf32>
    %543 = math.tanh %542 : vector<8x32xf32>
    %cst_164 = arith.constant 5.000000e-01 : f32
    %544 = vector.broadcast %cst_164 : f32 to vector<8x32xf32>
    %545 = arith.mulf %544, %543 : vector<8x32xf32>
    %cst_165 = arith.constant 5.000000e-01 : f32
    %546 = vector.broadcast %cst_165 : f32 to vector<8x32xf32>
    %547 = arith.addf %545, %546 : vector<8x32xf32>
    %548 = vector.extract_strided_slice %531 {offsets = [0, 64], sizes = [8, 32], strides = [1, 1]} : vector<8x128xf32> to vector<8x32xf32>
    %549 = vector.extract_strided_slice %531 {offsets = [0, 96], sizes = [8, 32], strides = [1, 1]} : vector<8x128xf32> to vector<8x32xf32>
    %550 = arith.mulf %539, %549 : vector<8x32xf32>
    %551 = arith.addf %548, %550 : vector<8x32xf32>
    %552 = math.tanh %551 : vector<8x32xf32>
    %cst_166 = arith.constant 1.000000e+00 : f32
    %553 = vector.broadcast %cst_166 : f32 to vector<8x32xf32>
    %554 = arith.subf %553, %547 : vector<8x32xf32>
    %555 = arith.mulf %554, %552 : vector<8x32xf32>
    %556 = arith.mulf %547, %490 : vector<8x32xf32>
    %557 = arith.addf %555, %556 : vector<8x32xf32>
    %558 = vector.shape_cast %88 : vector<8x32xf32> to vector<1x8x32xf32>
    %559 = vector.shape_cast %155 : vector<8x32xf32> to vector<1x8x32xf32>
    %560 = vector.shape_cast %222 : vector<8x32xf32> to vector<1x8x32xf32>
    %561 = vector.shape_cast %289 : vector<8x32xf32> to vector<1x8x32xf32>
    %562 = vector.shape_cast %356 : vector<8x32xf32> to vector<1x8x32xf32>
    %563 = vector.shape_cast %423 : vector<8x32xf32> to vector<1x8x32xf32>
    %564 = vector.shape_cast %490 : vector<8x32xf32> to vector<1x8x32xf32>
    %565 = vector.shape_cast %557 : vector<8x32xf32> to vector<1x8x32xf32>
    %566 = tpu.concatenate %558, %559, %560, %561, %562, %563, %564, %565 in 0 : vector<1x8x32xf32>, vector<1x8x32xf32>, vector<1x8x32xf32>, vector<1x8x32xf32>, vector<1x8x32xf32>, vector<1x8x32xf32>, vector<1x8x32xf32>, vector<1x8x32xf32> -> vector<8x8x32xf32>
    %c0_167 = arith.constant 0 : index
    %c0_168 = arith.constant 0 : index
    %c0_169 = arith.constant 0 : index
    %567 = vector.load %arg10[%c0_167, %c0_168, %c0_169] : memref<8x8x32xf32, #tpu.memory_space<vmem>>, vector<8x8x32xf32>
    tpu.vector_store %arg10[%c0_167, %c0_168, %c0_169], %566 {strides = array<i32>} : memref<8x8x32xf32, #tpu.memory_space<vmem>>, vector<8x8x32xf32>,
    %c0_170 = arith.constant 0 : index
    %c0_171 = arith.constant 0 : index
    %c0_172 = arith.constant 0 : index
    %568 = vector.load %arg11[%c0_170, %c0_171, %c0_172] : memref<2x8x32xf32, #tpu.memory_space<vmem>>, vector<1x8x32xf32>
    %569 = vector.shape_cast %568 : vector<1x8x32xf32> to vector<8x32xf32>
    %570 = vector.shape_cast %526 : vector<8x32xf32> to vector<1x8x32xf32>
    tpu.vector_store %arg11[%c0_170, %c0_171, %c0_172], %570 {strides = array<i32>} : memref<2x8x32xf32, #tpu.memory_space<vmem>>, vector<1x8x32xf32>,
    %c1_173 = arith.constant 1 : index
    %c0_174 = arith.constant 0 : index
    %c0_175 = arith.constant 0 : index
    %571 = vector.load %arg11[%c1_173, %c0_174, %c0_175] : memref<2x8x32xf32, #tpu.memory_space<vmem>>, vector<1x8x32xf32>
    %572 = vector.shape_cast %571 : vector<1x8x32xf32> to vector<8x32xf32>
    %573 = vector.shape_cast %557 : vector<8x32xf32> to vector<1x8x32xf32>
    tpu.vector_store %arg11[%c1_173, %c0_174, %c0_175], %573 {strides = array<i32>} : memref<2x8x32xf32, #tpu.memory_space<vmem>>, vector<1x8x32xf32>,
    %574 = vector.shape_cast %566 : vector<8x8x32xf32> to vector<64x32xf32>
    %c0_176 = arith.constant 0 : index
    %c0_177 = arith.constant 0 : index
    %575 = vector.load %arg8[%c0_176, %c0_177] : memref<32x4xf32, #tpu.memory_space<vmem>>, vector<32x4xf32>
    %cst_178 = arith.constant dense<0.000000e+00> : vector<64x4xf32>
    %576 = tpu.matmul %574, %575, %cst_178 {dimension_numbers = #tpu.dot_dimension_numbers<[1], [0], [0], [1], [0, 0, 1, 1], [], []>} : vector<64x32xf32>, vector<32x4xf32>, vector<64x4xf32> -> vector<64x4xf32>
    %c0_179 = arith.constant 0 : index
    %c0_180 = arith.constant 0 : index
    %577 = vector.load %arg9[%c0_179, %c0_180] : memref<1x4xf32, #tpu.memory_space<vmem>>, vector<1x4xf32>
    %578 = vector.broadcast %577 : vector<1x4xf32> to vector<64x4xf32>
    %579 = arith.addf %576, %578 : vector<64x4xf32>
    %cst_181 = arith.constant dense<0xFF800000> : vector<64xf32>
    %580 = vector.multi_reduction <maximumf>, %579, %cst_181 [1] : vector<64x4xf32> to vector<64xf32>
    %581 = vector.shape_cast %580 : vector<64xf32> to vector<64x1xf32>
    %582 = vector.broadcast %581 : vector<64x1xf32> to vector<64x4xf32>
    %583 = arith.subf %579, %582 : vector<64x4xf32>
    %584 = math.exp %583 : vector<64x4xf32>
    %cst_182 = arith.constant dense<0.000000e+00> : vector<64xf32>
    %585 = vector.multi_reduction <add>, %584, %cst_182 [1] : vector<64x4xf32> to vector<64xf32>
    %586 = vector.shape_cast %585 : vector<64xf32> to vector<64x1xf32>
    %587 = tpu.reciprocal %586 {approx = true} : vector<64x1xf32> -> vector<64x1xf32>
    %588 = vector.broadcast %587 : vector<64x1xf32> to vector<64x4xf32>
    %589 = arith.mulf %584, %588 : vector<64x4xf32>
    %590 = math.log %586 : vector<64x1xf32>
    %591 = vector.broadcast %590 : vector<64x1xf32> to vector<64x4xf32>
    %592 = arith.subf %583, %591 : vector<64x4xf32>
    %593 = vector.shape_cast %589 : vector<64x4xf32> to vector<8x8x4xf32>
    %c0_183 = arith.constant 0 : index
    %c0_184 = arith.constant 0 : index
    %c0_185 = arith.constant 0 : index
    %594 = vector.load %arg12[%c0_183, %c0_184, %c0_185] : memref<8x8x4xf32, #tpu.memory_space<vmem>>, vector<8x8x4xf32>
    tpu.vector_store %arg12[%c0_183, %c0_184, %c0_185], %593 {strides = array<i32>} : memref<8x8x4xf32, #tpu.memory_space<vmem>>, vector<8x8x4xf32>,
    %595 = tpu.iota {dimensions = array<i32: 1>} : vector<64x4xi32>
    %cst_186 = arith.constant dense<0xFF800000> : vector<64xf32>
    %596 = vector.multi_reduction <maximumf>, %2, %cst_186 [1] : vector<64x4xf32> to vector<64xf32>
    %597 = vector.shape_cast %596 : vector<64xf32> to vector<64x1xf32>
    %598 = vector.broadcast %597 : vector<64x1xf32> to vector<64x4xf32>
    %599 = arith.cmpf oge, %2, %598 : vector<64x4xf32>
    %c4_i32 = arith.constant 4 : i32
    %600 = vector.broadcast %c4_i32 : i32 to vector<64x4xi32>
    %601 = arith.select %599, %595, %600 : vector<64x4xi1>, vector<64x4xi32>
    %cst_187 = arith.constant dense<2147483647> : vector<64xi32>
    %602 = vector.multi_reduction <minsi>, %601, %cst_187 [1] : vector<64x4xi32> to vector<64xi32>
    %603 = vector.shape_cast %602 : vector<64xi32> to vector<64x1xi32>
    %604 = vector.broadcast %603 : vector<64x1xi32> to vector<64x4xi32>
    %605 = arith.cmpi eq, %595, %604 : vector<64x4xi32>
    %cst_188 = arith.constant 0.000000e+00 : f32
    %606 = vector.broadcast %cst_188 : f32 to vector<64x4xf32>
    %607 = arith.select %605, %592, %606 : vector<64x4xi1>, vector<64x4xf32>
    %cst_189 = arith.constant dense<0.000000e+00> : vector<64xf32>
    %608 = vector.multi_reduction <add>, %607, %cst_189 [1] : vector<64x4xf32> to vector<64xf32>
    %609 = vector.shape_cast %608 : vector<64xf32> to vector<64x1xf32>
    %cst_190 = arith.constant dense<0.000000e+00> : vector<1xf32>
    %610 = vector.multi_reduction <add>, %609, %cst_190 [0] : vector<64x1xf32> to vector<1xf32>
    %611 = vector.shape_cast %610 : vector<1xf32> to vector<1x1xf32>
    %cst_191 = arith.constant 0.000000e+00 : f32
    %612 = vector.broadcast %cst_191 : f32 to vector<1x1xf32>
    %613 = arith.subf %612, %611 : vector<1x1xf32>
    %c0_192 = arith.constant 0 : index
    %c0_193 = arith.constant 0 : index
    %614 = vector.load %arg13[%c0_192, %c0_193] : memref<1x1xf32, #tpu.memory_space<vmem>>, vector<1x1xf32>
    tpu.vector_store %arg13[%c0_192, %c0_193], %613 {strides = array<i32>} : memref<1x1xf32, #tpu.memory_space<vmem>>, vector<1x1xf32>,
    return
  }
  func.func @transform_0(%arg0: i32) -> (i32, i32, i32) {
    %c0_i32 = arith.constant 0 : i32
    %c0_i32_0 = arith.constant 0 : i32
    %c0_i32_1 = arith.constant 0 : i32
    %c0_i32_2 = arith.constant 0 : i32
    return %c0_i32, %c0_i32_0, %c0_i32_1 : i32, i32, i32
  }
  func.func @transform_1(%arg0: i32) -> (i32, i32) {
    %c0_i32 = arith.constant 0 : i32
    %c0_i32_0 = arith.constant 0 : i32
    %c0_i32_1 = arith.constant 0 : i32
    return %c0_i32, %c0_i32_0 : i32, i32
  }
  func.func @transform_2(%arg0: i32) -> (i32, i32) {
    %c0_i32 = arith.constant 0 : i32
    %c0_i32_0 = arith.constant 0 : i32
    %c0_i32_1 = arith.constant 0 : i32
    return %c0_i32, %c0_i32_0 : i32, i32
  }
  func.func @transform_3(%arg0: i32) -> (i32, i32) {
    %c0_i32 = arith.constant 0 : i32
    %c0_i32_0 = arith.constant 0 : i32
    %c0_i32_1 = arith.constant 0 : i32
    return %c0_i32, %c0_i32_0 : i32, i32
  }
  func.func @transform_4(%arg0: i32) -> (i32, i32) {
    %c0_i32 = arith.constant 0 : i32
    %c0_i32_0 = arith.constant 0 : i32
    %c0_i32_1 = arith.constant 0 : i32
    return %c0_i32, %c0_i32_0 : i32, i32
  }
  func.func @transform_5(%arg0: i32) -> (i32, i32) {
    %c0_i32 = arith.constant 0 : i32
    %c0_i32_0 = arith.constant 0 : i32
    %c0_i32_1 = arith.constant 0 : i32
    return %c0_i32, %c0_i32_0 : i32, i32
  }
  func.func @transform_6(%arg0: i32) -> (i32, i32) {
    %c0_i32 = arith.constant 0 : i32
    %c0_i32_0 = arith.constant 0 : i32
    %c0_i32_1 = arith.constant 0 : i32
    return %c0_i32, %c0_i32_0 : i32, i32
  }
  func.func @transform_7(%arg0: i32) -> (i32, i32) {
    %c0_i32 = arith.constant 0 : i32
    %c0_i32_0 = arith.constant 0 : i32
    %c0_i32_1 = arith.constant 0 : i32
    return %c0_i32, %c0_i32_0 : i32, i32
  }
  func.func @transform_8(%arg0: i32) -> (i32, i32) {
    %c0_i32 = arith.constant 0 : i32
    %c0_i32_0 = arith.constant 0 : i32
    %c0_i32_1 = arith.constant 0 : i32
    return %c0_i32, %c0_i32_0 : i32, i32
  }
  func.func @transform_9(%arg0: i32) -> (i32, i32, i32) {
    %c0_i32 = arith.constant 0 : i32
    %c0_i32_0 = arith.constant 0 : i32
    %c0_i32_1 = arith.constant 0 : i32
    %c0_i32_2 = arith.constant 0 : i32
    return %c0_i32, %c0_i32_0, %c0_i32_1 : i32, i32, i32
  }
  func.func @transform_10(%arg0: i32) -> (i32, i32, i32) {
    %c0_i32 = arith.constant 0 : i32
    %c0_i32_0 = arith.constant 0 : i32
    %c0_i32_1 = arith.constant 0 : i32
    %c0_i32_2 = arith.constant 0 : i32
    return %c0_i32, %c0_i32_0, %c0_i32_1 : i32, i32, i32
  }
  func.func @transform_11(%arg0: i32) -> (i32, i32, i32) {
    %c0_i32 = arith.constant 0 : i32
    %c0_i32_0 = arith.constant 0 : i32
    %c0_i32_1 = arith.constant 0 : i32
    %c0_i32_2 = arith.constant 0 : i32
    return %c0_i32, %c0_i32_0, %c0_i32_1 : i32, i32, i32
  }
  func.func @transform_12(%arg0: i32) -> (i32, i32) {
    %c0_i32 = arith.constant 0 : i32
    %c0_i32_0 = arith.constant 0 : i32
    %c0_i32_1 = arith.constant 0 : i32
    return %c0_i32, %c0_i32_0 : i32, i32
  }
}

</mosaic_0001>

<bundles_post_ra>
// kernel: tpu_custom_call.1
= control target key start
LH: loop header
LB: loop body
LE: loop exit
PB: predicated region body
PF: predicated region fallthrough
CT: control target
= control target key end

     0   :  { %18 = vsyncpa [#allocation4], 0  ;;  %v2508_v1 = vmov 0.0   ;;  %vm2509_vm0 = vmmov 0   ;;  %vm188_vm1 = vcmask 785408   ;;  %s3369_s0 = inlined_call_operand.vmem [shape: f32[8,8,4], index: 0, kind: input, shape index: {}]   ;;  %s3370_s1 = inlined_call_operand.vmem [shape: f32[4,96], index: 1, kind: input, shape index: {}]   ;;  %s3371_s2 = inlined_call_operand.vmem [shape: f32[1,96], index: 2, kind: input, shape index: {}]   ;;  %s3372_s3 = inlined_call_operand.vmem [shape: bf16[32,96], index: 3, kind: input, shape index: {}]   ;;  %s3373_s4 = inlined_call_operand.vmem [shape: f32[1,96], index: 4, kind: input, shape index: {}]   ;;  %s3374_s5 = inlined_call_operand.vmem [shape: bf16[64,128], index: 5, kind: input, shape index: {}]   ;;  %s3375_s6 = inlined_call_operand.vmem [shape: f32[1,128], index: 6, kind: input, shape index: {}]   ;;  %s3376_s7 = inlined_call_operand.vmem [shape: f32[32,4], index: 7, kind: input, shape index: {}]   ;;  %s3377_s8 = inlined_call_operand.vmem [shape: f32[1,4], index: 8, kind: input, shape index: {}]   ;;  %s3378_s9 = inlined_call_operand.hbm [shape: f32[8,8,32], index: 9, kind: output, shape index: {0}]   ;;  %s3379_s10 = inlined_call_operand.hbm [shape: f32[2,8,32], index: 10, kind: output, shape index: {1}]   ;;  %s3380_s11 = inlined_call_operand.vmem [shape: f32[8,8,4], index: 11, kind: output, shape index: {2}]   ;;  %s3381_s12 = inlined_call_operand.hbm [shape: f32[1,1], index: 12, kind: output, shape index: {3}]  }
   0x1   :  { %v2587_v0 = vld [vmem:[%s3372_s3 + $0x8] sm:$0xff]   ;;  %2126 = vmatprep.subr.bf16.mxu1 %v2508_v1  ;;  %v2594_v2 = vld [vmem:[%s3372_s3] sm:$0xff]   ;;  %2130 = vmatprep.mubr.msk.bf16.mxu1 %vm2509_vm0, %v2508_v1 }
   0x2   :  { %2127 = vmatpush3.bf16.msra.mxu1 %v2587_v0  ;;  %v2601_v3 = vld [vmem:[%s3371_s2] ss:$0 sm:$0xff] }
   0x3   :  { %2128 = vmatprep.subr.bf16.mxu1 %v2508_v1  ;;  %189 = vst.msk [vmem:[#allocation2] sm:$0xff] %vm188_vm1, %v2601_v3 }
   0x4   :  { %19 = vsyncpa [#allocation6], 0  ;;  %v2510_v4 = vmov 0   ;;  %v2617_v5 = vld [vmem:[%s3373_s4] ss:$0 sm:$0xff]  ;;  %s2511_s27 = smov 64  }
   0x5   :  { %v48_v21 = vld [vmem:[%s3370_s1] sm:$0xf]  ;;  %vm74_vm2 = vcmask 1043456   ;;  %vm49_vm3 = vcmask 31744   ;;  %v41_v23 = vld [vmem:[%s3369_s0 + $0x8] sm:$0xff]  ;;  %s2512_s1 = smov 96  }
   0x6   :  { %2129 = vmatpush3.bf16.msra.mxu1 %v2594_v2  ;;  %v40_v22 = vld [vmem:[%s3369_s0] sm:$0xff]  ;;  %2112 = vmatprep.subr.msk.mxu0 %vm74_vm2, %v48_v21  ;;  %vm238_vm4 = vcmask 261120   ;;  %v2650_v36 = vld [vmem:[%s3374_s5 + $0x18] sm:$0xff]   ;;  %v42_v37 = vld [vmem:[%s3369_s0 + $0x10] sm:$0xff]  ;;  %vm342_vm5 = vcmask 523264   ;;  %s2513_s18 = smov 32  }
   0x7   :  { %2146 = vmatprep.subr.bf16.mxu1 %v2508_v1  ;;  %2114 = vmatprep.mubr.msk.f32.mxu0 %vm49_vm3, %v40_v22  ;;  %v43_v38 = vld [vmem:[%s3369_s0 + $0x18] sm:$0xff]  ;;  %v44_v39 = vld [vmem:[%s3369_s0 + $0x20] sm:$0xff]  ;;  %v2666_v40 = vld [vmem:[%s3374_s5 + $0x10] sm:$0xff]  }
   0x8   :  { %2113 = vmatpush3.msk.msra.mxu0 %vm74_vm2, %v48_v21  ;;  %v45_v42 = vld [vmem:[%s3369_s0 + $0x28] sm:$0xff]  ;;  %v46_v51 = vld [vmem:[%s3369_s0 + $0x30] sm:$0xff]  ;;  %v47_v53 = vld [vmem:[%s3369_s0 + $0x38] sm:$0xff] }
   0x9   :  { %2131 = vmatmul.mubr.bf16.vlgmr.msra.gmra.mxu1 %v2510_v4  ;;  %2115 = vmatmul.mubr.msk.f32.vlgmr.msra.gmra.mxu0 %vm49_vm3, %v41_v23  ;;  %v2686_v50 = vld [vmem:[%s3374_s5 + $0x8] sm:$0xff]   ;;  %v2702_v54 = vld [vmem:[%s3374_s5] sm:$0xff]  }
   0xa   :  { %2147 = vmatpush3.bf16.msra.mxu1 %v2587_v0  ;;  %2150 = vmatprep.mubr.msk.bf16.mxu1 %vm2509_vm0, %v2508_v1  ;;  %v219_v11 = vld [vmem:[#allocation2] sm:$0xff] }
   0xb   :  { %2148 = vmatprep.subr.bf16.mxu1 %v2508_v1  ;;  %2134 = vmatprep.subr.bf16.mxu0 %v2508_v1  ;;  %v2742_v23 = vld [vmem:[%s3375_s6] ss:$0 sm:$0xff] }
   0xc   :  { %2117 = vmatprep.mubr.msk.f32.mxu0 %vm49_vm3, %v42_v37  ;;  %2135 = vmatpush3.bf16.msra.mxu0 %v2650_v36 }
   0xd   :  { %2118 = vmatmul.mubr.msk.f32.gmra.mxu0 %vm49_vm3, %v43_v38  ;;  %2136 = vmatprep.subr.bf16.mxu0 %v2508_v1 }
   0xe   :  { %2149 = vmatpush3.bf16.msra.mxu1 %v2594_v2  ;;  %2120 = vmatprep.mubr.msk.f32.mxu0 %vm49_vm3, %v44_v39 }
   0xf   :  { %2154 = vmatprep.subr.bf16.mxu1 %v2508_v1 }
  0x10   :  { %2137 = vmatpush3.bf16.msra.mxu0 %v2666_v40 }
  0x11   :  { %2121 = vmatmul.mubr.msk.f32.gmra.mxu0 %vm49_vm3, %v45_v42  ;;  %2138 = vmatprep.subr.bf16.mxu0 %v2508_v1 }
  0x12   :  { %2123 = vmatprep.mubr.msk.f32.mxu0 %vm49_vm3, %v46_v51 }
  0x14   :  { %2139 = vmatpush3.bf16.msra.mxu0 %v2686_v50 }
  0x15   :  { %2140 = vmatprep.subr.bf16.mxu0 %v2508_v1  ;;  %2124 = vmatmul.mubr.msk.f32.gmra.mxu0 %vm49_vm3, %v47_v53 }
  0x16   :  { %2142 = vmatprep.mubr.msk.bf16.mxu0 %vm2509_vm0, %v2508_v1 }
  0x18   :  { %2141 = vmatpush3.bf16.msra.mxu0 %v2702_v54 }
  0x19   :  { %2166 = vmatprep.subr.bf16.mxu0 %v2508_v1 }
  0xc9   :  { %v276_v6 = vpop.f32.mrf.mxu1  ;;  %v2116_v31 = vpop.f32.mrf.mxu0 }
  0xca   :  { %v277_v7 = vadd.f32 %v2617_v5, %v276_v6  ;;  %v191_v32 = vadd.f32 %v2116_v31, %v2601_v3 }
  0xcb   :  { %v2132_v8 = vpop.f32.mrf.mxu1  ;;  %v144_v33 = vpop.f32.mrf.mxu0 }
  0xcc   :  { %288 = vrot.lane.b32.xlu0 %v277_v7, %s2511_s27  ;;  %v282_v12 = vadd.f32 %v277_v7, %v219_v11  ;;  %199 = vst.msk [vmem:[#allocation2 + $0x10] sm:$0xff] %vm188_vm1, %v191_v32  ;;  %v190_v34 = vadd.f32 %v2601_v3, %v144_v33 }
  0xcd   :  { %v279_v9 = vpop.f32.mrf.mxu1  ;;  %v2119_v4 = vpop.f32.mrf.mxu0 }
  0xce   :  { %v283_v13 = vmul.f32 0.5, %v282_v12  ;;  %198 = vst.msk [vmem:[#allocation2 + $0x8] sm:$0xff] %vm188_vm1, %v190_v34  ;;  %v193_v6 = vadd.f32 %v2119_v4, %v2601_v3 }
  0xcf   :  { %v2133_v10 = vpop.f32.mrf.mxu1  ;;  %v154_v7 = vpop.f32.mrf.mxu0 }
  0xd0   :  { %2323 = vtanh.f32 %v283_v13  ;;  %201 = vst.msk [vmem:[#allocation2 + $0x20] sm:$0xff] %vm188_vm1, %v193_v6  ;;  %v192_v8 = vadd.f32 %v2601_v3, %v154_v7 }
  0xd1   :  { %v2122_v9 = vpop.f32.mrf.mxu0 }
  0xd2   :  { %200 = vst.msk [vmem:[#allocation2 + $0x18] sm:$0xff] %vm188_vm1, %v192_v8  ;;  %v195_v10 = vadd.f32 %v2122_v9, %v2601_v3 }
  0xd3   :  { %v164_v12 = vpop.f32.mrf.mxu0 }
  0xd4   :  { %203 = vst.msk [vmem:[#allocation2 + $0x30] sm:$0xff] %vm188_vm1, %v195_v10  ;;  %v194_v13 = vadd.f32 %v2601_v3, %v164_v12 }
  0xd5   :  { %v409_v47 = vld [vmem:[#allocation2 + $0x8] sm:$0xff] }
  0xd6   :  { %202 = vst.msk [vmem:[#allocation2 + $0x28] sm:$0xff] %vm188_vm1, %v194_v13 }
  0xdd   :  { %v2324_v14 = vpop.eup %2323 }
  0xde   :  { %v285_v15 = vmul.f32 0.5, %v2324_v14  ;;  %v2125_v14 = vpop.f32.mrf.mxu0 }
  0xe0   :  { %v286_v16 = vadd.f32 0.5, %v285_v15  ;;  %v174_v15 = vpop.f32.mrf.mxu0 }
  0xe2   :  { %v298_v25 = vsub.f32 1.0, %v286_v16  ;;  %v304_v27 = vmul.f32 0.0, %v286_v16 }
 0x13e   :  { %v289_v17 = vpop.permute.xlu0 %288 }
 0x13f   :  { %v291_v18 = vmul.f32 %v289_v17, %v286_v16  ;;  %v196_v16 = vadd.f32 %v2601_v3, %v174_v15 }
 0x141   :  { %293 = vrot.lane.b32.xlu0 %v291_v18, %s2511_s27  ;;  %204 = vst.msk [vmem:[#allocation2 + $0x38] sm:$0xff] %vm188_vm1, %v196_v16 }
 0x1b3   :  { %v294_v19 = vpop.permute.xlu0 %293 }
 0x1b4   :  { %v296_v20 = vadd.f32 %v294_v19, %v219_v11 }
 0x1b6   :  { %2325 = vtanh.f32 %v296_v20 }
 0x1c3   :  { %v2326_v24 = vpop.eup %2325 }
 0x1c4   :  { %300 = vrot.lane.b32.xlu1 %v2326_v24, %s2512_s1 }
 0x236   :  { %v301_v26 = vpop.permute.xlu1 %300 }
 0x237   :  { %v303_v28 = vmul.f32 %v301_v26, %v298_v25 }
 0x239   :  { %v2635_v29 = vadd.f32 %v304_v27, %v303_v28 }
 0x23b   :  { %v410_v30 = vpack.c.bf16 %v2635_v29, %v2635_v29 }
 0x23d   :  { %412 = vrot.lane.b32.xlu1 %v410_v30, %s2512_s1 }
 0x2af   :  { %v413_v35 = vpop.permute.xlu1 %412 }
 0x2b0   :  { %2151 = vmatmul.mubr.msk.bf16.vlgmr.msra.gmra.mxu1 %vm238_vm4, %v413_v35 }
 0x2b1   :  { %2162 = vmatprep.mubr.msk.bf16.mxu1 %vm2509_vm0, %v2508_v1  ;;  %2155 = vmatpush3.bf16.msra.mxu1 %v2650_v36 }
 0x2b2   :  { %2156 = vmatprep.subr.bf16.mxu1 %v2508_v1 }
 0x2b5   :  { %2157 = vmatpush3.bf16.msra.mxu1 %v2666_v40 }
 0x2b6   :  { %2158 = vmatprep.subr.bf16.mxu1 %v2508_v1 }
 0x2b9   :  { %2159 = vmatpush3.bf16.msra.mxu1 %v2686_v50 }
 0x2ba   :  { %2160 = vmatprep.subr.bf16.mxu1 %v2508_v1 }
 0x2bd   :  { %2161 = vmatpush3.bf16.msra.mxu1 %v2702_v54 }
 0x2be   :  { %2186 = vmatprep.subr.bf16.mxu1 %v2508_v1 }
 0x370   :  { %v451_v41 = vpop.f32.mrf.mxu1 }
 0x371   :  { %v452_v43 = vadd.f32 %v2617_v5, %v451_v41 }
 0x372   :  { %v2152_v44 = vpop.f32.mrf.mxu1 }
 0x373   :  { %463 = vrot.lane.b32.xlu0 %v452_v43, %s2511_s27  ;;  %v457_v48 = vadd.f32 %v452_v43, %v409_v47 }
 0x374   :  { %v454_v45 = vpop.f32.mrf.mxu1 }
 0x375   :  { %v458_v49 = vmul.f32 0.5, %v457_v48  ;;  %v554_v45 = vld [vmem:[#allocation2 + $0x10] sm:$0xff] }
 0x376   :  { %v2153_v46 = vpop.f32.mrf.mxu1 }
 0x377   :  { %2327 = vtanh.f32 %v458_v49 }
 0x384   :  { %v2328_v52 = vpop.eup %2327 }
 0x385   :  { %v460_v55 = vmul.f32 0.5, %v2328_v52 }
 0x387   :  { %v461_v56 = vadd.f32 0.5, %v460_v55 }
 0x389   :  { %v473_v17 = vsub.f32 1.0, %v461_v56  ;;  %v479_v19 = vmul.f32 %v461_v56, %v2635_v29 }
 0x3e5   :  { %v464_v57 = vpop.permute.xlu0 %463 }
 0x3e6   :  { %v466_v58 = vmul.f32 %v464_v57, %v461_v56 }
 0x3e8   :  { %468 = vrot.lane.b32.xlu1 %v466_v58, %s2511_s27 }
 0x3ec   :  { %307 = vrot.lane.b32.xlu1 %v2635_v29, %s2512_s1 }
 0x45a   :  { %v469_v59 = vpop.permute.xlu1 %468 }
 0x45b   :  { %v471_v60 = vadd.f32 %v469_v59, %v409_v47 }
 0x45d   :  { %2329 = vtanh.f32 %v471_v60 }
 0x45e   :  { %v308_v61 = vpop.permute.xlu1 %307 }
 0x45f   :  { %v310_v62 = vsel %vm238_vm4, %v308_v61, 0.0 }
 0x460   :  { %v311_v63 = vpack.c.bf16 %v310_v62, %v310_v62 }
 0x462   :  { %2143 = vmatmul.mubr.msk.bf16.vlgmr.msra.gmra.mxu0 %vm342_vm5, %v311_v63 }
 0x463   :  { %2167 = vmatpush3.bf16.msra.mxu0 %v2587_v0  ;;  %2170 = vmatprep.mubr.msk.bf16.mxu0 %vm2509_vm0, %v2508_v1 }
 0x464   :  { %2168 = vmatprep.subr.bf16.mxu0 %v2508_v1 }
 0x467   :  { %2169 = vmatpush3.bf16.msra.mxu0 %v2594_v2 }
 0x468   :  { %2174 = vmatprep.subr.bf16.mxu0 %v2508_v1 }
 0x46a   :  { %v2330_v11 = vpop.eup %2329 }
 0x46b   :  { %475 = vrot.lane.b32.xlu0 %v2330_v11, %s2512_s1 }
 0x4dd   :  { %v476_v18 = vpop.permute.xlu0 %475 }
 0x4de   :  { %v478_v20 = vmul.f32 %v476_v18, %v473_v17 }
 0x4e0   :  { %v2734_v21 = vadd.f32 %v479_v19, %v478_v20 }
 0x4e2   :  { %v555_v22 = vpack.c.bf16 %v2734_v21, %v2734_v21 }
 0x4e4   :  { %557 = vrot.lane.b32.xlu0 %v555_v22, %s2512_s1 }
 0x522   :  { %v380_v3 = vpop.f32.mrf.mxu0 }
 0x523   :  { %v381_v24 = vadd.f32 %v2742_v23, %v380_v3 }
 0x524   :  { %v2144_v25 = vpop.f32.mrf.mxu0 }
 0x525   :  { %391 = vrot.lane.b32.xlu1 %v381_v24, %s2513_s18  ;;  %v386_v29 = vmul.f32 0.5, %v381_v24 }
 0x526   :  { %v383_v26 = vpop.f32.mrf.mxu0 }
 0x527   :  { %2331 = vtanh.f32 %v386_v29 }
 0x528   :  { %v2145_v27 = vpop.f32.mrf.mxu0 }
 0x534   :  { %v2332_v30 = vpop.eup %2331 }
 0x535   :  { %v388_v31 = vmul.f32 0.5, %v2332_v30 }
 0x537   :  { %v389_v32 = vadd.f32 0.5, %v388_v31 }
 0x539   :  { %v401_v56 = vsub.f32 1.0, %v389_v32  ;;  %v407_v59 = vmul.f32 0.0, %v389_v32 }
 0x556   :  { %v558_v28 = vpop.permute.xlu0 %557 }
 0x557   :  { %2171 = vmatmul.mubr.msk.bf16.vlgmr.msra.gmra.mxu0 %vm238_vm4, %v558_v28 }
 0x558   :  { %2175 = vmatpush3.bf16.msra.mxu0 %v2650_v36  ;;  %2182 = vmatprep.mubr.msk.bf16.mxu0 %vm2509_vm0, %v2508_v1 }
 0x559   :  { %2176 = vmatprep.subr.bf16.mxu0 %v2508_v1 }
 0x55c   :  { %2177 = vmatpush3.bf16.msra.mxu0 %v2666_v40 }
 0x55d   :  { %2178 = vmatprep.subr.bf16.mxu0 %v2508_v1 }
 0x560   :  { %2179 = vmatpush3.bf16.msra.mxu0 %v2686_v50 }
 0x561   :  { %2180 = vmatprep.subr.bf16.mxu0 %v2508_v1 }
 0x564   :  { %2181 = vmatpush3.bf16.msra.mxu0 %v2702_v54 }
 0x565   :  { %2206 = vmatprep.subr.bf16.mxu0 %v2508_v1 }
 0x597   :  { %v392_v33 = vpop.permute.xlu1 %391 }
 0x598   :  { %v394_v34 = vmul.f32 %v392_v33, %v389_v32  ;;  %v699_v33 = vld [vmem:[#allocation2 + $0x18] sm:$0xff] }
 0x59a   :  { %396 = vrot.lane.b32.xlu1 %v394_v34, %s2511_s27 }
 0x60c   :  { %v397_v35 = vpop.permute.xlu1 %396 }
 0x60d   :  { %v399_v37 = vadd.f32 %v397_v35, %v381_v24 }
 0x60f   :  { %2333 = vtanh.f32 %v399_v37 }
 0x617   :  { %v596_v38 = vpop.f32.mrf.mxu0 }
 0x618   :  { %v597_v39 = vadd.f32 %v2617_v5, %v596_v38 }
 0x619   :  { %v2172_v41 = vpop.f32.mrf.mxu0 }
 0x61a   :  { %608 = vrot.lane.b32.xlu0 %v597_v39, %s2511_s27  ;;  %v602_v46 = vadd.f32 %v597_v39, %v554_v45 }
 0x61b   :  { %v599_v42 = vpop.f32.mrf.mxu0 }
 0x61c   :  { %v2334_v43 = vpop.eup %2333  ;;  %v603_v47 = vmul.f32 0.5, %v602_v46 }
 0x61d   :  { %403 = vrot.lane.b32.xlu1 %v2334_v43, %s2512_s1  ;;  %v2173_v44 = vpop.f32.mrf.mxu0 }
 0x61e   :  { %2335 = vtanh.f32 %v603_v47 }
 0x62b   :  { %v2336_v48 = vpop.eup %2335 }
 0x62c   :  { %v605_v49 = vmul.f32 0.5, %v2336_v48 }
 0x62e   :  { %v606_v51 = vadd.f32 0.5, %v605_v49 }
 0x630   :  { %v618_v7 = vsub.f32 1.0, %v606_v51  ;;  %v624_v9 = vmul.f32 %v606_v51, %v2734_v21 }
 0x68c   :  { %v609_v52 = vpop.permute.xlu0 %608 }
 0x68d   :  { %v611_v53 = vmul.f32 %v609_v52, %v606_v51 }
 0x68f   :  { %613 = vrot.lane.b32.xlu0 %v611_v53, %s2511_s27  ;;  %v404_v55 = vpop.permute.xlu1 %403 }
 0x690   :  { %v406_v57 = vmul.f32 %v404_v55, %v401_v56 }
 0x692   :  { %v2764_v61 = vadd.f32 %v407_v59, %v406_v57 }
 0x693   :  { %482 = vrot.lane.b32.xlu0 %v2734_v21, %s2512_s1 }
 0x701   :  { %v614_v58 = vpop.permute.xlu0 %613 }
 0x702   :  { %v616_v60 = vadd.f32 %v614_v58, %v554_v45 }
 0x704   :  { %2337 = vtanh.f32 %v616_v60 }
 0x705   :  { %v483_v62 = vpop.permute.xlu0 %482 }
 0x706   :  { %v485_v63 = vsel %vm238_vm4, %v483_v62, %v2764_v61 }
 0x707   :  { %v486_v4 = vpack.c.bf16 %v485_v63, %v485_v63 }
 0x709   :  { %2163 = vmatmul.mubr.msk.bf16.vlgmr.msra.gmra.mxu1 %vm342_vm5, %v486_v4 }
 0x70a   :  { %2187 = vmatpush3.bf16.msra.mxu1 %v2587_v0  ;;  %2190 = vmatprep.mubr.msk.bf16.mxu1 %vm2509_vm0, %v2508_v1 }
 0x70b   :  { %2188 = vmatprep.subr.bf16.mxu1 %v2508_v1 }
 0x70e   :  { %2189 = vmatpush3.bf16.msra.mxu1 %v2594_v2 }
 0x70f   :  { %2194 = vmatprep.subr.bf16.mxu1 %v2508_v1 }
 0x711   :  { %v2338_v6 = vpop.eup %2337 }
 0x712   :  { %620 = vrot.lane.b32.xlu1 %v2338_v6, %s2512_s1 }
 0x784   :  { %v621_v8 = vpop.permute.xlu1 %620 }
 0x785   :  { %v623_v10 = vmul.f32 %v621_v8, %v618_v7 }
 0x787   :  { %v2777_v11 = vadd.f32 %v624_v9, %v623_v10 }
 0x789   :  { %v700_v12 = vpack.c.bf16 %v2777_v11, %v2777_v11 }
 0x78b   :  { %702 = vrot.lane.b32.xlu0 %v700_v12, %s2512_s1 }
 0x7c9   :  { %v524_v13 = vpop.f32.mrf.mxu1 }
 0x7ca   :  { %v525_v14 = vadd.f32 %v2742_v23, %v524_v13 }
 0x7cb   :  { %v2164_v15 = vpop.f32.mrf.mxu1 }
 0x7cc   :  { %535 = vrot.lane.b32.xlu1 %v525_v14, %s2513_s18  ;;  %v530_v19 = vmul.f32 0.5, %v525_v14 }
 0x7cd   :  { %v527_v16 = vpop.f32.mrf.mxu1 }
 0x7ce   :  { %2339 = vtanh.f32 %v530_v19 }
 0x7cf   :  { %v2165_v17 = vpop.f32.mrf.mxu1 }
 0x7db   :  { %v2340_v20 = vpop.eup %2339 }
 0x7dc   :  { %v532_v21 = vmul.f32 0.5, %v2340_v20 }
 0x7de   :  { %v533_v22 = vadd.f32 0.5, %v532_v21 }
 0x7e0   :  { %v545_v43 = vsub.f32 1.0, %v533_v22  ;;  %v551_v45 = vmul.f32 %v533_v22, %v2764_v61 }
 0x7fd   :  { %v703_v18 = vpop.permute.xlu0 %702 }
 0x7fe   :  { %2191 = vmatmul.mubr.msk.bf16.vlgmr.msra.gmra.mxu1 %vm238_vm4, %v703_v18 }
 0x7ff   :  { %2195 = vmatpush3.bf16.msra.mxu1 %v2650_v36  ;;  %2202 = vmatprep.mubr.msk.bf16.mxu1 %vm2509_vm0, %v2508_v1 }
 0x800   :  { %2196 = vmatprep.subr.bf16.mxu1 %v2508_v1 }
 0x803   :  { %2197 = vmatpush3.bf16.msra.mxu1 %v2666_v40 }
 0x804   :  { %2198 = vmatprep.subr.bf16.mxu1 %v2508_v1 }
 0x807   :  { %2199 = vmatpush3.bf16.msra.mxu1 %v2686_v50 }
 0x808   :  { %2200 = vmatprep.subr.bf16.mxu1 %v2508_v1 }
 0x80b   :  { %2201 = vmatpush3.bf16.msra.mxu1 %v2702_v54 }
 0x80c   :  { %2226 = vmatprep.subr.bf16.mxu1 %v2508_v1 }
 0x83e   :  { %v536_v3 = vpop.permute.xlu1 %535 }
 0x83f   :  { %v538_v24 = vmul.f32 %v536_v3, %v533_v22 }
 0x841   :  { %540 = vrot.lane.b32.xlu0 %v538_v24, %s2511_s27 }
 0x8b3   :  { %v541_v25 = vpop.permute.xlu0 %540 }
 0x8b4   :  { %v543_v26 = vadd.f32 %v541_v25, %v525_v14 }
 0x8b6   :  { %2341 = vtanh.f32 %v543_v26 }
 0x8be   :  { %v741_v27 = vpop.f32.mrf.mxu1 }
 0x8bf   :  { %v742_v28 = vadd.f32 %v2617_v5, %v741_v27 }
 0x8c0   :  { %v2192_v29 = vpop.f32.mrf.mxu1 }
 0x8c1   :  { %753 = vrot.lane.b32.xlu1 %v742_v28, %s2511_s27  ;;  %v747_v34 = vadd.f32 %v742_v28, %v699_v33 }
 0x8c2   :  { %v744_v30 = vpop.f32.mrf.mxu1 }
 0x8c3   :  { %v2342_v31 = vpop.eup %2341  ;;  %v748_v35 = vmul.f32 0.5, %v747_v34 }
 0x8c4   :  { %547 = vrot.lane.b32.xlu0 %v2342_v31, %s2512_s1  ;;  %v2193_v32 = vpop.f32.mrf.mxu1 }
 0x8c5   :  { %627 = vrot.lane.b32.xlu1 %v2777_v11, %s2512_s1  ;;  %2343 = vtanh.f32 %v748_v35  ;;  %v844_v32 = vld [vmem:[#allocation2 + $0x20] sm:$0xff] }
 0x8d2   :  { %v2344_v37 = vpop.eup %2343 }
 0x8d3   :  { %v750_v38 = vmul.f32 0.5, %v2344_v37 }
 0x8d5   :  { %v751_v39 = vadd.f32 0.5, %v750_v38 }
 0x8d7   :  { %v763_v62 = vsub.f32 1.0, %v751_v39  ;;  %v769_v4 = vmul.f32 %v751_v39, %v2777_v11 }
 0x933   :  { %v754_v41 = vpop.permute.xlu1 %753 }
 0x934   :  { %v756_v42 = vmul.f32 %v754_v41, %v751_v39 }
 0x936   :  { %v548_v44 = vpop.permute.xlu0 %547  ;;  %758 = vrot.lane.b32.xlu0 %v756_v42, %s2511_s27 }
 0x937   :  { %v550_v46 = vmul.f32 %v548_v44, %v545_v43  ;;  %v628_v48 = vpop.permute.xlu1 %627 }
 0x939   :  { %v2803_v47 = vadd.f32 %v551_v45, %v550_v46 }
 0x93b   :  { %v630_v49 = vsel %vm238_vm4, %v628_v48, %v2803_v47 }
 0x93c   :  { %v631_v51 = vpack.c.bf16 %v630_v49, %v630_v49 }
 0x93e   :  { %2183 = vmatmul.mubr.msk.bf16.vlgmr.msra.gmra.mxu0 %vm342_vm5, %v631_v51 }
 0x93f   :  { %2207 = vmatpush3.bf16.msra.mxu0 %v2587_v0  ;;  %2210 = vmatprep.mubr.msk.bf16.mxu0 %vm2509_vm0, %v2508_v1 }
 0x940   :  { %2208 = vmatprep.subr.bf16.mxu0 %v2508_v1 }
 0x943   :  { %2209 = vmatpush3.bf16.msra.mxu0 %v2594_v2 }
 0x944   :  { %2214 = vmatprep.subr.bf16.mxu0 %v2508_v1 }
 0x9a8   :  { %v759_v52 = vpop.permute.xlu0 %758 }
 0x9a9   :  { %v761_v53 = vadd.f32 %v759_v52, %v699_v33 }
 0x9ab   :  { %2345 = vtanh.f32 %v761_v53 }
 0x9b8   :  { %v2346_v55 = vpop.eup %2345 }
 0x9b9   :  { %765 = vrot.lane.b32.xlu1 %v2346_v55, %s2512_s1 }
 0x9fe   :  { %v669_v56 = vpop.f32.mrf.mxu0 }
 0x9ff   :  { %v670_v57 = vadd.f32 %v2742_v23, %v669_v56 }
 0xa00   :  { %v2184_v58 = vpop.f32.mrf.mxu0 }
 0xa01   :  { %680 = vrot.lane.b32.xlu1 %v670_v57, %s2513_s18  ;;  %v675_v9 = vmul.f32 0.5, %v670_v57 }
 0xa02   :  { %v672_v59 = vpop.f32.mrf.mxu0 }
 0xa03   :  { %2347 = vtanh.f32 %v675_v9 }
 0xa04   :  { %v2185_v60 = vpop.f32.mrf.mxu0 }
 0xa10   :  { %v2348_v10 = vpop.eup %2347 }
 0xa11   :  { %v677_v12 = vmul.f32 0.5, %v2348_v10 }
 0xa13   :  { %v678_v13 = vadd.f32 0.5, %v677_v12 }
 0xa15   :  { %v690_v3 = vsub.f32 1.0, %v678_v13  ;;  %v696_v26 = vmul.f32 %v678_v13, %v2803_v47 }
 0xa2b   :  { %v766_v63 = vpop.permute.xlu1 %765 }
 0xa2c   :  { %v768_v6 = vmul.f32 %v766_v63, %v763_v62 }
 0xa2e   :  { %v2818_v7 = vadd.f32 %v769_v4, %v768_v6 }
 0xa30   :  { %v845_v8 = vpack.c.bf16 %v2818_v7, %v2818_v7 }
 0xa32   :  { %847 = vrot.lane.b32.xlu0 %v845_v8, %s2512_s1 }
 0xa73   :  { %v681_v14 = vpop.permute.xlu1 %680 }
 0xa74   :  { %v683_v15 = vmul.f32 %v681_v14, %v678_v13 }
 0xa76   :  { %685 = vrot.lane.b32.xlu0 %v683_v15, %s2511_s27 }
 0xa7a   :  { %772 = vrot.lane.b32.xlu0 %v2818_v7, %s2512_s1 }
 0xaa4   :  { %v848_v11 = vpop.permute.xlu0 %847 }
 0xaa5   :  { %2211 = vmatmul.mubr.msk.bf16.vlgmr.msra.gmra.mxu0 %vm238_vm4, %v848_v11 }
 0xaa6   :  { %2215 = vmatpush3.bf16.msra.mxu0 %v2650_v36  ;;  %2222 = vmatprep.mubr.msk.bf16.mxu0 %vm2509_vm0, %v2508_v1 }
 0xaa7   :  { %2216 = vmatprep.subr.bf16.mxu0 %v2508_v1 }
 0xaaa   :  { %2217 = vmatpush3.bf16.msra.mxu0 %v2666_v40 }
 0xaab   :  { %2218 = vmatprep.subr.bf16.mxu0 %v2508_v1 }
 0xaae   :  { %2219 = vmatpush3.bf16.msra.mxu0 %v2686_v50 }
 0xaaf   :  { %2220 = vmatprep.subr.bf16.mxu0 %v2508_v1 }
 0xab2   :  { %2221 = vmatpush3.bf16.msra.mxu0 %v2702_v54 }
 0xab3   :  { %2246 = vmatprep.subr.bf16.mxu0 %v2508_v1 }
 0xae8   :  { %v686_v16 = vpop.permute.xlu0 %685 }
 0xae9   :  { %v688_v17 = vadd.f32 %v686_v16, %v670_v57 }
 0xaeb   :  { %2349 = vtanh.f32 %v688_v17 }
 0xaec   :  { %v773_v29 = vpop.permute.xlu0 %772 }
 0xaf8   :  { %v2350_v18 = vpop.eup %2349 }
 0xaf9   :  { %692 = vrot.lane.b32.xlu1 %v2350_v18, %s2512_s1 }
 0xb65   :  { %v886_v19 = vpop.f32.mrf.mxu0 }
 0xb66   :  { %v887_v20 = vadd.f32 %v2617_v5, %v886_v19 }
 0xb67   :  { %v2212_v21 = vpop.f32.mrf.mxu0 }
 0xb68   :  { %898 = vrot.lane.b32.xlu1 %v887_v20, %s2511_s27  ;;  %v892_v33 = vadd.f32 %v887_v20, %v844_v32 }
 0xb69   :  { %v889_v22 = vpop.f32.mrf.mxu0 }
 0xb6a   :  { %v893_v34 = vmul.f32 0.5, %v892_v33 }
 0xb6b   :  { %v2213_v24 = vpop.f32.mrf.mxu0  ;;  %v693_v25 = vpop.permute.xlu1 %692 }
 0xb6c   :  { %v695_v27 = vmul.f32 %v693_v25, %v690_v3  ;;  %2351 = vtanh.f32 %v893_v34  ;;  %v989_v24 = vld [vmem:[#allocation2 + $0x28] sm:$0xff] }
 0xb6e   :  { %v2841_v28 = vadd.f32 %v696_v26, %v695_v27 }
 0xb70   :  { %v775_v30 = vsel %vm238_vm4, %v773_v29, %v2841_v28 }
 0xb71   :  { %v776_v31 = vpack.c.bf16 %v775_v30, %v775_v30 }
 0xb73   :  { %2203 = vmatmul.mubr.msk.bf16.vlgmr.msra.gmra.mxu1 %vm342_vm5, %v776_v31 }
 0xb74   :  { %2227 = vmatpush3.bf16.msra.mxu1 %v2587_v0  ;;  %2230 = vmatprep.mubr.msk.bf16.mxu1 %vm2509_vm0, %v2508_v1 }
 0xb75   :  { %2228 = vmatprep.subr.bf16.mxu1 %v2508_v1 }
 0xb78   :  { %2229 = vmatpush3.bf16.msra.mxu1 %v2594_v2 }
 0xb79   :  { %2234 = vmatprep.subr.bf16.mxu1 %v2508_v1  ;;  %v2352_v35 = vpop.eup %2351 }
 0xb7a   :  { %v895_v37 = vmul.f32 0.5, %v2352_v35 }
 0xb7c   :  { %v896_v38 = vadd.f32 0.5, %v895_v37 }
 0xb7e   :  { %v908_v53 = vsub.f32 1.0, %v896_v38  ;;  %v914_v57 = vmul.f32 %v896_v38, %v2818_v7 }
 0xbda   :  { %v899_v39 = vpop.permute.xlu1 %898 }
 0xbdb   :  { %v901_v41 = vmul.f32 %v899_v39, %v896_v38 }
 0xbdd   :  { %903 = vrot.lane.b32.xlu0 %v901_v41, %s2511_s27 }
 0xc33   :  { %v814_v42 = vpop.f32.mrf.mxu1 }
 0xc34   :  { %v815_v51 = vadd.f32 %v2742_v23, %v814_v42 }
 0xc35   :  { %v2204_v43 = vpop.f32.mrf.mxu1 }
 0xc36   :  { %v820_v52 = vmul.f32 0.5, %v815_v51 }
 0xc37   :  { %v817_v44 = vpop.f32.mrf.mxu1 }
 0xc39   :  { %v2205_v45 = vpop.f32.mrf.mxu1 }
 0xc4f   :  { %v904_v46 = vpop.permute.xlu0 %903 }
 0xc50   :  { %v906_v48 = vadd.f32 %v904_v46, %v844_v32 }
 0xc52   :  { %2353 = vtanh.f32 %v906_v48 }
 0xc53   :  { %2355 = vtanh.f32 %v820_v52 }
 0xc5f   :  { %v2354_v49 = vpop.eup %2353 }
 0xc60   :  { %910 = vrot.lane.b32.xlu1 %v2354_v49, %s2512_s1  ;;  %v2356_v55 = vpop.eup %2355 }
 0xc61   :  { %v822_v60 = vmul.f32 0.5, %v2356_v55 }
 0xc63   :  { %v823_v4 = vadd.f32 0.5, %v822_v60 }
 0xc64   :  { %825 = vrot.lane.b32.xlu1 %v815_v51, %s2513_s18 }
 0xc65   :  { %v835_v12 = vsub.f32 1.0, %v823_v4  ;;  %v841_v14 = vmul.f32 %v823_v4, %v2841_v28 }
 0xcd2   :  { %v911_v56 = vpop.permute.xlu1 %910 }
 0xcd3   :  { %v913_v58 = vmul.f32 %v911_v56, %v908_v53 }
 0xcd5   :  { %v2857_v59 = vadd.f32 %v914_v57, %v913_v58 }
 0xcd6   :  { %v826_v63 = vpop.permute.xlu1 %825 }
 0xcd7   :  { %v990_v62 = vpack.c.bf16 %v2857_v59, %v2857_v59  ;;  %v828_v6 = vmul.f32 %v826_v63, %v823_v4 }
 0xcd9   :  { %992 = vrot.lane.b32.xlu0 %v990_v62, %s2512_s1 }
 0xcdd   :  { %830 = vrot.lane.b32.xlu0 %v828_v6, %s2511_s27 }
 0xce1   :  { %917 = vrot.lane.b32.xlu0 %v2857_v59, %s2512_s1 }
 0xd4b   :  { %v993_v8 = vpop.permute.xlu0 %992 }
 0xd4c   :  { %2231 = vmatmul.mubr.msk.bf16.vlgmr.msra.gmra.mxu1 %vm238_vm4, %v993_v8 }
 0xd4d   :  { %2235 = vmatpush3.bf16.msra.mxu1 %v2650_v36  ;;  %2242 = vmatprep.mubr.msk.bf16.mxu1 %vm2509_vm0, %v2508_v1 }
 0xd4e   :  { %2236 = vmatprep.subr.bf16.mxu1 %v2508_v1 }
 0xd4f   :  { %v831_v7 = vpop.permute.xlu0 %830 }
 0xd50   :  { %v833_v9 = vadd.f32 %v831_v7, %v815_v51 }
 0xd51   :  { %2237 = vmatpush3.bf16.msra.mxu1 %v2666_v40 }
 0xd52   :  { %2357 = vtanh.f32 %v833_v9  ;;  %2238 = vmatprep.subr.bf16.mxu1 %v2508_v1 }
 0xd53   :  { %v918_v16 = vpop.permute.xlu0 %917 }
 0xd55   :  { %2239 = vmatpush3.bf16.msra.mxu1 %v2686_v50 }
 0xd56   :  { %2240 = vmatprep.subr.bf16.mxu1 %v2508_v1 }
 0xd59   :  { %2241 = vmatpush3.bf16.msra.mxu1 %v2702_v54 }
 0xd5a   :  { %2266 = vmatprep.subr.bf16.mxu1 %v2508_v1 }
 0xd5f   :  { %v2358_v10 = vpop.eup %2357 }
 0xd60   :  { %837 = vrot.lane.b32.xlu1 %v2358_v10, %s2512_s1 }
 0xdd2   :  { %v838_v13 = vpop.permute.xlu1 %837 }
 0xdd3   :  { %v840_v15 = vmul.f32 %v838_v13, %v835_v12 }
 0xdd5   :  { %v2878_v11 = vadd.f32 %v841_v14, %v840_v15 }
 0xdd7   :  { %v920_v17 = vsel %vm238_vm4, %v918_v16, %v2878_v11 }
 0xdd8   :  { %v921_v18 = vpack.c.bf16 %v920_v17, %v920_v17 }
 0xdda   :  { %2223 = vmatmul.mubr.msk.bf16.vlgmr.msra.gmra.mxu0 %vm342_vm5, %v921_v18 }
 0xddb   :  { %2247 = vmatpush3.bf16.msra.mxu0 %v2587_v0  ;;  %2250 = vmatprep.mubr.msk.bf16.mxu0 %vm2509_vm0, %v2508_v1 }
 0xddc   :  { %2248 = vmatprep.subr.bf16.mxu0 %v2508_v1 }
 0xddf   :  { %2249 = vmatpush3.bf16.msra.mxu0 %v2594_v2 }
 0xde0   :  { %2254 = vmatprep.subr.bf16.mxu0 %v2508_v1 }
 0xe0c   :  { %v1031_v19 = vpop.f32.mrf.mxu1 }
 0xe0d   :  { %v1032_v20 = vadd.f32 %v2617_v5, %v1031_v19 }
 0xe0e   :  { %v2232_v21 = vpop.f32.mrf.mxu1 }
 0xe0f   :  { %1043 = vrot.lane.b32.xlu1 %v1032_v20, %s2511_s27  ;;  %v1037_v25 = vadd.f32 %v1032_v20, %v989_v24 }
 0xe10   :  { %v1034_v22 = vpop.f32.mrf.mxu1 }
 0xe11   :  { %v1038_v26 = vmul.f32 0.5, %v1037_v25  ;;  %v1134_v22 = vld [vmem:[#allocation2 + $0x30] sm:$0xff] }
 0xe12   :  { %v2233_v3 = vpop.f32.mrf.mxu1 }
 0xe13   :  { %2359 = vtanh.f32 %v1038_v26 }
 0xe20   :  { %v2360_v27 = vpop.eup %2359 }
 0xe21   :  { %v1040_v29 = vmul.f32 0.5, %v2360_v27 }
 0xe23   :  { %v1041_v30 = vadd.f32 0.5, %v1040_v29 }
 0xe25   :  { %v1053_v51 = vsub.f32 1.0, %v1041_v30  ;;  %v1059_v53 = vmul.f32 %v1041_v30, %v2857_v59 }
 0xe81   :  { %v1044_v31 = vpop.permute.xlu1 %1043 }
 0xe82   :  { %v1046_v32 = vmul.f32 %v1044_v31, %v1041_v30 }
 0xe84   :  { %1048 = vrot.lane.b32.xlu0 %v1046_v32, %s2511_s27 }
 0xe9a   :  { %v959_v33 = vpop.f32.mrf.mxu0 }
 0xe9b   :  { %v960_v34 = vadd.f32 %v2742_v23, %v959_v33 }
 0xe9c   :  { %v2224_v35 = vpop.f32.mrf.mxu0 }
 0xe9d   :  { %970 = vrot.lane.b32.xlu0 %v960_v34, %s2513_s18  ;;  %v965_v39 = vmul.f32 0.5, %v960_v34 }
 0xe9e   :  { %v962_v37 = vpop.f32.mrf.mxu0 }
 0xea0   :  { %v2225_v38 = vpop.f32.mrf.mxu0 }
 0xef6   :  { %v1049_v41 = vpop.permute.xlu0 %1048 }
 0xef7   :  { %v1051_v42 = vadd.f32 %v1049_v41, %v989_v24 }
 0xef9   :  { %2361 = vtanh.f32 %v1051_v42 }
 0xefa   :  { %2363 = vtanh.f32 %v965_v39 }
 0xf06   :  { %v2362_v43 = vpop.eup %2361 }
 0xf07   :  { %v2364_v44 = vpop.eup %2363  ;;  %1055 = vrot.lane.b32.xlu1 %v2362_v43, %s2512_s1 }
 0xf08   :  { %v967_v45 = vmul.f32 0.5, %v2364_v44 }
 0xf0a   :  { %v968_v46 = vadd.f32 0.5, %v967_v45 }
 0xf0c   :  { %v980_v59 = vsub.f32 1.0, %v968_v46  ;;  %v986_v6 = vmul.f32 %v968_v46, %v2878_v11 }
 0xf0f   :  { %v971_v48 = vpop.permute.xlu0 %970 }
 0xf10   :  { %v973_v49 = vmul.f32 %v971_v48, %v968_v46 }
 0xf12   :  { %975 = vrot.lane.b32.xlu0 %v973_v49, %s2511_s27 }
 0xf79   :  { %v1056_v52 = vpop.permute.xlu1 %1055 }
 0xf7a   :  { %v1058_v55 = vmul.f32 %v1056_v52, %v1053_v51 }
 0xf7c   :  { %v2897_v56 = vadd.f32 %v1059_v53, %v1058_v55 }
 0xf7e   :  { %1062 = vrot.lane.b32.xlu0 %v2897_v56, %s2512_s1  ;;  %v1135_v57 = vpack.c.bf16 %v2897_v56, %v2897_v56 }
 0xf80   :  { %1137 = vrot.lane.b32.xlu1 %v1135_v57, %s2512_s1 }
 0xf84   :  { %v976_v58 = vpop.permute.xlu0 %975 }
 0xf85   :  { %v978_v60 = vadd.f32 %v976_v58, %v960_v34 }
 0xf87   :  { %2365 = vtanh.f32 %v978_v60 }
 0xf94   :  { %v2366_v62 = vpop.eup %2365 }
 0xf95   :  { %982 = vrot.lane.b32.xlu1 %v2366_v62, %s2512_s1 }
 0xff0   :  { %v1063_v9 = vpop.permute.xlu0 %1062 }
 0xff2   :  { %v1138_v63 = vpop.permute.xlu1 %1137 }
 0xff3   :  { %2251 = vmatmul.mubr.msk.bf16.vlgmr.msra.gmra.mxu0 %vm238_vm4, %v1138_v63  ;;  %v2435_v63 = vld [vmem:[%s3373_s4] ss:$0 sm:$0xff] }
 0xff4   :  { %2255 = vmatpush3.bf16.msra.mxu0 %v2650_v36  ;;  %2262 = vmatprep.mubr.msk.bf16.mxu0 %vm2509_vm0, %v2508_v1 }
 0xff5   :  { %2256 = vmatprep.subr.bf16.mxu0 %v2508_v1 }
 0xff8   :  { %2257 = vmatpush3.bf16.msra.mxu0 %v2666_v40 }
 0xff9   :  { %2258 = vmatprep.subr.bf16.mxu0 %v2508_v1 }
 0xffc   :  { %2259 = vmatpush3.bf16.msra.mxu0 %v2686_v50 }
 0xffd   :  { %2260 = vmatprep.subr.bf16.mxu0 %v2508_v1 }
0x1000   :  { %2261 = vmatpush3.bf16.msra.mxu0 %v2702_v54 }
0x1007   :  { %v983_v4 = vpop.permute.xlu1 %982 }
0x1008   :  { %v985_v8 = vmul.f32 %v983_v4, %v980_v59 }
0x100a   :  { %v2916_v7 = vadd.f32 %v986_v6, %v985_v8 }
0x100c   :  { %v1065_v10 = vsel %vm238_vm4, %v1063_v9, %v2916_v7 }
0x100d   :  { %v1066_v12 = vpack.c.bf16 %v1065_v10, %v1065_v10 }
0x100f   :  { %2243 = vmatmul.mubr.msk.bf16.vlgmr.msra.gmra.mxu1 %vm342_vm5, %v1066_v12 }
0x1010   :  { %2267 = vmatpush3.bf16.msra.mxu1 %v2587_v0  ;;  %2270 = vmatprep.mubr.msk.bf16.mxu1 %vm2509_vm0, %v2508_v1 }
0x1011   :  { %2268 = vmatprep.subr.bf16.mxu1 %v2508_v1 }
0x1014   :  { %2269 = vmatpush3.bf16.msra.mxu1 %v2594_v2 }
0x1015   :  { %2274 = vmatprep.subr.bf16.mxu1 %v2508_v1 }
0x10b3   :  { %v1176_v13 = vpop.f32.mrf.mxu0 }
0x10b4   :  { %v1177_v14 = vadd.f32 %v2617_v5, %v1176_v13 }
0x10b5   :  { %v2252_v15 = vpop.f32.mrf.mxu0 }
0x10b6   :  { %1188 = vrot.lane.b32.xlu1 %v1177_v14, %s2511_s27  ;;  %v1182_v2 = vadd.f32 %v1177_v14, %v1134_v22 }
0x10b7   :  { %v1179_v16 = vpop.f32.mrf.mxu0 }
0x10b8   :  { %v1183_v3 = vmul.f32 0.5, %v1182_v2 }
0x10b9   :  { %v2253_v17 = vpop.f32.mrf.mxu0 }
0x10ba   :  { %2367 = vtanh.f32 %v1183_v3 }
0x10c7   :  { %v2368_v24 = vpop.eup %2367 }
0x10c8   :  { %v1185_v25 = vmul.f32 0.5, %v2368_v24 }
0x10ca   :  { %v1186_v5 = vadd.f32 0.5, %v1185_v25 }
0x10cc   :  { %v1198_v43 = vsub.f32 1.0, %v1186_v5  ;;  %v1204_v45 = vmul.f32 %v1186_v5, %v2897_v56 }
0x10cf   :  { %v1104_v18 = vpop.f32.mrf.mxu1 }
0x10d0   :  { %v1105_v0 = vadd.f32 %v2742_v23, %v1104_v18 }
0x10d1   :  { %v2244_v19 = vpop.f32.mrf.mxu1 }
0x10d2   :  { %1115 = vrot.lane.b32.xlu1 %v1105_v0, %s2513_s18  ;;  %v1110_v29 = vmul.f32 0.5, %v1105_v0 }
0x10d3   :  { %v1107_v20 = vpop.f32.mrf.mxu1 }
0x10d4   :  { %2369 = vtanh.f32 %v1110_v29 }
0x10d5   :  { %v2245_v21 = vpop.f32.mrf.mxu1 }
0x10e1   :  { %v2370_v30 = vpop.eup %2369 }
0x10e2   :  { %v1112_v31 = vmul.f32 0.5, %v2370_v30 }
0x10e4   :  { %v1113_v32 = vadd.f32 0.5, %v1112_v31 }
0x10e6   :  { %v1125_v52 = vsub.f32 1.0, %v1113_v32  ;;  %v1131_v57 = vmul.f32 %v1113_v32, %v2916_v7 }
0x1128   :  { %v1189_v26 = vpop.permute.xlu1 %1188 }
0x1129   :  { %v1191_v27 = vmul.f32 %v1189_v26, %v1186_v5 }
0x112b   :  { %1193 = vrot.lane.b32.xlu0 %v1191_v27, %s2511_s27 }
0x1144   :  { %v1116_v33 = vpop.permute.xlu1 %1115 }
0x1145   :  { %v1118_v34 = vmul.f32 %v1116_v33, %v1113_v32 }
0x1147   :  { %1120 = vrot.lane.b32.xlu1 %v1118_v34, %s2511_s27 }
0x119d   :  { %v1194_v35 = vpop.permute.xlu0 %1193 }
0x119e   :  { %v1196_v37 = vadd.f32 %v1194_v35, %v1134_v22 }
0x11a0   :  { %2371 = vtanh.f32 %v1196_v37 }
0x11ad   :  { %v2372_v38 = vpop.eup %2371 }
0x11ae   :  { %1200 = vrot.lane.b32.xlu0 %v2372_v38, %s2512_s1 }
0x11b9   :  { %v1121_v39 = vpop.permute.xlu1 %1120 }
0x11ba   :  { %v1123_v41 = vadd.f32 %v1121_v39, %v1105_v0 }
0x11bc   :  { %2373 = vtanh.f32 %v1123_v41 }
0x11c9   :  { %v2374_v42 = vpop.eup %2373 }
0x11ca   :  { %1127 = vrot.lane.b32.xlu1 %v2374_v42, %s2512_s1 }
0x1220   :  { %v1201_v44 = vpop.permute.xlu0 %1200 }
0x1221   :  { %v1203_v46 = vmul.f32 %v1201_v44, %v1198_v43 }
0x1223   :  { %v2936_v48 = vadd.f32 %v1204_v45, %v1203_v46 }
0x1225   :  { %v1280_v49 = vpack.c.bf16 %v2936_v48, %v2936_v48 }
0x1227   :  { %1282 = vrot.lane.b32.xlu0 %v1280_v49, %s2512_s1 }
0x122b   :  { %1207 = vrot.lane.b32.xlu0 %v2936_v48, %s2512_s1 }
0x123c   :  { %v1128_v51 = vpop.permute.xlu1 %1127 }
0x123d   :  { %v1130_v53 = vmul.f32 %v1128_v51, %v1125_v52 }
0x123f   :  { %v2948_v56 = vadd.f32 %v1131_v57, %v1130_v53 }
0x1299   :  { %v1283_v55 = vpop.permute.xlu0 %1282 }
0x129a   :  { %2271 = vmatmul.mubr.msk.bf16.vlgmr.msra.gmra.mxu1 %vm238_vm4, %v1283_v55 }
0x129b   :  { %2275 = vmatpush3.bf16.msra.mxu1 %v2650_v36  ;;  %2282 = vmatprep.mubr.msk.bf16.mxu1 %vm2509_vm0, %v2508_v1 }
0x129c   :  { %2276 = vmatprep.subr.bf16.mxu1 %v2508_v1 }
0x129d   :  { %v1208_v58 = vpop.permute.xlu0 %1207 }
0x129e   :  { %v1210_v60 = vsel %vm238_vm4, %v1208_v58, %v2948_v56 }
0x129f   :  { %v1211_v62 = vpack.c.bf16 %v1210_v60, %v1210_v60  ;;  %2277 = vmatpush3.bf16.msra.mxu1 %v2666_v40  ;;  %v1468_v60 = vld [vmem:[%s3376_s7 + $0x10] sm:$0xff] }
0x12a0   :  { %2278 = vmatprep.subr.bf16.mxu1 %v2508_v1 }
0x12a1   :  { %2263 = vmatmul.mubr.msk.bf16.vlgmr.msra.gmra.mxu0 %vm342_vm5, %v1211_v62 }
0x12a3   :  { %2279 = vmatpush3.bf16.msra.mxu1 %v2686_v50 }
0x12a4   :  { %2280 = vmatprep.subr.bf16.mxu1 %v2508_v1 }
0x12a7   :  { %2281 = vmatpush3.bf16.msra.mxu1 %v2702_v54  ;;  %v1279_v54 = vld [vmem:[#allocation2 + $0x38] sm:$0xff] }
0x135a   :  { %v1321_v36 = vpop.f32.mrf.mxu1 }
0x135b   :  { %v1322_v59 = vadd.f32 %v2435_v63, %v1321_v36  ;;  %v1466_v36 = vld [vmem:[%s3376_s7] sm:$0xff] }
0x135c   :  { %v2272_v4 = vpop.f32.mrf.mxu1 }
0x135d   :  { %1333 = vrot.lane.b32.xlu1 %v1322_v59, %s2511_s27  ;;  %v1327_v12 = vadd.f32 %v1322_v59, %v1279_v54 }
0x135e   :  { %v1324_v40 = vpop.f32.mrf.mxu1 }
0x135f   :  { %v1328_v13 = vmul.f32 0.5, %v1327_v12 }
0x1360   :  { %v2273_v6 = vpop.f32.mrf.mxu1 }
0x1361   :  { %v1249_v8 = vpop.f32.mrf.mxu0  ;;  %2375 = vtanh.f32 %v1328_v13  ;;  %v3016_v6 = vld [vmem:[%s3369_s0] sm:$0xff]  ;;  %v3038_v13 = vld [vmem:[%s3369_s0 + $0x38] sm:$0xff] }
0x1362   :  { %v1250_v9 = vadd.f32 %v2742_v23, %v1249_v8  ;;  %v1720_v8 = vsel %vm49_vm3, %v3016_v6, -inf }
0x1363   :  { %v2264_v10 = vpop.f32.mrf.mxu0 }
0x1364   :  { %1260 = vrot.lane.b32.xlu0 %v1250_v9, %s2513_s18  ;;  %v1255_v14 = vmul.f32 0.5, %v1250_v9 }
0x1365   :  { %v1252_v1 = vpop.f32.mrf.mxu0 }
0x1366   :  { %2377 = vtanh.f32 %v1255_v14  ;;  %v1741_v14 = vsel %vm49_vm3, %v3038_v13, -inf }
0x1367   :  { %v2265_v50 = vpop.f32.mrf.mxu0 }
0x136e   :  { %v2376_v15 = vpop.eup %2375 }
0x136f   :  { %v1330_v16 = vmul.f32 0.5, %v2376_v15 }
0x1371   :  { %v1331_v18 = vadd.f32 0.5, %v1330_v16 }
0x1373   :  { %v2378_v17 = vpop.eup %2377  ;;  %v1343_v29 = vsub.f32 1.0, %v1331_v18  ;;  %v1349_v31 = vmul.f32 %v1331_v18, %v2936_v48 }
0x1374   :  { %v1257_v20 = vmul.f32 0.5, %v2378_v17 }
0x1376   :  { %v1258_v21 = vadd.f32 0.5, %v1257_v20 }
0x1378   :  { %v1270_v35 = vsub.f32 1.0, %v1258_v21  ;;  %v1276_v38 = vmul.f32 %v1258_v21, %v2948_v56 }
0x13cf   :  { %v1334_v0 = vpop.permute.xlu1 %1333 }
0x13d0   :  { %v1336_v19 = vmul.f32 %v1334_v0, %v1331_v18  ;;  %v2440_v18 = vld [vmem:[%s3369_s0 + $0x8] sm:$0xff] }
0x13d1   :  { %v1723_v0 = vsel %vm49_vm3, %v2440_v18, -inf }
0x13d2   :  { %1338 = vrot.lane.b32.xlu1 %v1336_v19, %s2511_s27  ;;  %v2441_v19 = vld [vmem:[%s3369_s0 + $0x10] sm:$0xff] }
0x13d3   :  { %v1726_v20 = vsel %vm49_vm3, %v2441_v19, -inf }
0x13d6   :  { %v1261_v22 = vpop.permute.xlu0 %1260 }
0x13d7   :  { %v1263_v2 = vmul.f32 %v1261_v22, %v1258_v21  ;;  %v3063_v21 = vld [vmem:[%s3369_s0 + $0x20] sm:$0xff] }
0x13d8   :  { %v1732_v22 = vsel %vm49_vm3, %v3063_v21, -inf }
0x13d9   :  { %1265 = vrot.lane.b32.xlu0 %v1263_v2, %s2511_s27  ;;  %v3070_v2 = vld [vmem:[%s3369_s0 + $0x30] sm:$0xff] }
0x1444   :  { %v1339_v3 = vpop.permute.xlu1 %1338 }
0x1445   :  { %v1341_v24 = vadd.f32 %v1339_v3, %v1279_v54  ;;  %v1738_v3 = vsel %vm49_vm3, %v3070_v2, -inf }
0x1447   :  { %2379 = vtanh.f32 %v1341_v24 }
0x144b   :  { %v1266_v25 = vpop.permute.xlu0 %1265 }
0x144c   :  { %v1268_v5 = vadd.f32 %v1266_v25, %v1250_v9  ;;  %v3023_v9 = vld [vmem:[%s3369_s0 + $0x18] sm:$0xff]  ;;  %v2018_v25 = vld [vmem:[%s3377_s8] ss:$0 sm:$0xff] }
0x144e   :  { %2381 = vtanh.f32 %v1268_v5 }
0x1454   :  { %v2380_v26 = vpop.eup %2379 }
0x1455   :  { %1345 = vrot.lane.b32.xlu1 %v2380_v26, %s2512_s1 }
0x145b   :  { %v2382_v27 = vpop.eup %2381 }
0x145c   :  { %1272 = vrot.lane.b32.xlu0 %v2382_v27, %s2512_s1 }
0x14c7   :  { %v1346_v30 = vpop.permute.xlu1 %1345 }
0x14c8   :  { %v1348_v32 = vmul.f32 %v1346_v30, %v1343_v29 }
0x14ca   :  { %v1350_v33 = vadd.f32 %v1349_v31, %v1348_v32 }
0x14cc   :  { %1352 = vrot.lane.b32.xlu1 %v1350_v33, %s2512_s1 }
0x14ce   :  { %v1273_v34 = vpop.permute.xlu0 %1272 }
0x14cf   :  { %v1275_v37 = vmul.f32 %v1273_v34, %v1270_v35 }
0x14d1   :  { %v2972_v39 = vadd.f32 %v1276_v38, %v1275_v37 }
0x153e   :  { %v1353_v41 = vpop.permute.xlu1 %1352 }
0x153f   :  { %v1355_v42 = vsel %vm238_vm4, %v1353_v41, %v2972_v39  ;;  %1463 = vst.msk [vmem:[#allocation5] sm:$0xff] %vm238_vm4, %v1353_v41 }
0x1540   :  { %v1356_v43 = vpack.c.bf16 %v1355_v42, %v1355_v42 }
0x1542   :  { %2283 = vmatmul.mubr.msk.bf16.vlgmr.msra.gmra.mxu1 %vm342_vm5, %v1356_v43 }
0x1602   :  { %v1394_v44 = vpop.f32.mrf.mxu1 }
0x1603   :  { %v1395_v45 = vadd.f32 %v2742_v23, %v1394_v44  ;;  %v1469_v23 = vld [vmem:[%s3376_s7 + $0x18] sm:$0xff] }
0x1604   :  { %v2284_v46 = vpop.f32.mrf.mxu1  ;;  %2286 = vmatprep.subr.mxu0 %v1469_v23 }
0x1605   :  { %1405 = vrot.lane.b32.xlu0 %v1395_v45, %s2513_s18  ;;  %v1400_v51 = vmul.f32 0.5, %v1395_v45  ;;  %2287 = vmatpush3.msra.mxu0 %v1469_v23 }
0x1606   :  { %v1397_v48 = vpop.f32.mrf.mxu1  ;;  %2288 = vmatprep.subr.mxu0 %v1468_v60 }
0x1607   :  { %2383 = vtanh.f32 %v1400_v51  ;;  %2289 = vmatpush3.msra.mxu0 %v1468_v60  ;;  %v1718_v48 = vlaneseq }
0x1608   :  { %v2285_v49 = vpop.f32.mrf.mxu1 }
0x1614   :  { %v2384_v52 = vpop.eup %2383 }
0x1615   :  { %v1402_v53 = vmul.f32 0.5, %v2384_v52  ;;  %v3104_v52 = vand.u32 127, %v1718_v48 }
0x1617   :  { %v1403_v55 = vadd.f32 0.5, %v1402_v53 }
0x1619   :  { %v1415_v10 = vsub.f32 1.0, %v1403_v55  ;;  %v1421_v50 = vmul.f32 %v1403_v55, %v2972_v39 }
0x1677   :  { %v1406_v57 = vpop.permute.xlu0 %1405 }
0x1678   :  { %v1408_v58 = vmul.f32 %v1406_v57, %v1403_v55 }
0x167a   :  { %1410 = vrot.lane.b32.xlu1 %v1408_v58, %s2511_s27 }
0x167e   :  { %1431 = vrot.lane.b32.xlu1 %v2764_v61, %s2512_s1 }
0x1682   :  { %1435 = vrot.lane.b32.xlu1 %v2841_v28, %s2512_s1 }
0x1686   :  { %1439 = vrot.lane.b32.xlu1 %v2916_v7, %s2512_s1  ;;  %v1467_v7 = vld [vmem:[%s3376_s7 + $0x8] sm:$0xff] }
0x1687   :  { %2290 = vmatprep.subr.mxu0 %v1467_v7 }
0x1688   :  { %2291 = vmatpush3.msra.mxu0 %v1467_v7 }
0x1689   :  { %2292 = vmatprep.subr.mxu0 %v1466_v36 }
0x168a   :  { %1443 = vrot.lane.b32.xlu1 %v2972_v39, %s2512_s1  ;;  %2293 = vmatpush3.msra.mxu0 %v1466_v36 }
0x16ae   :  { %1721 = vmax.xlane.f32.xlu1 %v1720_v8 }
0x16ec   :  { %v1411_v61 = vpop.permute.xlu1 %1410 }
0x16ed   :  { %v1413_v28 = vadd.f32 %v1411_v61, %v1395_v45 }
0x16ef   :  { %2385 = vtanh.f32 %v1413_v28 }
0x16f0   :  { %v1432_v62 = vpop.permute.xlu1 %1431 }
0x16f1   :  { %1455 = vst.msk [vmem:[#allocation3] sm:$0xff] %vm238_vm4, %v1432_v62  ;;  %2294 = vmatprep.mubr.msk.f32.mxu0 %vm238_vm4, %v1432_v62 }
0x16f4   :  { %v1436_v63 = vpop.permute.xlu1 %1435 }
0x16f5   :  { %1457 = vst.msk [vmem:[#allocation3 + $0x10] sm:$0xff] %vm238_vm4, %v1436_v63 }
0x16f8   :  { %v1440_v59 = vpop.permute.xlu1 %1439 }
0x16f9   :  { %1459 = vst.msk [vmem:[#allocation3 + $0x20] sm:$0xff] %vm238_vm4, %v1440_v59 }
0x16fc   :  { %v2386_v4 = vpop.eup %2385  ;;  %v1444_v40 = vpop.permute.xlu1 %1443 }
0x16fd   :  { %1461 = vst.msk [vmem:[#allocation3 + $0x30] sm:$0xff] %vm238_vm4, %v1444_v40  ;;  %1417 = vrot.lane.b32.xlu0 %v2386_v4, %s2512_s1 }
0x1701   :  { %1433 = vrot.lane.b32.xlu0 %v2803_v47, %s2512_s1  ;;  %v1729_v47 = vsel %vm49_vm3, %v3023_v9, -inf }
0x1702   :  { %1730 = vmax.xlane.f32.xlu1 %v1729_v47 }
0x1705   :  { %1437 = vrot.lane.b32.xlu0 %v2878_v11, %s2512_s1  ;;  %v3030_v11 = vld [vmem:[%s3369_s0 + $0x28] sm:$0xff] }
0x1709   :  { %1441 = vrot.lane.b32.xlu0 %v2948_v56, %s2512_s1  ;;  %v1735_v56 = vsel %vm49_vm3, %v3030_v11, -inf }
0x170a   :  { %1736 = vmax.xlane.f32.xlu1 %v1735_v56 }
0x170e   :  { %1742 = vmax.xlane.f32.xlu1 %v1741_v14 }
0x1737   :  { %v1722_v46 = vpop.xlane.xlu1 %1721 }
0x1738   :  { %vm1744_vm7 = vcmp.ge.f32.partialorder %v3016_v6, %v1722_v46 }
0x1739   :  { %v1752_v58 = vsel %vm1744_vm7, %v3104_v52, 4 }
0x173a   :  { %v3115_v28 = vsel %vm49_vm3, %v1752_v58, 2147483647 }
0x173b   :  { %v1762_v8 = vshra.s32 %v3115_v28, 16 }
0x173d   :  { %v3146_v14 = vcvt.s32.f32 %v1762_v8 }
0x176f   :  { %v1418_v1 = vpop.permute.xlu0 %1417 }
0x1770   :  { %v1420_v54 = vmul.f32 %v1418_v1, %v1415_v10 }
0x1772   :  { %v1422_v12 = vadd.f32 %v1421_v50, %v1420_v54 }
0x1773   :  { %v1434_v15 = vpop.permute.xlu0 %1433 }
0x1774   :  { %1456 = vst.msk [vmem:[#allocation3 + $0x8] sm:$0xff] %vm238_vm4, %v1434_v15  ;;  %1445 = vrot.lane.b32.xlu0 %v1422_v12, %s2512_s1  ;;  %2295 = vmatmul.mubr.msk.f32.vlgmr.msra.gmra.mxu0 %vm238_vm4, %v1434_v15  ;;  %s2515_s1 = smov [#allocation3]  }
0x1775   :  { %2297 = vmatprep.mubr.msk.f32.mxu0 %vm238_vm4, %v1436_v63  ;;  %s1941_s14 = sshll.u32 %s2515_s1, 4  ;;  %s1942_s14 = int_to_ptr.vmem [resolvable:$true] %s1941_s14 }
0x1777   :  { %v1438_v16 = vpop.permute.xlu0 %1437 }
0x1778   :  { %1458 = vst.msk [vmem:[#allocation3 + $0x18] sm:$0xff] %vm238_vm4, %v1438_v16  ;;  %2298 = vmatmul.mubr.msk.f32.gmra.mxu0 %vm238_vm4, %v1438_v16 }
0x1779   :  { %2300 = vmatprep.mubr.msk.f32.mxu0 %vm238_vm4, %v1440_v59 }
0x177b   :  { %v1442_v17 = vpop.permute.xlu0 %1441 }
0x177c   :  { %1460 = vst.msk [vmem:[#allocation3 + $0x28] sm:$0xff] %vm238_vm4, %v1442_v17  ;;  %2301 = vmatmul.mubr.msk.f32.gmra.mxu0 %vm238_vm4, %v1442_v17 }
0x177d   :  { %2303 = vmatprep.mubr.msk.f32.mxu0 %vm238_vm4, %v1444_v40 }
0x178b   :  { %v1731_v51 = vpop.xlane.xlu1 %1730 }
0x178c   :  { %vm1747_vm8 = vcmp.ge.f32.partialorder %v3023_v9, %v1731_v51 }
0x178d   :  { %v1755_v61 = vsel %vm1747_vm8, %v3104_v52, 4 }
0x178e   :  { %v3123_v4 = vsel %vm49_vm3, %v1755_v61, 2147483647 }
0x178f   :  { %v1807_v50 = vshra.s32 %v3123_v4, 16 }
0x1791   :  { %v3154_v17 = vcvt.s32.f32 %v1807_v50 }
0x1793   :  { %1724 = vmax.xlane.f32.xlu0 %v1723_v0  ;;  %v1737_v57 = vpop.xlane.xlu1 %1736 }
0x1794   :  { %vm1749_vm10 = vcmp.ge.f32.partialorder %v3030_v11, %v1737_v57 }
0x1795   :  { %v1757_v6 = vsel %vm1749_vm10, %v3104_v52, 4 }
0x1796   :  { %v3143_v12 = vsel %vm49_vm3, %v1757_v6, 2147483647 }
0x1797   :  { %1727 = vmax.xlane.f32.xlu0 %v1726_v20  ;;  %v1743_v63 = vpop.xlane.xlu1 %1742  ;;  %v1837_v0 = vshra.s32 %v3143_v12, 16 }
0x1798   :  { %vm1751_vm12 = vcmp.ge.f32.partialorder %v3038_v13, %v1743_v63 }
0x1799   :  { %v1759_v13 = vsel %vm1751_vm12, %v3104_v52, 4 }
0x179b   :  { %1733 = vmax.xlane.f32.xlu0 %v1732_v22 }
0x179f   :  { %1739 = vmax.xlane.f32.xlu0 %v1738_v3 }
0x17e6   :  { %v1446_v24 = vpop.permute.xlu0 %1445 }
0x17e7   :  { %1462 = vst.msk [vmem:[#allocation3 + $0x38] sm:$0xff] %vm238_vm4, %v1446_v24  ;;  %1465 = vst.msk [vmem:[#allocation5 + $0x8] sm:$0xff] %vm238_vm4, %v1446_v24  ;;  %2304 = vmatmul.mubr.msk.f32.gmra.mxu0 %vm238_vm4, %v1446_v24 }
0x181c   :  { %v1725_v49 = vpop.xlane.xlu0 %1724 }
0x181d   :  { %vm1745_vm6 = vcmp.ge.f32.partialorder %v2440_v18, %v1725_v49 }
0x181e   :  { %v1753_v55 = vsel %vm1745_vm6, %v3104_v52, 4 }
0x181f   :  { %v3111_v60 = vsel %vm49_vm3, %v1753_v55, 2147483647 }
0x1820   :  { %v1728_v53 = vpop.xlane.xlu0 %1727  ;;  %v1777_v36 = vshra.s32 %v3111_v60, 16 }
0x1821   :  { %vm1746_vm9 = vcmp.ge.f32.partialorder %v2441_v19, %v1728_v53  ;;  %v3159_v19 = vsel %vm49_vm3, %v1759_v13, 2147483647  ;;  %v1776_v13 = vand.u32 65535, %v3111_v60 }
0x1822   :  { %v1754_v62 = vsel %vm1746_vm9, %v3104_v52, 4  ;;  %v3136_v10 = vcvt.s32.f32 %v1777_v36  ;;  %v1867_v3 = vshra.s32 %v3159_v19, 16 }
0x1823   :  { %v3133_v56 = vsel %vm49_vm3, %v1754_v62, 2147483647 }
0x1824   :  { %v1734_v23 = vpop.xlane.xlu0 %1733  ;;  %v1792_v15 = vshra.s32 %v3133_v56, 16 }
0x1825   :  { %vm1748_vm11 = vcmp.ge.f32.partialorder %v3063_v21, %v1734_v23 }
0x1826   :  { %v1756_v1 = vsel %vm1748_vm11, %v3104_v52, 4  ;;  %v3162_v20 = vcvt.s32.f32 %v1792_v15 }
0x1827   :  { %v3151_v16 = vsel %vm49_vm3, %v1756_v1, 2147483647 }
0x1828   :  { %v1740_v9 = vpop.xlane.xlu0 %1739  ;;  %v1822_v21 = vshra.s32 %v3151_v16, 16 }
0x1829   :  { %vm1750_vm13 = vcmp.ge.f32.partialorder %v3070_v2, %v1740_v9  ;;  %v3169_v2 = vcvt.s32.f32 %v1837_v0 }
0x182a   :  { %v1758_v18 = vsel %vm1750_vm13, %v3104_v52, 4  ;;  %v3173_v24 = vcvt.s32.f32 %v1822_v21 }
0x182b   :  { %v3166_v22 = vsel %vm49_vm3, %v1758_v18, 2147483647  ;;  %v1761_v18 = vand.u32 65535, %v3115_v28  ;;  %v1791_v28 = vand.u32 65535, %v3133_v56  ;;  %v1821_v56 = vand.u32 65535, %v3151_v16 }
0x1834   :  { %v2296_v5 = vpop.f32.mrf.mxu0 }
0x1835   :  { %v3080_v26 = vadd.f32 %v2296_v5, %v2018_v25  ;;  %v3177_v5 = vcvt.s32.f32 %v1867_v3  ;;  %v1806_v3 = vand.u32 65535, %v3123_v4  ;;  %v1836_v4 = vand.u32 65535, %v3143_v12 }
0x1836   :  { %v1559_v27 = vpop.f32.mrf.mxu0 }
0x1837   :  { %v3082_v29 = vadd.f32 %v2018_v25, %v1559_v27  ;;  %v1601_v30 = vsel %vm49_vm3, %v3080_v26, -inf }
0x1838   :  { %1602 = vmax.xlane.f32.xlu1 %v1601_v30  ;;  %v2299_v31 = vpop.f32.mrf.mxu0 }
0x1839   :  { %v3086_v32 = vadd.f32 %v2299_v31, %v2018_v25  ;;  %v1598_v33 = vsel %vm49_vm3, %v3082_v29, -inf }
0x183a   :  { %1599 = vmax.xlane.f32.xlu0 %v1598_v33  ;;  %v1569_v34 = vpop.f32.mrf.mxu0 }
0x183b   :  { %v3090_v35 = vadd.f32 %v2018_v25, %v1569_v34  ;;  %v1607_v37 = vsel %vm49_vm3, %v3086_v32, -inf }
0x183c   :  { %1608 = vmax.xlane.f32.xlu1 %v1607_v37  ;;  %v2302_v38 = vpop.f32.mrf.mxu0 }
0x183d   :  { %v3094_v39 = vadd.f32 %v2302_v38, %v2018_v25  ;;  %v1604_v41 = vsel %vm49_vm3, %v3090_v35, -inf }
0x183e   :  { %1605 = vmax.xlane.f32.xlu0 %v1604_v41  ;;  %v1579_v42 = vpop.f32.mrf.mxu0 }
0x183f   :  { %v3098_v43 = vadd.f32 %v2018_v25, %v1579_v42  ;;  %v1613_v44 = vsel %vm49_vm3, %v3094_v39, -inf }
0x1840   :  { %1614 = vmax.xlane.f32.xlu1 %v1613_v44 }
0x1841   :  { %v1610_v45 = vsel %vm49_vm3, %v3098_v43, -inf }
0x1842   :  { %1611 = vmax.xlane.f32.xlu0 %v1610_v45 }
0x18a7   :  { %v2305_v7 = vpop.f32.mrf.mxu0 }
0x18a8   :  { %v3120_v59 = vadd.f32 %v2305_v7, %v2018_v25 }
0x18a9   :  { %v1589_v40 = vpop.f32.mrf.mxu0 }
0x18aa   :  { %v3128_v47 = vadd.f32 %v2018_v25, %v1589_v40  ;;  %v1619_v11 = vsel %vm49_vm3, %v3120_v59, -inf  ;;  %v1852_v25 = vshra.s32 %v3166_v22, 16 }
0x18ab   :  { %1620 = vmax.xlane.f32.xlu1 %v1619_v11 }
0x18ac   :  { %v1616_v54 = vsel %vm49_vm3, %v3128_v47, -inf  ;;  %v3180_v27 = vcvt.s32.f32 %v1852_v25  ;;  %v1778_v25 = vcvt.s32.f32 %v1776_v13 }
0x18ad   :  { %1617 = vmax.xlane.f32.xlu0 %v1616_v54 }
0x18af   :  { %1780 = vmin.xlane.f32.xlu1 %v3136_v10 }
0x18b1   :  { %1765 = vmin.xlane.f32.xlu0 %v3146_v14 }
0x18b3   :  { %1810 = vmin.xlane.f32.xlu1 %v3154_v17 }
0x18b5   :  { %1795 = vmin.xlane.f32.xlu0 %v3162_v20 }
0x18b7   :  { %1840 = vmin.xlane.f32.xlu1 %v3169_v2 }
0x18b9   :  { %1825 = vmin.xlane.f32.xlu0 %v3173_v24 }
0x18bb   :  { %1870 = vmin.xlane.f32.xlu1 %v3177_v5 }
0x18bd   :  { %1855 = vmin.xlane.f32.xlu0 %v3180_v27 }
0x18c1   :  { %v1603_v30 = vpop.xlane.xlu1 %1602 }
0x18c2   :  { %v3185_v31 = vsub.f32 %v3080_v26, %v1603_v30 }
0x18c3   :  { %v1600_v33 = vpop.xlane.xlu0 %1599 }
0x18c4   :  { %v1632_v34 = vmul.f32 1.442695, %v3185_v31  ;;  %v3189_v37 = vsub.f32 %v3082_v29, %v1600_v33 }
0x18c5   :  { %v1609_v38 = vpop.xlane.xlu1 %1608 }
0x18c6   :  { %2387 = vpow2.f32 %v1632_v34  ;;  %v1630_v41 = vmul.f32 1.442695, %v3189_v37  ;;  %v3193_v42 = vsub.f32 %v3086_v32, %v1609_v38  ;;  %v1763_v34 = vcvt.s32.f32 %v1761_v18 }
0x18c7   :  { %v1606_v44 = vpop.xlane.xlu0 %1605 }
0x18c8   :  { %2389 = vpow2.f32 %v1630_v41  ;;  %v1636_v45 = vmul.f32 1.442695, %v3193_v42  ;;  %v3197_v26 = vsub.f32 %v3090_v35, %v1606_v44  ;;  %v1808_v41 = vcvt.s32.f32 %v1806_v3 }
0x18c9   :  { %v1615_v46 = vpop.xlane.xlu1 %1614  ;;  %v1793_v44 = vcvt.s32.f32 %v1791_v28 }
0x18ca   :  { %2391 = vpow2.f32 %v1636_v45  ;;  %v1634_v48 = vmul.f32 1.442695, %v3197_v26  ;;  %v3201_v29 = vsub.f32 %v3094_v39, %v1615_v46  ;;  %v1838_v46 = vcvt.s32.f32 %v1836_v4 }
0x18cb   :  { %v1612_v49 = vpop.xlane.xlu0 %1611 }
0x18cc   :  { %2393 = vpow2.f32 %v1634_v48  ;;  %v1640_v51 = vmul.f32 1.442695, %v3201_v29  ;;  %v3205_v32 = vsub.f32 %v3098_v43, %v1612_v49  ;;  %v1823_v49 = vcvt.s32.f32 %v1821_v56 }
0x18ce   :  { %2395 = vpow2.f32 %v1640_v51  ;;  %v1638_v53 = vmul.f32 1.442695, %v3205_v32 }
0x18d0   :  { %2397 = vpow2.f32 %v1638_v53 }
0x18d3   :  { %v3208_v35 = vpop.eup %2387 }
0x18d4   :  { %v1649_v55 = vsel %vm49_vm3, %v3208_v35, 0.0 }
0x18d5   :  { %v3212_v57 = vpop.eup %2389  ;;  %1650 = vadd.xlane.f32.xlu1 %v1649_v55 }
0x18d6   :  { %v1646_v39 = vsel %vm49_vm3, %v3212_v57, 0.0 }
0x18d7   :  { %v3216_v58 = vpop.eup %2391  ;;  %1647 = vadd.xlane.f32.xlu0 %v1646_v39 }
0x18d8   :  { %v1655_v43 = vsel %vm49_vm3, %v3216_v58, 0.0 }
0x18d9   :  { %v3220_v23 = vpop.eup %2393  ;;  %1656 = vadd.xlane.f32.xlu1 %v1655_v43 }
0x18da   :  { %v1652_v61 = vsel %vm49_vm3, %v3220_v23, 0.0 }
0x18db   :  { %v3224_v7 = vpop.eup %2395  ;;  %1653 = vadd.xlane.f32.xlu0 %v1652_v61 }
0x18dc   :  { %v1661_v62 = vsel %vm49_vm3, %v3224_v7, 0.0 }
0x18dd   :  { %v3228_v36 = vpop.eup %2397  ;;  %1662 = vadd.xlane.f32.xlu1 %v1661_v62 }
0x18de   :  { %v1658_v63 = vsel %vm49_vm3, %v3228_v36, 0.0 }
0x18df   :  { %1659 = vadd.xlane.f32.xlu0 %v1658_v63 }
0x1934   :  { %v1621_v40 = vpop.xlane.xlu1 %1620 }
0x1935   :  { %v3233_v6 = vsub.f32 %v3120_v59, %v1621_v40 }
0x1936   :  { %v1618_v8 = vpop.xlane.xlu0 %1617 }
0x1937   :  { %v1644_v9 = vmul.f32 1.442695, %v3233_v6  ;;  %v3237_v11 = vsub.f32 %v3128_v47, %v1618_v8 }
0x1938   :  { %v3240_v50 = vpop.xlane.xlu1 %1780 }
0x1939   :  { %2399 = vpow2.f32 %v1644_v9  ;;  %v1642_v1 = vmul.f32 1.442695, %v3237_v11  ;;  %vm1782_vm14 = vcmp.eq.f32.partialorder %v3136_v10, %v3240_v50 }
0x193a   :  { %v3242_v54 = vpop.xlane.xlu0 %1765  ;;  %v1783_v33 = vsel %vm1782_vm14, %v1778_v25, inf }
0x193b   :  { %2401 = vpow2.f32 %v1642_v1  ;;  %vm1767_vm15 = vcmp.eq.f32.partialorder %v3146_v14, %v3242_v54 }
0x193c   :  { %v3245_v15 = vpop.xlane.xlu1 %1810  ;;  %v1768_v38 = vsel %vm1767_vm15, %v1763_v34, inf }
0x193d   :  { %vm1812_vm0 = vcmp.eq.f32.partialorder %v3154_v17, %v3245_v15  ;;  %v1866_v17 = vand.u32 65535, %v3159_v19  ;;  %v1817_v25 = vcvt.f32.s32 %v3245_v15 }
0x193e   :  { %v3250_v0 = vpop.xlane.xlu0 %1795  ;;  %v1813_v14 = vsel %vm1812_vm0, %v1808_v41, inf }
0x193f   :  { %vm1797_vm1 = vcmp.eq.f32.partialorder %v3162_v20, %v3250_v0  ;;  %v1851_v20 = vand.u32 65535, %v3166_v22  ;;  %v1868_v19 = vcvt.s32.f32 %v1866_v17  ;;  %v1802_v28 = vcvt.f32.s32 %v3250_v0 }
0x1940   :  { %v3264_v30 = vpop.xlane.xlu1 %1840  ;;  %v1798_v12 = vsel %vm1797_vm1, %v1793_v44, inf }
0x1941   :  { %vm1842_vm2 = vcmp.eq.f32.partialorder %v3169_v2, %v3264_v30  ;;  %v1853_v53 = vcvt.s32.f32 %v1851_v20  ;;  %v1803_v20 = vshll.u32 %v1802_v28, 16 }
0x1942   :  { %v3269_v10 = vpop.xlane.xlu0 %1825  ;;  %v1843_v16 = vsel %vm1842_vm2, %v1838_v46, inf }
0x1943   :  { %vm1827_vm4 = vcmp.eq.f32.partialorder %v3173_v24, %v3269_v10 }
0x1944   :  { %v3277_v45 = vpop.xlane.xlu1 %1870  ;;  %v1828_v2 = vsel %vm1827_vm4, %v1823_v49, inf }
0x1945   :  { %vm1872_vm5 = vcmp.eq.f32.partialorder %v3177_v5, %v3277_v45 }
0x1946   :  { %v3247_v59 = vpop.eup %2399  ;;  %v3282_v48 = vpop.xlane.xlu0 %1855  ;;  %v1873_v51 = vsel %vm1872_vm5, %v1868_v19, inf }
0x1947   :  { %v1667_v47 = vsel %vm49_vm3, %v3247_v59, 0.0  ;;  %vm1857_vm6 = vcmp.eq.f32.partialorder %v3180_v27, %v3282_v48 }
0x1948   :  { %v3254_v21 = vpop.eup %2401  ;;  %1668 = vadd.xlane.f32.xlu1 %v1667_v47  ;;  %v1858_v24 = vsel %vm1857_vm6, %v1853_v53, inf  ;;  %v1787_v47 = vcvt.f32.s32 %v3240_v50  ;;  %v1832_v50 = vcvt.f32.s32 %v3269_v10  ;;  %v1877_v10 = vcvt.f32.s32 %v3277_v45 }
0x1949   :  { %v1664_v60 = vsel %vm49_vm3, %v3254_v21, 0.0 }
0x194a   :  { %1665 = vadd.xlane.f32.xlu0 %v1664_v60  ;;  %v1788_v41 = vshll.u32 %v1787_v47, 16  ;;  %v1833_v19 = vshll.u32 %v1832_v50, 16 }
0x194c   :  { %1784 = vmin.xlane.f32.xlu1 %v1783_v33  ;;  %v1847_v33 = vcvt.f32.s32 %v3264_v30 }
0x194e   :  { %1769 = vmin.xlane.f32.xlu0 %v1768_v38 }
0x1950   :  { %1814 = vmin.xlane.f32.xlu1 %v1813_v14 }
0x1952   :  { %1799 = vmin.xlane.f32.xlu0 %v1798_v12 }
0x1954   :  { %1844 = vmin.xlane.f32.xlu1 %v1843_v16  ;;  %v1848_v16 = vshll.u32 %v1847_v33, 16 }
0x1956   :  { %1829 = vmin.xlane.f32.xlu0 %v1828_v2 }
0x1958   :  { %1874 = vmin.xlane.f32.xlu1 %v1873_v51 }
0x195a   :  { %1859 = vmin.xlane.f32.xlu0 %v1858_v24 }
0x195e   :  { %v1651_v22 = vpop.xlane.xlu1 %1650 }
0x195f   :  { %2403 = vrcp.f32 %v1651_v22 }
0x1960   :  { %v1648_v55 = vpop.xlane.xlu0 %1647 }
0x1961   :  { %2405 = vrcp.f32 %v1648_v55 }
0x1962   :  { %v1657_v39 = vpop.xlane.xlu1 %1656 }
0x1963   :  { %2407 = vrcp.f32 %v1657_v39 }
0x1964   :  { %v1654_v43 = vpop.xlane.xlu0 %1653 }
0x1965   :  { %2409 = vrcp.f32 %v1654_v43 }
0x1966   :  { %v1663_v5 = vpop.xlane.xlu1 %1662 }
0x1967   :  { %2411 = vrcp.f32 %v1663_v5 }
0x1968   :  { %v1660_v61 = vpop.xlane.xlu0 %1659 }
0x1969   :  { %2413 = vrcp.f32 %v1660_v61 }
0x196a   :  { %2415 = vlog2.f32 %v1651_v22 }
0x196b   :  { %2417 = vlog2.f32 %v1648_v55 }
0x196c   :  { %v2404_v62 = vpop.eup %2403  ;;  %2419 = vlog2.f32 %v1657_v39 }
0x196d   :  { %v1679_v27 = vmul.f32 %v2404_v62, %v3208_v35  ;;  %2421 = vlog2.f32 %v1654_v43 }
0x196e   :  { %v2406_v63 = vpop.eup %2405  ;;  %2423 = vlog2.f32 %v1663_v5 }
0x196f   :  { %1711 = vst.msk [vmem:[%s3380_s11 + $0x8] sm:$0xff] %vm49_vm3, %v1679_v27  ;;  %v1678_v40 = vmul.f32 %v2406_v63, %v3212_v57  ;;  %2425 = vlog2.f32 %v1660_v61 }
0x1970   :  { %v2408_v8 = vpop.eup %2407 }
0x1971   :  { %1710 = vst.msk [vmem:[%s3380_s11] sm:$0xff] %vm49_vm3, %v1678_v40  ;;  %v1681_v9 = vmul.f32 %v2408_v8, %v3216_v58 }
0x1972   :  { %v2410_v1 = vpop.eup %2409 }
0x1973   :  { %1713 = vst.msk [vmem:[%s3380_s11 + $0x18] sm:$0xff] %vm49_vm3, %v1681_v9  ;;  %v1680_v35 = vmul.f32 %v2410_v1, %v3220_v23 }
0x1974   :  { %v2412_v13 = vpop.eup %2411 }
0x1975   :  { %1712 = vst.msk [vmem:[%s3380_s11 + $0x10] sm:$0xff] %vm49_vm3, %v1680_v35  ;;  %v1683_v57 = vmul.f32 %v2412_v13, %v3224_v7  ;;  %v1878_v35 = vshll.u32 %v1877_v10, 16 }
0x1976   :  { %v2414_v18 = vpop.eup %2413 }
0x1977   :  { %1715 = vst.msk [vmem:[%s3380_s11 + $0x28] sm:$0xff] %vm49_vm3, %v1683_v57  ;;  %v1682_v58 = vmul.f32 %v2414_v18, %v3228_v36  ;;  %v2416_v7 = vpop.eup %2415  ;;  %v1772_v36 = vcvt.f32.s32 %v3242_v54  ;;  %v1818_v54 = vshll.u32 %v1817_v25, 16 }
0x1978   :  { %v2418_v60 = vpop.eup %2417  ;;  %v1689_v34 = vmul.f32 0.6931472, %v2416_v7 }
0x1979   :  { %1714 = vst.msk [vmem:[%s3380_s11 + $0x20] sm:$0xff] %vm49_vm3, %v1682_v58  ;;  %v2420_v38 = vpop.eup %2419  ;;  %v1687_v14 = vmul.f32 0.6931472, %v2418_v60  ;;  %v1773_v12 = vshll.u32 %v1772_v36, 16 }
0x197a   :  { %v2422_v17 = vpop.eup %2421  ;;  %v1693_v0 = vmul.f32 0.6931472, %v2420_v38  ;;  %v1703_v30 = vsub.f32 %v3185_v31, %v1689_v34  ;;  %v1862_v31 = vcvt.f32.s32 %v3282_v48 }
0x197b   :  { %v2424_v2 = vpop.eup %2423  ;;  %v1691_v24 = vmul.f32 0.6931472, %v2422_v17  ;;  %v1702_v39 = vsub.f32 %v3189_v37, %v1687_v14 }
0x197c   :  { %v2426_v43 = vpop.eup %2425  ;;  %v1697_v27 = vmul.f32 0.6931472, %v2424_v2  ;;  %v1705_v45 = vsub.f32 %v3193_v42, %v1693_v0  ;;  %v1863_v60 = vshll.u32 %v1862_v31, 16 }
0x197d   :  { %v1695_v13 = vmul.f32 0.6931472, %v2426_v43  ;;  %v1704_v48 = vsub.f32 %v3197_v26, %v1691_v24 }
0x197e   :  { %v1707_v28 = vsub.f32 %v3201_v29, %v1697_v27 }
0x19d1   :  { %v1669_v23 = vpop.xlane.xlu1 %1668 }
0x19d2   :  { %2427 = vrcp.f32 %v1669_v23 }
0x19d3   :  { %2429 = vlog2.f32 %v1669_v23  ;;  %v1666_v3 = vpop.xlane.xlu0 %1665 }
0x19d4   :  { %2431 = vrcp.f32 %v1666_v3 }
0x19d5   :  { %2433 = vlog2.f32 %v1666_v3  ;;  %v1785_v4 = vpop.xlane.xlu1 %1784 }
0x19d6   :  { %v1786_v56 = vcvt.f32.s32 %v1785_v4 }
0x19d7   :  { %v1770_v44 = vpop.xlane.xlu0 %1769 }
0x19d8   :  { %v1789_v46 = vadd.s32 %v1788_v41, %v1786_v56  ;;  %v1771_v15 = vcvt.f32.s32 %v1770_v44  ;;  %v1706_v56 = vsub.f32 %v3205_v32, %v1695_v13 }
0x19d9   :  { %v1815_v49 = vpop.xlane.xlu1 %1814 }
0x19da   :  { %v1774_v51 = vadd.s32 %v1773_v12, %v1771_v15  ;;  %v1816_v53 = vcvt.f32.s32 %v1815_v49  ;;  %vm1881_vm7 = vcmp.eq.s32.totalorder %v3104_v52, %v1789_v46 }
0x19db   :  { %v1800_v22 = vpop.xlane.xlu0 %1799  ;;  %v1889_v55 = vsel %vm1881_vm7, %v1703_v30, 0.0 }
0x19dc   :  { %v1819_v5 = vadd.s32 %v1818_v54, %v1816_v53  ;;  %v1801_v61 = vcvt.f32.s32 %v1800_v22  ;;  %v1899_v62 = vsel %vm49_vm3, %v1889_v55, 0.0  ;;  %vm1880_vm8 = vcmp.eq.s32.totalorder %v3104_v52, %v1774_v51 }
0x19dd   :  { %1900 = vadd.xlane.f32.xlu1 %v1899_v62  ;;  %v1845_v63 = vpop.xlane.xlu1 %1844  ;;  %v1888_v40 = vsel %vm1880_vm8, %v1702_v39, 0.0 }
0x19de   :  { %v1804_v8 = vadd.s32 %v1803_v20, %v1801_v61  ;;  %v1846_v9 = vcvt.f32.s32 %v1845_v63  ;;  %v1896_v1 = vsel %vm49_vm3, %v1888_v40, 0.0  ;;  %vm1883_vm9 = vcmp.eq.s32.totalorder %v3104_v52, %v1819_v5 }
0x19df   :  { %v2428_v37 = vpop.eup %2427  ;;  %1897 = vadd.xlane.f32.xlu0 %v1896_v1  ;;  %v1830_v57 = vpop.xlane.xlu0 %1829  ;;  %v1891_v18 = vsel %vm1883_vm9, %v1705_v45, 0.0 }
0x19e0   :  { %v2430_v58 = vpop.eup %2429  ;;  %v1685_v23 = vmul.f32 %v2428_v37, %v3247_v59  ;;  %v1849_v7 = vadd.s32 %v1848_v16, %v1846_v9  ;;  %v1831_v47 = vcvt.f32.s32 %v1830_v57  ;;  %v1905_v42 = vsel %vm49_vm3, %v1891_v18, 0.0 }
0x19e1   :  { %v2432_v3 = vpop.eup %2431  ;;  %v1701_v36 = vmul.f32 0.6931472, %v2430_v58  ;;  %1906 = vadd.xlane.f32.xlu1 %v1905_v42  ;;  %v1875_v25 = vpop.xlane.xlu1 %1874  ;;  %vm1882_vm10 = vcmp.eq.s32.totalorder %v3104_v52, %v1804_v8 }
0x19e2   :  { %v2434_v33 = vpop.eup %2433  ;;  %1717 = vst.msk [vmem:[%s3380_s11 + $0x38] sm:$0xff] %vm49_vm3, %v1685_v23  ;;  %v1684_v26 = vmul.f32 %v2432_v3, %v3254_v21  ;;  %v1834_v59 = vadd.s32 %v1833_v19, %v1831_v47  ;;  %v1876_v34 = vcvt.f32.s32 %v1875_v25  ;;  %v1890_v4 = vsel %vm1882_vm10, %v1704_v48, 0.0 }
0x19e3   :  { %v1699_v38 = vmul.f32 0.6931472, %v2434_v33  ;;  %v1902_v41 = vsel %vm49_vm3, %v1890_v4, 0.0  ;;  %v1860_v50 = vpop.xlane.xlu0 %1859  ;;  %vm1885_vm11 = vcmp.eq.s32.totalorder %v3104_v52, %v1849_v7  ;;  %v1709_v12 = vsub.f32 %v3233_v6, %v1701_v36 }
0x19e4   :  { %1716 = vst.msk [vmem:[%s3380_s11 + $0x30] sm:$0xff] %vm49_vm3, %v1684_v26  ;;  %v1879_v29 = vadd.s32 %v1878_v35, %v1876_v34  ;;  %1903 = vadd.xlane.f32.xlu0 %v1902_v41  ;;  %v1861_v14 = vcvt.f32.s32 %v1860_v50  ;;  %v1893_v21 = vsel %vm1885_vm11, %v1707_v28, 0.0  ;;  %vm1884_vm12 = vcmp.eq.s32.totalorder %v3104_v52, %v1834_v59  ;;  %s2514_s11 = smov [#allocation5]  }
0x19e5   :  { %v1911_v44 = vsel %vm49_vm3, %v1893_v21, 0.0  ;;  %v1892_v17 = vsel %vm1884_vm12, %v1706_v56, 0.0  ;;  %v1708_v15 = vsub.f32 %v3237_v11, %v1699_v38  ;;  %s1953_s13 = sshll.u32 %s2514_s11, 4  ;;  %s1954_s13 = int_to_ptr.vmem [resolvable:$true] %s1953_s13 }
0x19e6   :  { %v1864_v54 = vadd.s32 %v1863_v60, %v1861_v14  ;;  %1912 = vadd.xlane.f32.xlu1 %v1911_v44  ;;  %v1908_v32 = vsel %vm49_vm3, %v1892_v17, 0.0  ;;  %vm1887_vm13 = vcmp.eq.s32.totalorder %v3104_v52, %v1879_v29  ;;  %s2444_s15 = scalar_lea.vmem %s1954_s13, 256  ;;  %p2449_p1 = scmp.lt.s32.totalorder %s1954_s13, %s1954_s13 }
0x19e7   :  { %v1895_v46 = vsel %vm1887_vm13, %v1709_v12, 0.0  ;;  %p2445_p0 = scmp.ne.s32.totalorder %s1954_s13, %s2444_s15  ;;  %p2450_p2 = scmp.lt.s32.totalorder %s2444_s15, %s2444_s15 }
0x19e8   :  { %1909 = vadd.xlane.f32.xlu0 %v1908_v32  ;;  %v1917_v20 = vsel %vm49_vm3, %v1895_v46, 0.0  ;;  %vm1886_vm14 = vcmp.eq.s32.totalorder %v3104_v52, %v1864_v54 }
0x19e9   :  { %v1894_v16 = vsel %vm1886_vm14, %v1708_v15, 0.0  ;;  %p2451_p3 = por %p2450_p2, %p2449_p1 }
0x19ea   :  { %1918 = vadd.xlane.f32.xlu1 %v1917_v20  ;;  %v1914_v0 = vsel %vm49_vm3, %v1894_v16, 0.0 }
0x19eb   :  { %p2452_p4 = pnand %p2451_p3, %p2445_p0 }
0x19ec   :  { %1915 = vadd.xlane.f32.xlu0 %v1914_v0 }
0x19ed   :  { %2455 = shalt.err (!%p2452_p4)
}
0x19ee   :  { %s2516_s16 = smov 128   ;;  %s2517_s5 = smov 8  }
0x19ef   :  { %1959 = dma.vmem_to_hbm [thread:$0]  %s1954_s13, 256, %s3379_s10, [#allocation6], %s2516_s16, %s2516_s16, %s2517_s5  }
0x19f0   :  { %s2464_s6 = scalar_lea.vmem %s1942_s14, 1024  ;;  %p2469_p6 = scmp.lt.s32.totalorder %s1942_s14, %s1942_s14 }
0x19f1   :  { %p2465_p5 = scmp.ne.s32.totalorder %s1942_s14, %s2464_s6  ;;  %p2470_p7 = scmp.lt.s32.totalorder %s2464_s6, %s2464_s6 }
0x19f3   :  { %p2471_p8 = por %p2470_p7, %p2469_p6 }
0x19f5   :  { %p2472_p9 = pnand %p2471_p8, %p2465_p5 }
0x19f7   :  { %2475 = shalt.err (!%p2472_p9)
}
0x19f8   :  { %1947 = dma.vmem_to_hbm [thread:$0]  %s1942_s14, 1024, %s3378_s9, [#allocation4], %s2516_s16, %s2516_s16, %s2517_s5   ;;  %vm1934_vm3 = vcmask 0  }
0x19f9   :  { %s2518_s9 = smov [#allocation7]  }
0x19fa   :  { %s1968_s10 = sshll.u32 %s2518_s9, 4  ;;  %s1969_s10 = int_to_ptr.vmem [resolvable:$true] %s1968_s10 }
0x19fb   :  { %s2484_s0 = scalar_lea.vmem %s1969_s10, 16  ;;  %s2488_s8 = scalar_lea.vmem %s1969_s10, 32 }
0x19fc   :  { %p2485_p10 = scmp.ne.s32.totalorder %s1969_s10, %s2484_s0  ;;  %p2489_p11 = scmp.lt.s32.totalorder %s1969_s10, %s1969_s10 }
0x19fd   :  { %p2490_p12 = scmp.lt.s32.totalorder %s2488_s8, %s2484_s0 }
0x19ff   :  { %p2491_p13 = por %p2490_p12, %p2489_p11 }
0x1a01   :  { %p2492_p0 = pnand %p2491_p13, %p2485_p10 }
0x1a66   :  { %v1901_v52 = vpop.xlane.xlu1 %1900 }
0x1a68   :  { %v1898_v6 = vpop.xlane.xlu0 %1897 }
0x1a69   :  { %v1920_v49 = vadd.f32 %v1901_v52, %v1898_v6 }
0x1a6a   :  { %v1907_v11 = vpop.xlane.xlu1 %1906 }
0x1a6d   :  { %v1904_v30 = vpop.xlane.xlu0 %1903 }
0x1a6e   :  { %v1921_v2 = vadd.f32 %v1920_v49, %v1904_v30 }
0x1a6f   :  { %v1913_v51 = vpop.xlane.xlu1 %1912 }
0x1a70   :  { %v1922_v19 = vadd.f32 %v1921_v2, %v1907_v11 }
0x1a71   :  { %v1910_v53 = vpop.xlane.xlu0 %1909 }
0x1a72   :  { %v1923_v10 = vadd.f32 %v1922_v19, %v1910_v53 }
0x1a73   :  { %v1919_v39 = vpop.xlane.xlu1 %1918 }
0x1a74   :  { %v1924_v24 = vadd.f32 %v1923_v10, %v1913_v51 }
0x1a75   :  { %v1916_v22 = vpop.xlane.xlu0 %1915 }
0x1a76   :  { %v1925_v55 = vadd.f32 %v1924_v24, %v1916_v22 }
0x1a78   :  { %v1926_v43 = vadd.f32 %v1925_v55, %v1919_v39 }
0x1a7a   :  { %v1927_v5 = vrot.slane %v1926_v43, 4 }
0x1a7c   :  { %v1928_v61 = vadd.f32 %v1927_v5, %v1926_v43 }
0x1a7e   :  { %v1929_v62 = vrot.slane %v1928_v61, 2 }
0x1a80   :  { %v1930_v31 = vadd.f32 %v1929_v62, %v1928_v61 }
0x1a82   :  { %v1931_v27 = vrot.slane %v1930_v31, 1 }
0x1a84   :  { %v1932_v63 = vadd.f32 %v1931_v27, %v1930_v31 }
0x1a86   :  { %v1933_v40 = vsub.f32 0.0, %v1932_v63 }
0x1a88   :  { %1935 = vst.msk [vmem:[#allocation7] sm:$0x1] %vm1934_vm3, %v1933_v40 }
0x1a89   :  { %2495 = shalt.err (!%p2492_p0)
}
0x1a8a   :  { %1971 = dma.vmem_to_hbm [thread:$0]  %s1969_s10, 16, %s3381_s12, [#allocation6]  }
0x1a8b   :  { %2504 = dma.done.wait [#allocation4], 1024  }
0x1a8c   :  { %2505 = vsyncadd [#allocation4], 4294966272 }
0x1a8d   :  { %2506 = dma.done.wait [#allocation6], 272  }
0x1a8e   :  { %2507 = vsyncadd [#allocation6], 4294967024 }
0x1a8f   :  { %1983 = vsyncpa [#allocation4], 1 }
0x1a90   :  { %1984 = vsyncpa [#allocation6], 1 }

</bundles_post_ra>
